<compile_context>
chip_gen: v7x
topology: tpu7x:2x2x1
jax: 0.10.0
libtpu: 0.0.40
codegen_flags: <defaults>
</compile_context>

<pallas_src>
import jax
import jax.numpy as jnp
from jax.experimental import pallas as pl
from jax.experimental.pallas import tpu as pltpu

# ----------------------------- constants --------------------------------------------
B, C, H, W = 2, 4, 16, 16        # batch, in_channels, spatial   (in_size = (4, 16, 16))
HC = 8                           # features_encoder.out_channels (hidden channels)
Z = 16                           # z_dim
HP, WP = H + 2, W + 2            # zero-padded spatial for the 3x3 / pad=1 convs
L_PAD = HP * WP                  # 324  : flattened padded spatial extent
L_ACC = 384                      # 3*128: lane-aligned working width  (>= L_PAD)
L_IN = 512                       # 4*128: padded-input width (>= L_ACC + max tap offset 38)
TAPS = tuple(kh * WP + kw for kh in range(3) for kw in range(3))   # 3x3 tap offsets


# ----------------------------- fused Pallas kernel -----------------------------------
def _vae_fused_kernel(x_ref, noise_ref, encw_ref, encb_ref, msw_ref, msb_ref,
                      dmw_ref, dmb_ref, decw_ref, decb_ref,
                      xrec_ref, mu_ref, ls_ref, d_scr):
    """Whole VAE forward for one sample (one grid step == one batch element)."""
    # --- features_encoder: 3x3 same-conv as 9 shifted-slice GEMM taps, then ReLU ---
    xv = x_ref[0]                                                  # (C, L_IN) bf16
    acc = jnp.zeros((HC, L_ACC), jnp.float32)
    for t, off in enumerate(TAPS):
        acc = acc + jnp.dot(encw_ref[t], xv[:, off:off + L_ACC],
                            preferred_element_type=jnp.float32)
    h = jnp.maximum(acc + encb_ref[...], 0.0)                      # (HC, L_ACC) f32
    hb = h.astype(jnp.bfloat16)

    # --- mu & log_sigma2: one fused (n_features, 2*Z) projection, per-channel K blocks ---
    ms = msb_ref[...]                                              # (1, 2*Z) f32
    for c in range(HC):
        ms = ms + jnp.dot(hb[c:c + 1, :], msw_ref[c],
                          preferred_element_type=jnp.float32)
    mu = ms[:, :Z]
    ls = ms[:, Z:2 * Z]
    mu_ref[0] = mu
    ls_ref[0] = ls

    # --- reparameterization (exactly as in the reference): z = log_sigma2 * I + mu ---
    z = (ls * noise_ref[0] + mu).astype(jnp.bfloat16)              # (1, Z)

    # --- decode_MLP: z -> features, emitted directly in zero-padded decoder-conv layout ---
    for c in range(HC):
        d_scr[pl.ds(c, 1), :] = (
            jnp.dot(z, dmw_ref[c], preferred_element_type=jnp.float32)
            + dmb_ref[pl.ds(c, 1), :])
    d_feat = d_scr[...].astype(jnp.bfloat16)                       # (HC, L_ACC)

    # --- features_decoder: 3x3 same-conv (9 taps), then tanh ---
    accd = jnp.zeros((C, L_PAD), jnp.float32)
    for t, off in enumerate(TAPS):
        accd = accd + jnp.dot(decw_ref[t], d_feat[:, off:off + L_PAD],
                              preferred_element_type=jnp.float32)
    xrec_ref[0] = jnp.tanh(accd + decb_ref[...]).astype(xrec_ref.dtype)


def vae_pallas(xpe, noise, p):
    zero2 = lambda b: (0, 0)
    zero3 = lambda b: (0, 0, 0)
    return pl.pallas_call(
        _vae_fused_kernel,
        grid=(B,),
        in_specs=[
            pl.BlockSpec((1, C, L_IN), lambda b: (b, 0, 0)),        # padded input (per sample)
            pl.BlockSpec((1, 1, Z), lambda b: (b, 0, 0)),           # reparam noise (per sample)
            pl.BlockSpec((9, HC, C), zero3),                        # encoder conv taps
            pl.BlockSpec((HC, 1), zero2),                           # encoder bias
            pl.BlockSpec((HC, L_ACC, 2 * Z), zero3),                # fused mu|log_sigma2 weight
            pl.BlockSpec((1, 2 * Z), zero2),                        # fused mu|log_sigma2 bias
            pl.BlockSpec((HC, Z, L_ACC), zero3),                    # decode_MLP weight
            pl.BlockSpec((HC, L_ACC), zero2),                       # decode_MLP bias
            pl.BlockSpec((9, C, HC), zero3),                        # decoder conv taps
            pl.BlockSpec((C, 1), zero2),                            # decoder bias
        ],
        out_specs=[
            pl.BlockSpec((1, C, L_PAD), lambda b: (b, 0, 0)),       # x_rec (padded spatial)
            pl.BlockSpec((1, 1, Z), lambda b: (b, 0, 0)),           # mu
            pl.BlockSpec((1, 1, Z), lambda b: (b, 0, 0)),           # log_sigma2
        ],
        out_shape=[
            jax.ShapeDtypeStruct((B, C, L_PAD), jnp.float32),
            jax.ShapeDtypeStruct((B, 1, Z), jnp.float32),
            jax.ShapeDtypeStruct((B, 1, Z), jnp.float32),
        ],
        scratch_shapes=[pltpu.VMEM((HC, L_ACC), jnp.float32)],
        compiler_params=pltpu.CompilerParams(
            dimension_semantics=("parallel",)),
    )(xpe, noise, p["enc_w"], p["enc_b"], p["msw"], p["msb"],
      p["dmw"], p["dmb"], p["dec_w"], p["dec_b"])


# ----------------------------- host-side wrapper (tiny glue only) --------------------
def vae_forward(x_nchw, params, noise_key):
    """Mirrors VAE.forward: returns (x_rec [NCHW], mu, log_sigma2)."""
    xpad = jnp.pad(x_nchw.astype(jnp.float32), ((0, 0), (0, 0), (1, 1), (1, 1)))
    xpe = jnp.pad(xpad.reshape(B, C, L_PAD), ((0, 0), (0, 0), (0, L_IN - L_PAD)))
    xpe = xpe.astype(jnp.bfloat16)
    noise = jax.random.normal(noise_key, (B, 1, Z), jnp.float32)        # I ~ N(0, 1)

    xr_pad, mu, ls = vae_pallas(xpe, noise, params)

    x_rec = xr_pad.reshape(B, C, HP, WP)[:, :, :H, :W]                  # drop conv halo
    return x_rec, mu.reshape(B, Z), ls.reshape(B, Z)


# ----------------------------- synthetic parameters ----------------------------------
def init_params(key):
    n_features = HC * H * W          # 2048, as in the PyTorch module
    ks = jax.random.split(key, 8)

    def rnd(k, shape, fan_in):
        return jax.random.normal(k, shape, jnp.float32) / (fan_in ** 0.5)

    enc_w = rnd(ks[0], (9, HC, C), 9 * C).astype(jnp.bfloat16)
    enc_b = rnd(ks[1], (HC, 1), 9 * C)
    dec_w = rnd(ks[2], (9, C, HC), 9 * HC).astype(jnp.bfloat16)
    dec_b = rnd(ks[3], (C, 1), 9 * HC)

    # fused [mu | log_sigma2] weight: stored per encoder channel over the padded spatial
    # grid; rows at conv-halo / lane-tail positions are zero (equivalent to a plain
    # Linear(n_features -> 2*z_dim) up to a permutation of its input features).
    msw = jnp.zeros((HC, HP, WP, 2 * Z), jnp.float32)
    msw = msw.at[:, :H, :W, :].set(rnd(ks[4], (HC, H, W, 2 * Z), n_features))
    msw = jnp.pad(msw.reshape(HC, L_PAD, 2 * Z),
                  ((0, 0), (0, L_ACC - L_PAD), (0, 0))).astype(jnp.bfloat16)
    msb = rnd(ks[5], (1, 2 * Z), n_features)

    # decode_MLP weight/bias: columns placed at the *centered* padded positions (h+1, w+1)
    # and zero elsewhere, so the kernel's decode_MLP output is already the zero-padded
    # decoder-conv input (no separate pad / reshape needed).
    dmw = jnp.zeros((HC, Z, HP, WP), jnp.float32)
    dmw = dmw.at[:, :, 1:H + 1, 1:W + 1].set(rnd(ks[6], (HC, Z, H, W), Z))
    dmw = jnp.pad(dmw.reshape(HC, Z, L_PAD),
                  ((0, 0), (0, 0), (0, L_ACC - L_PAD))).astype(jnp.bfloat16)
    dmb = jnp.zeros((HC, HP, WP), jnp.float32)
    dmb = dmb.at[:, 1:H + 1, 1:W + 1].set(rnd(ks[7], (HC, H, W), Z))
    dmb = jnp.pad(dmb.reshape(HC, L_PAD), ((0, 0), (0, L_ACC - L_PAD)))

    return dict(enc_w=enc_w, enc_b=enc_b, msw=msw, msb=msb,
                dmw=dmw, dmb=dmb, dec_w=dec_w, dec_b=dec_b)


# ----------------------------- pure-JAX reference ------------------------------------
def vae_reference(x_nchw, params, noise):
    """Reference of the same module (same bf16 rounding points as the kernel)."""
    f32 = jnp.float32
    xb = x_nchw.astype(jnp.bfloat16).astype(f32)
    xpad = jnp.pad(xb, ((0, 0), (0, 0), (1, 1), (1, 1)))

    ew = params["enc_w"].astype(f32)                     # (9, HC, C)
    h = jnp.zeros((B, HC, H, W), f32)
    for kh in range(3):
        for kw in range(3):
            h = h + jnp.einsum("nc,bchw->bnhw", ew[kh * 3 + kw],
                               xpad[:, :, kh:kh + H, kw:kw + W])
    h = jnp.maximum(h + params["enc_b"].reshape(1, HC, 1, 1), 0.0)
    hb = h.astype(jnp.bfloat16).astype(f32)

    msw = params["msw"].astype(f32)[:, :L_PAD, :].reshape(HC, HP, WP, 2 * Z)[:, :H, :W, :]
    ms = jnp.einsum("bchw,chwz->bz", hb, msw) + params["msb"]
    mu, ls = ms[:, :Z], ms[:, Z:]

    z = ls * noise.reshape(B, Z) + mu                    # z = log_sigma2 * I + mu
    zb = z.astype(jnp.bfloat16).astype(f32)

    dmw = params["dmw"].astype(f32)[:, :, :L_PAD].reshape(HC, Z, HP, WP)[:, :, 1:H + 1, 1:W + 1]
    dmb = params["dmb"][:, :L_PAD].reshape(HC, HP, WP)[:, 1:H + 1, 1:W + 1]
    d = jnp.einsum("bz,czhw->bchw", zb, dmw) + dmb[None]
    db = d.astype(jnp.bfloat16).astype(f32)

    dw = params["dec_w"].astype(f32)                     # (9, C, HC)
    dpad = jnp.pad(db, ((0, 0), (0, 0), (1, 1), (1, 1)))
    xr = jnp.zeros((B, C, H, W), f32)
    for kh in range(3):
        for kw in range(3):
            xr = xr + jnp.einsum("mc,bchw->bmhw", dw[kh * 3 + kw],
                                 dpad[:, :, kh:kh + H, kw:kw + W])
    xr = jnp.tanh(xr + params["dec_b"].reshape(1, C, 1, 1))
    return xr, mu, ls


# ----------------------------- main ---------------------------------------------------
if __name__ == "__main__":
    root = jax.random.PRNGKey(0)
    k_param, k_x, k_noise = jax.random.split(root, 3)

    params = init_params(k_param)
    x = jax.random.normal(k_x, (B, C, H, W), jnp.float32)

    fwd = jax.jit(vae_forward)
    x_rec, mu, log_sigma2 = fwd(x, params, k_noise)
    jax.block_until_ready((x_rec, mu, log_sigma2))

    # --- shape / range contract of VAE.forward ---
    assert x_rec.shape == (B, C, H, W)
    assert mu.shape == (B, Z) and log_sigma2.shape == (B, Z)
    assert bool(jnp.all(jnp.abs(x_rec) <= 1.0))          # tanh output range

    # --- numerical check against a pure-JAX reference of the same module ---
    noise = jax.random.normal(k_noise, (B, 1, Z), jnp.float32)
    xr_r, mu_r, ls_r = vae_reference(x, params, noise)
    assert bool(jnp.allclose(mu, mu_r, atol=1e-2, rtol=1e-2))
    assert bool(jnp.allclose(log_sigma2, ls_r, atol=1e-2, rtol=1e-2))
    assert bool(jnp.allclose(x_rec, xr_r, atol=1e-2, rtol=1e-2))

    print("KERNEL_OK")
</pallas_src>

<mosaic_0001>
module attributes {stable_mosaic.version = 11 : i64} {
  func.func @_vae_fused_kernel(%arg0: i32, %arg1: memref<1x4x512xbf16, #tpu.memory_space<vmem>>, %arg2: memref<1x1x16xf32, #tpu.memory_space<vmem>>, %arg3: memref<9x8x4xbf16, #tpu.memory_space<vmem>>, %arg4: memref<8x1xf32, #tpu.memory_space<vmem>>, %arg5: memref<8x384x32xbf16, #tpu.memory_space<vmem>>, %arg6: memref<1x32xf32, #tpu.memory_space<vmem>>, %arg7: memref<8x16x384xbf16, #tpu.memory_space<vmem>>, %arg8: memref<8x384xf32, #tpu.memory_space<vmem>>, %arg9: memref<9x4x8xbf16, #tpu.memory_space<vmem>>, %arg10: memref<4x1xf32, #tpu.memory_space<vmem>>, %arg11: memref<1x4x324xf32, #tpu.memory_space<vmem>>, %arg12: memref<1x1x16xf32, #tpu.memory_space<vmem>>, %arg13: memref<1x1x16xf32, #tpu.memory_space<vmem>>, %arg14: memref<8x384xf32, #tpu.memory_space<vmem>>) attributes {dimension_semantics = [#tpu.dimension_semantics<parallel>], iteration_bounds = array<i64: 2>, scalar_prefetch = 0 : i64, scratch_operands = 1 : i64, tpu.core_type = #tpu.core_type<tc>, window_params = [{transform_indices = @transform_0, window_bounds = array<i64: 1, 4, 512>}, {transform_indices = @transform_1, window_bounds = array<i64: 1, 1, 16>}, {pipeline_mode = #tpu.pipeline_mode<synchronous>, transform_indices = @transform_2, window_bounds = array<i64: 9, 8, 4>}, {pipeline_mode = #tpu.pipeline_mode<synchronous>, transform_indices = @transform_3, window_bounds = array<i64: 8, 1>}, {pipeline_mode = #tpu.pipeline_mode<synchronous>, transform_indices = @transform_4, window_bounds = array<i64: 8, 384, 32>}, {pipeline_mode = #tpu.pipeline_mode<synchronous>, transform_indices = @transform_5, window_bounds = array<i64: 1, 32>}, {pipeline_mode = #tpu.pipeline_mode<synchronous>, transform_indices = @transform_6, window_bounds = array<i64: 8, 16, 384>}, {pipeline_mode = #tpu.pipeline_mode<synchronous>, transform_indices = @transform_7, window_bounds = array<i64: 8, 384>}, {pipeline_mode = #tpu.pipeline_mode<synchronous>, transform_indices = @transform_8, window_bounds = array<i64: 9, 4, 8>}, {pipeline_mode = #tpu.pipeline_mode<synchronous>, transform_indices = @transform_9, window_bounds = array<i64: 4, 1>}, {transform_indices = @transform_10, window_bounds = array<i64: 1, 4, 324>}, {transform_indices = @transform_11, window_bounds = array<i64: 1, 1, 16>}, {transform_indices = @transform_12, window_bounds = array<i64: 1, 1, 16>}]} {
    %c0 = arith.constant 0 : index
    %c0_0 = arith.constant 0 : index
    %c0_1 = arith.constant 0 : index
    %0 = vector.load %arg1[%c0, %c0_0, %c0_1] : memref<1x4x512xbf16, #tpu.memory_space<vmem>>, vector<1x4x512xbf16>
    %1 = vector.shape_cast %0 : vector<1x4x512xbf16> to vector<4x512xbf16>
    %cst = arith.constant 0.000000e+00 : f32
    %2 = vector.broadcast %cst : f32 to vector<8x384xf32>
    %c0_2 = arith.constant 0 : index
    %c0_3 = arith.constant 0 : index
    %c0_4 = arith.constant 0 : index
    %3 = vector.load %arg3[%c0_2, %c0_3, %c0_4] : memref<9x8x4xbf16, #tpu.memory_space<vmem>>, vector<1x8x4xbf16>
    %4 = vector.shape_cast %3 : vector<1x8x4xbf16> to vector<8x4xbf16>
    %5 = vector.extract_strided_slice %1 {offsets = [0, 0], sizes = [4, 384], strides = [1, 1]} : vector<4x512xbf16> to vector<4x384xbf16>
    %cst_5 = arith.constant dense<0.000000e+00> : vector<8x384xf32>
    %6 = tpu.matmul %4, %5, %cst_5 {dimension_numbers = #tpu.dot_dimension_numbers<[1], [0], [0], [1], [0, 0, 1, 1], [], []>} : vector<8x4xbf16>, vector<4x384xbf16>, vector<8x384xf32> -> vector<8x384xf32>
    %7 = arith.addf %2, %6 : vector<8x384xf32>
    %c1 = arith.constant 1 : index
    %c0_6 = arith.constant 0 : index
    %c0_7 = arith.constant 0 : index
    %8 = vector.load %arg3[%c1, %c0_6, %c0_7] : memref<9x8x4xbf16, #tpu.memory_space<vmem>>, vector<1x8x4xbf16>
    %9 = vector.shape_cast %8 : vector<1x8x4xbf16> to vector<8x4xbf16>
    %10 = vector.extract_strided_slice %1 {offsets = [0, 1], sizes = [4, 384], strides = [1, 1]} : vector<4x512xbf16> to vector<4x384xbf16>
    %cst_8 = arith.constant dense<0.000000e+00> : vector<8x384xf32>
    %11 = tpu.matmul %9, %10, %cst_8 {dimension_numbers = #tpu.dot_dimension_numbers<[1], [0], [0], [1], [0, 0, 1, 1], [], []>} : vector<8x4xbf16>, vector<4x384xbf16>, vector<8x384xf32> -> vector<8x384xf32>
    %12 = arith.addf %7, %11 : vector<8x384xf32>
    %c2 = arith.constant 2 : index
    %c0_9 = arith.constant 0 : index
    %c0_10 = arith.constant 0 : index
    %13 = vector.load %arg3[%c2, %c0_9, %c0_10] : memref<9x8x4xbf16, #tpu.memory_space<vmem>>, vector<1x8x4xbf16>
    %14 = vector.shape_cast %13 : vector<1x8x4xbf16> to vector<8x4xbf16>
    %15 = vector.extract_strided_slice %1 {offsets = [0, 2], sizes = [4, 384], strides = [1, 1]} : vector<4x512xbf16> to vector<4x384xbf16>
    %cst_11 = arith.constant dense<0.000000e+00> : vector<8x384xf32>
    %16 = tpu.matmul %14, %15, %cst_11 {dimension_numbers = #tpu.dot_dimension_numbers<[1], [0], [0], [1], [0, 0, 1, 1], [], []>} : vector<8x4xbf16>, vector<4x384xbf16>, vector<8x384xf32> -> vector<8x384xf32>
    %17 = arith.addf %12, %16 : vector<8x384xf32>
    %c3 = arith.constant 3 : index
    %c0_12 = arith.constant 0 : index
    %c0_13 = arith.constant 0 : index
    %18 = vector.load %arg3[%c3, %c0_12, %c0_13] : memref<9x8x4xbf16, #tpu.memory_space<vmem>>, vector<1x8x4xbf16>
    %19 = vector.shape_cast %18 : vector<1x8x4xbf16> to vector<8x4xbf16>
    %20 = vector.extract_strided_slice %1 {offsets = [0, 18], sizes = [4, 384], strides = [1, 1]} : vector<4x512xbf16> to vector<4x384xbf16>
    %cst_14 = arith.constant dense<0.000000e+00> : vector<8x384xf32>
    %21 = tpu.matmul %19, %20, %cst_14 {dimension_numbers = #tpu.dot_dimension_numbers<[1], [0], [0], [1], [0, 0, 1, 1], [], []>} : vector<8x4xbf16>, vector<4x384xbf16>, vector<8x384xf32> -> vector<8x384xf32>
    %22 = arith.addf %17, %21 : vector<8x384xf32>
    %c4 = arith.constant 4 : index
    %c0_15 = arith.constant 0 : index
    %c0_16 = arith.constant 0 : index
    %23 = vector.load %arg3[%c4, %c0_15, %c0_16] : memref<9x8x4xbf16, #tpu.memory_space<vmem>>, vector<1x8x4xbf16>
    %24 = vector.shape_cast %23 : vector<1x8x4xbf16> to vector<8x4xbf16>
    %25 = vector.extract_strided_slice %1 {offsets = [0, 19], sizes = [4, 384], strides = [1, 1]} : vector<4x512xbf16> to vector<4x384xbf16>
    %cst_17 = arith.constant dense<0.000000e+00> : vector<8x384xf32>
    %26 = tpu.matmul %24, %25, %cst_17 {dimension_numbers = #tpu.dot_dimension_numbers<[1], [0], [0], [1], [0, 0, 1, 1], [], []>} : vector<8x4xbf16>, vector<4x384xbf16>, vector<8x384xf32> -> vector<8x384xf32>
    %27 = arith.addf %22, %26 : vector<8x384xf32>
    %c5 = arith.constant 5 : index
    %c0_18 = arith.constant 0 : index
    %c0_19 = arith.constant 0 : index
    %28 = vector.load %arg3[%c5, %c0_18, %c0_19] : memref<9x8x4xbf16, #tpu.memory_space<vmem>>, vector<1x8x4xbf16>
    %29 = vector.shape_cast %28 : vector<1x8x4xbf16> to vector<8x4xbf16>
    %30 = vector.extract_strided_slice %1 {offsets = [0, 20], sizes = [4, 384], strides = [1, 1]} : vector<4x512xbf16> to vector<4x384xbf16>
    %cst_20 = arith.constant dense<0.000000e+00> : vector<8x384xf32>
    %31 = tpu.matmul %29, %30, %cst_20 {dimension_numbers = #tpu.dot_dimension_numbers<[1], [0], [0], [1], [0, 0, 1, 1], [], []>} : vector<8x4xbf16>, vector<4x384xbf16>, vector<8x384xf32> -> vector<8x384xf32>
    %32 = arith.addf %27, %31 : vector<8x384xf32>
    %c6 = arith.constant 6 : index
    %c0_21 = arith.constant 0 : index
    %c0_22 = arith.constant 0 : index
    %33 = vector.load %arg3[%c6, %c0_21, %c0_22] : memref<9x8x4xbf16, #tpu.memory_space<vmem>>, vector<1x8x4xbf16>
    %34 = vector.shape_cast %33 : vector<1x8x4xbf16> to vector<8x4xbf16>
    %35 = vector.extract_strided_slice %1 {offsets = [0, 36], sizes = [4, 384], strides = [1, 1]} : vector<4x512xbf16> to vector<4x384xbf16>
    %cst_23 = arith.constant dense<0.000000e+00> : vector<8x384xf32>
    %36 = tpu.matmul %34, %35, %cst_23 {dimension_numbers = #tpu.dot_dimension_numbers<[1], [0], [0], [1], [0, 0, 1, 1], [], []>} : vector<8x4xbf16>, vector<4x384xbf16>, vector<8x384xf32> -> vector<8x384xf32>
    %37 = arith.addf %32, %36 : vector<8x384xf32>
    %c7 = arith.constant 7 : index
    %c0_24 = arith.constant 0 : index
    %c0_25 = arith.constant 0 : index
    %38 = vector.load %arg3[%c7, %c0_24, %c0_25] : memref<9x8x4xbf16, #tpu.memory_space<vmem>>, vector<1x8x4xbf16>
    %39 = vector.shape_cast %38 : vector<1x8x4xbf16> to vector<8x4xbf16>
    %40 = vector.extract_strided_slice %1 {offsets = [0, 37], sizes = [4, 384], strides = [1, 1]} : vector<4x512xbf16> to vector<4x384xbf16>
    %cst_26 = arith.constant dense<0.000000e+00> : vector<8x384xf32>
    %41 = tpu.matmul %39, %40, %cst_26 {dimension_numbers = #tpu.dot_dimension_numbers<[1], [0], [0], [1], [0, 0, 1, 1], [], []>} : vector<8x4xbf16>, vector<4x384xbf16>, vector<8x384xf32> -> vector<8x384xf32>
    %42 = arith.addf %37, %41 : vector<8x384xf32>
    %c8 = arith.constant 8 : index
    %c0_27 = arith.constant 0 : index
    %c0_28 = arith.constant 0 : index
    %43 = vector.load %arg3[%c8, %c0_27, %c0_28] : memref<9x8x4xbf16, #tpu.memory_space<vmem>>, vector<1x8x4xbf16>
    %44 = vector.shape_cast %43 : vector<1x8x4xbf16> to vector<8x4xbf16>
    %45 = vector.extract_strided_slice %1 {offsets = [0, 38], sizes = [4, 384], strides = [1, 1]} : vector<4x512xbf16> to vector<4x384xbf16>
    %cst_29 = arith.constant dense<0.000000e+00> : vector<8x384xf32>
    %46 = tpu.matmul %44, %45, %cst_29 {dimension_numbers = #tpu.dot_dimension_numbers<[1], [0], [0], [1], [0, 0, 1, 1], [], []>} : vector<8x4xbf16>, vector<4x384xbf16>, vector<8x384xf32> -> vector<8x384xf32>
    %47 = arith.addf %42, %46 : vector<8x384xf32>
    %c0_30 = arith.constant 0 : index
    %c0_31 = arith.constant 0 : index
    %48 = vector.load %arg4[%c0_30, %c0_31] : memref<8x1xf32, #tpu.memory_space<vmem>>, vector<8x1xf32>
    %49 = vector.broadcast %48 : vector<8x1xf32> to vector<8x384xf32>
    %50 = arith.addf %47, %49 : vector<8x384xf32>
    %cst_32 = arith.constant 0.000000e+00 : f32
    %51 = vector.broadcast %cst_32 : f32 to vector<8x384xf32>
    %52 = arith.maximumf %50, %51 : vector<8x384xf32>
    %53 = arith.truncf %52 : vector<8x384xf32> to vector<8x384xbf16>
    %c0_33 = arith.constant 0 : index
    %c0_34 = arith.constant 0 : index
    %54 = vector.load %arg6[%c0_33, %c0_34] : memref<1x32xf32, #tpu.memory_space<vmem>>, vector<1x32xf32>
    %55 = vector.extract_strided_slice %53 {offsets = [0, 0], sizes = [1, 384], strides = [1, 1]} : vector<8x384xbf16> to vector<1x384xbf16>
    %c0_35 = arith.constant 0 : index
    %c0_36 = arith.constant 0 : index
    %c0_37 = arith.constant 0 : index
    %56 = vector.load %arg5[%c0_35, %c0_36, %c0_37] : memref<8x384x32xbf16, #tpu.memory_space<vmem>>, vector<1x384x32xbf16>
    %57 = vector.shape_cast %56 : vector<1x384x32xbf16> to vector<384x32xbf16>
    %cst_38 = arith.constant dense<0.000000e+00> : vector<1x32xf32>
    %58 = tpu.matmul %55, %57, %cst_38 {dimension_numbers = #tpu.dot_dimension_numbers<[1], [0], [0], [1], [0, 0, 1, 1], [], []>} : vector<1x384xbf16>, vector<384x32xbf16>, vector<1x32xf32> -> vector<1x32xf32>
    %59 = arith.addf %54, %58 : vector<1x32xf32>
    %60 = vector.extract_strided_slice %53 {offsets = [1, 0], sizes = [1, 384], strides = [1, 1]} : vector<8x384xbf16> to vector<1x384xbf16>
    %c1_39 = arith.constant 1 : index
    %c0_40 = arith.constant 0 : index
    %c0_41 = arith.constant 0 : index
    %61 = vector.load %arg5[%c1_39, %c0_40, %c0_41] : memref<8x384x32xbf16, #tpu.memory_space<vmem>>, vector<1x384x32xbf16>
    %62 = vector.shape_cast %61 : vector<1x384x32xbf16> to vector<384x32xbf16>
    %cst_42 = arith.constant dense<0.000000e+00> : vector<1x32xf32>
    %63 = tpu.matmul %60, %62, %cst_42 {dimension_numbers = #tpu.dot_dimension_numbers<[1], [0], [0], [1], [0, 0, 1, 1], [], []>} : vector<1x384xbf16>, vector<384x32xbf16>, vector<1x32xf32> -> vector<1x32xf32>
    %64 = arith.addf %59, %63 : vector<1x32xf32>
    %65 = vector.extract_strided_slice %53 {offsets = [2, 0], sizes = [1, 384], strides = [1, 1]} : vector<8x384xbf16> to vector<1x384xbf16>
    %c2_43 = arith.constant 2 : index
    %c0_44 = arith.constant 0 : index
    %c0_45 = arith.constant 0 : index
    %66 = vector.load %arg5[%c2_43, %c0_44, %c0_45] : memref<8x384x32xbf16, #tpu.memory_space<vmem>>, vector<1x384x32xbf16>
    %67 = vector.shape_cast %66 : vector<1x384x32xbf16> to vector<384x32xbf16>
    %cst_46 = arith.constant dense<0.000000e+00> : vector<1x32xf32>
    %68 = tpu.matmul %65, %67, %cst_46 {dimension_numbers = #tpu.dot_dimension_numbers<[1], [0], [0], [1], [0, 0, 1, 1], [], []>} : vector<1x384xbf16>, vector<384x32xbf16>, vector<1x32xf32> -> vector<1x32xf32>
    %69 = arith.addf %64, %68 : vector<1x32xf32>
    %70 = vector.extract_strided_slice %53 {offsets = [3, 0], sizes = [1, 384], strides = [1, 1]} : vector<8x384xbf16> to vector<1x384xbf16>
    %c3_47 = arith.constant 3 : index
    %c0_48 = arith.constant 0 : index
    %c0_49 = arith.constant 0 : index
    %71 = vector.load %arg5[%c3_47, %c0_48, %c0_49] : memref<8x384x32xbf16, #tpu.memory_space<vmem>>, vector<1x384x32xbf16>
    %72 = vector.shape_cast %71 : vector<1x384x32xbf16> to vector<384x32xbf16>
    %cst_50 = arith.constant dense<0.000000e+00> : vector<1x32xf32>
    %73 = tpu.matmul %70, %72, %cst_50 {dimension_numbers = #tpu.dot_dimension_numbers<[1], [0], [0], [1], [0, 0, 1, 1], [], []>} : vector<1x384xbf16>, vector<384x32xbf16>, vector<1x32xf32> -> vector<1x32xf32>
    %74 = arith.addf %69, %73 : vector<1x32xf32>
    %75 = vector.extract_strided_slice %53 {offsets = [4, 0], sizes = [1, 384], strides = [1, 1]} : vector<8x384xbf16> to vector<1x384xbf16>
    %c4_51 = arith.constant 4 : index
    %c0_52 = arith.constant 0 : index
    %c0_53 = arith.constant 0 : index
    %76 = vector.load %arg5[%c4_51, %c0_52, %c0_53] : memref<8x384x32xbf16, #tpu.memory_space<vmem>>, vector<1x384x32xbf16>
    %77 = vector.shape_cast %76 : vector<1x384x32xbf16> to vector<384x32xbf16>
    %cst_54 = arith.constant dense<0.000000e+00> : vector<1x32xf32>
    %78 = tpu.matmul %75, %77, %cst_54 {dimension_numbers = #tpu.dot_dimension_numbers<[1], [0], [0], [1], [0, 0, 1, 1], [], []>} : vector<1x384xbf16>, vector<384x32xbf16>, vector<1x32xf32> -> vector<1x32xf32>
    %79 = arith.addf %74, %78 : vector<1x32xf32>
    %80 = vector.extract_strided_slice %53 {offsets = [5, 0], sizes = [1, 384], strides = [1, 1]} : vector<8x384xbf16> to vector<1x384xbf16>
    %c5_55 = arith.constant 5 : index
    %c0_56 = arith.constant 0 : index
    %c0_57 = arith.constant 0 : index
    %81 = vector.load %arg5[%c5_55, %c0_56, %c0_57] : memref<8x384x32xbf16, #tpu.memory_space<vmem>>, vector<1x384x32xbf16>
    %82 = vector.shape_cast %81 : vector<1x384x32xbf16> to vector<384x32xbf16>
    %cst_58 = arith.constant dense<0.000000e+00> : vector<1x32xf32>
    %83 = tpu.matmul %80, %82, %cst_58 {dimension_numbers = #tpu.dot_dimension_numbers<[1], [0], [0], [1], [0, 0, 1, 1], [], []>} : vector<1x384xbf16>, vector<384x32xbf16>, vector<1x32xf32> -> vector<1x32xf32>
    %84 = arith.addf %79, %83 : vector<1x32xf32>
    %85 = vector.extract_strided_slice %53 {offsets = [6, 0], sizes = [1, 384], strides = [1, 1]} : vector<8x384xbf16> to vector<1x384xbf16>
    %c6_59 = arith.constant 6 : index
    %c0_60 = arith.constant 0 : index
    %c0_61 = arith.constant 0 : index
    %86 = vector.load %arg5[%c6_59, %c0_60, %c0_61] : memref<8x384x32xbf16, #tpu.memory_space<vmem>>, vector<1x384x32xbf16>
    %87 = vector.shape_cast %86 : vector<1x384x32xbf16> to vector<384x32xbf16>
    %cst_62 = arith.constant dense<0.000000e+00> : vector<1x32xf32>
    %88 = tpu.matmul %85, %87, %cst_62 {dimension_numbers = #tpu.dot_dimension_numbers<[1], [0], [0], [1], [0, 0, 1, 1], [], []>} : vector<1x384xbf16>, vector<384x32xbf16>, vector<1x32xf32> -> vector<1x32xf32>
    %89 = arith.addf %84, %88 : vector<1x32xf32>
    %90 = vector.extract_strided_slice %53 {offsets = [7, 0], sizes = [1, 384], strides = [1, 1]} : vector<8x384xbf16> to vector<1x384xbf16>
    %c7_63 = arith.constant 7 : index
    %c0_64 = arith.constant 0 : index
    %c0_65 = arith.constant 0 : index
    %91 = vector.load %arg5[%c7_63, %c0_64, %c0_65] : memref<8x384x32xbf16, #tpu.memory_space<vmem>>, vector<1x384x32xbf16>
    %92 = vector.shape_cast %91 : vector<1x384x32xbf16> to vector<384x32xbf16>
    %cst_66 = arith.constant dense<0.000000e+00> : vector<1x32xf32>
    %93 = tpu.matmul %90, %92, %cst_66 {dimension_numbers = #tpu.dot_dimension_numbers<[1], [0], [0], [1], [0, 0, 1, 1], [], []>} : vector<1x384xbf16>, vector<384x32xbf16>, vector<1x32xf32> -> vector<1x32xf32>
    %94 = arith.addf %89, %93 : vector<1x32xf32>
    %95 = vector.extract_strided_slice %94 {offsets = [0, 0], sizes = [1, 16], strides = [1, 1]} : vector<1x32xf32> to vector<1x16xf32>
    %96 = vector.extract_strided_slice %94 {offsets = [0, 16], sizes = [1, 16], strides = [1, 1]} : vector<1x32xf32> to vector<1x16xf32>
    %c0_67 = arith.constant 0 : index
    %c0_68 = arith.constant 0 : index
    %c0_69 = arith.constant 0 : index
    %97 = vector.load %arg12[%c0_67, %c0_68, %c0_69] : memref<1x1x16xf32, #tpu.memory_space<vmem>>, vector<1x1x16xf32>
    %98 = vector.shape_cast %97 : vector<1x1x16xf32> to vector<1x16xf32>
    %99 = vector.shape_cast %95 : vector<1x16xf32> to vector<1x1x16xf32>
    tpu.vector_store %arg12[%c0_67, %c0_68, %c0_69], %99 {strides = array<i32>} : memref<1x1x16xf32, #tpu.memory_space<vmem>>, vector<1x1x16xf32>,
    %c0_70 = arith.constant 0 : index
    %c0_71 = arith.constant 0 : index
    %c0_72 = arith.constant 0 : index
    %100 = vector.load %arg13[%c0_70, %c0_71, %c0_72] : memref<1x1x16xf32, #tpu.memory_space<vmem>>, vector<1x1x16xf32>
    %101 = vector.shape_cast %100 : vector<1x1x16xf32> to vector<1x16xf32>
    %102 = vector.shape_cast %96 : vector<1x16xf32> to vector<1x1x16xf32>
    tpu.vector_store %arg13[%c0_70, %c0_71, %c0_72], %102 {strides = array<i32>} : memref<1x1x16xf32, #tpu.memory_space<vmem>>, vector<1x1x16xf32>,
    %c0_73 = arith.constant 0 : index
    %c0_74 = arith.constant 0 : index
    %c0_75 = arith.constant 0 : index
    %103 = vector.load %arg2[%c0_73, %c0_74, %c0_75] : memref<1x1x16xf32, #tpu.memory_space<vmem>>, vector<1x1x16xf32>
    %104 = vector.shape_cast %103 : vector<1x1x16xf32> to vector<1x16xf32>
    %105 = arith.mulf %96, %104 : vector<1x16xf32>
    %106 = arith.addf %105, %95 : vector<1x16xf32>
    %107 = arith.truncf %106 : vector<1x16xf32> to vector<1x16xbf16>
    %c0_76 = arith.constant 0 : index
    %c0_77 = arith.constant 0 : index
    %c0_78 = arith.constant 0 : index
    %108 = vector.load %arg7[%c0_76, %c0_77, %c0_78] : memref<8x16x384xbf16, #tpu.memory_space<vmem>>, vector<1x16x384xbf16>
    %109 = vector.shape_cast %108 : vector<1x16x384xbf16> to vector<16x384xbf16>
    %cst_79 = arith.constant dense<0.000000e+00> : vector<1x384xf32>
    %110 = tpu.matmul %107, %109, %cst_79 {dimension_numbers = #tpu.dot_dimension_numbers<[1], [0], [0], [1], [0, 0, 1, 1], [], []>} : vector<1x16xbf16>, vector<16x384xbf16>, vector<1x384xf32> -> vector<1x384xf32>
    %c0_80 = arith.constant 0 : index
    %c0_81 = arith.constant 0 : index
    %111 = vector.load %arg8[%c0_80, %c0_81] : memref<8x384xf32, #tpu.memory_space<vmem>>, vector<1x384xf32>
    %112 = arith.addf %110, %111 : vector<1x384xf32>
    %c0_82 = arith.constant 0 : index
    %c0_83 = arith.constant 0 : index
    %113 = vector.load %arg14[%c0_82, %c0_83] : memref<8x384xf32, #tpu.memory_space<vmem>>, vector<1x384xf32>
    tpu.vector_store %arg14[%c0_82, %c0_83], %112 {strides = array<i32>} : memref<8x384xf32, #tpu.memory_space<vmem>>, vector<1x384xf32>,
    %c1_84 = arith.constant 1 : index
    %c0_85 = arith.constant 0 : index
    %c0_86 = arith.constant 0 : index
    %114 = vector.load %arg7[%c1_84, %c0_85, %c0_86] : memref<8x16x384xbf16, #tpu.memory_space<vmem>>, vector<1x16x384xbf16>
    %115 = vector.shape_cast %114 : vector<1x16x384xbf16> to vector<16x384xbf16>
    %cst_87 = arith.constant dense<0.000000e+00> : vector<1x384xf32>
    %116 = tpu.matmul %107, %115, %cst_87 {dimension_numbers = #tpu.dot_dimension_numbers<[1], [0], [0], [1], [0, 0, 1, 1], [], []>} : vector<1x16xbf16>, vector<16x384xbf16>, vector<1x384xf32> -> vector<1x384xf32>
    %c1_88 = arith.constant 1 : index
    %c0_89 = arith.constant 0 : index
    %117 = vector.load %arg8[%c1_88, %c0_89] : memref<8x384xf32, #tpu.memory_space<vmem>>, vector<1x384xf32>
    %118 = arith.addf %116, %117 : vector<1x384xf32>
    %c1_90 = arith.constant 1 : index
    %c0_91 = arith.constant 0 : index
    %119 = vector.load %arg14[%c1_90, %c0_91] : memref<8x384xf32, #tpu.memory_space<vmem>>, vector<1x384xf32>
    tpu.vector_store %arg14[%c1_90, %c0_91], %118 {strides = array<i32>} : memref<8x384xf32, #tpu.memory_space<vmem>>, vector<1x384xf32>,
    %c2_92 = arith.constant 2 : index
    %c0_93 = arith.constant 0 : index
    %c0_94 = arith.constant 0 : index
    %120 = vector.load %arg7[%c2_92, %c0_93, %c0_94] : memref<8x16x384xbf16, #tpu.memory_space<vmem>>, vector<1x16x384xbf16>
    %121 = vector.shape_cast %120 : vector<1x16x384xbf16> to vector<16x384xbf16>
    %cst_95 = arith.constant dense<0.000000e+00> : vector<1x384xf32>
    %122 = tpu.matmul %107, %121, %cst_95 {dimension_numbers = #tpu.dot_dimension_numbers<[1], [0], [0], [1], [0, 0, 1, 1], [], []>} : vector<1x16xbf16>, vector<16x384xbf16>, vector<1x384xf32> -> vector<1x384xf32>
    %c2_96 = arith.constant 2 : index
    %c0_97 = arith.constant 0 : index
    %123 = vector.load %arg8[%c2_96, %c0_97] : memref<8x384xf32, #tpu.memory_space<vmem>>, vector<1x384xf32>
    %124 = arith.addf %122, %123 : vector<1x384xf32>
    %c2_98 = arith.constant 2 : index
    %c0_99 = arith.constant 0 : index
    %125 = vector.load %arg14[%c2_98, %c0_99] : memref<8x384xf32, #tpu.memory_space<vmem>>, vector<1x384xf32>
    tpu.vector_store %arg14[%c2_98, %c0_99], %124 {strides = array<i32>} : memref<8x384xf32, #tpu.memory_space<vmem>>, vector<1x384xf32>,
    %c3_100 = arith.constant 3 : index
    %c0_101 = arith.constant 0 : index
    %c0_102 = arith.constant 0 : index
    %126 = vector.load %arg7[%c3_100, %c0_101, %c0_102] : memref<8x16x384xbf16, #tpu.memory_space<vmem>>, vector<1x16x384xbf16>
    %127 = vector.shape_cast %126 : vector<1x16x384xbf16> to vector<16x384xbf16>
    %cst_103 = arith.constant dense<0.000000e+00> : vector<1x384xf32>
    %128 = tpu.matmul %107, %127, %cst_103 {dimension_numbers = #tpu.dot_dimension_numbers<[1], [0], [0], [1], [0, 0, 1, 1], [], []>} : vector<1x16xbf16>, vector<16x384xbf16>, vector<1x384xf32> -> vector<1x384xf32>
    %c3_104 = arith.constant 3 : index
    %c0_105 = arith.constant 0 : index
    %129 = vector.load %arg8[%c3_104, %c0_105] : memref<8x384xf32, #tpu.memory_space<vmem>>, vector<1x384xf32>
    %130 = arith.addf %128, %129 : vector<1x384xf32>
    %c3_106 = arith.constant 3 : index
    %c0_107 = arith.constant 0 : index
    %131 = vector.load %arg14[%c3_106, %c0_107] : memref<8x384xf32, #tpu.memory_space<vmem>>, vector<1x384xf32>
    tpu.vector_store %arg14[%c3_106, %c0_107], %130 {strides = array<i32>} : memref<8x384xf32, #tpu.memory_space<vmem>>, vector<1x384xf32>,
    %c4_108 = arith.constant 4 : index
    %c0_109 = arith.constant 0 : index
    %c0_110 = arith.constant 0 : index
    %132 = vector.load %arg7[%c4_108, %c0_109, %c0_110] : memref<8x16x384xbf16, #tpu.memory_space<vmem>>, vector<1x16x384xbf16>
    %133 = vector.shape_cast %132 : vector<1x16x384xbf16> to vector<16x384xbf16>
    %cst_111 = arith.constant dense<0.000000e+00> : vector<1x384xf32>
    %134 = tpu.matmul %107, %133, %cst_111 {dimension_numbers = #tpu.dot_dimension_numbers<[1], [0], [0], [1], [0, 0, 1, 1], [], []>} : vector<1x16xbf16>, vector<16x384xbf16>, vector<1x384xf32> -> vector<1x384xf32>
    %c4_112 = arith.constant 4 : index
    %c0_113 = arith.constant 0 : index
    %135 = vector.load %arg8[%c4_112, %c0_113] : memref<8x384xf32, #tpu.memory_space<vmem>>, vector<1x384xf32>
    %136 = arith.addf %134, %135 : vector<1x384xf32>
    %c4_114 = arith.constant 4 : index
    %c0_115 = arith.constant 0 : index
    %137 = vector.load %arg14[%c4_114, %c0_115] : memref<8x384xf32, #tpu.memory_space<vmem>>, vector<1x384xf32>
    tpu.vector_store %arg14[%c4_114, %c0_115], %136 {strides = array<i32>} : memref<8x384xf32, #tpu.memory_space<vmem>>, vector<1x384xf32>,
    %c5_116 = arith.constant 5 : index
    %c0_117 = arith.constant 0 : index
    %c0_118 = arith.constant 0 : index
    %138 = vector.load %arg7[%c5_116, %c0_117, %c0_118] : memref<8x16x384xbf16, #tpu.memory_space<vmem>>, vector<1x16x384xbf16>
    %139 = vector.shape_cast %138 : vector<1x16x384xbf16> to vector<16x384xbf16>
    %cst_119 = arith.constant dense<0.000000e+00> : vector<1x384xf32>
    %140 = tpu.matmul %107, %139, %cst_119 {dimension_numbers = #tpu.dot_dimension_numbers<[1], [0], [0], [1], [0, 0, 1, 1], [], []>} : vector<1x16xbf16>, vector<16x384xbf16>, vector<1x384xf32> -> vector<1x384xf32>
    %c5_120 = arith.constant 5 : index
    %c0_121 = arith.constant 0 : index
    %141 = vector.load %arg8[%c5_120, %c0_121] : memref<8x384xf32, #tpu.memory_space<vmem>>, vector<1x384xf32>
    %142 = arith.addf %140, %141 : vector<1x384xf32>
    %c5_122 = arith.constant 5 : index
    %c0_123 = arith.constant 0 : index
    %143 = vector.load %arg14[%c5_122, %c0_123] : memref<8x384xf32, #tpu.memory_space<vmem>>, vector<1x384xf32>
    tpu.vector_store %arg14[%c5_122, %c0_123], %142 {strides = array<i32>} : memref<8x384xf32, #tpu.memory_space<vmem>>, vector<1x384xf32>,
    %c6_124 = arith.constant 6 : index
    %c0_125 = arith.constant 0 : index
    %c0_126 = arith.constant 0 : index
    %144 = vector.load %arg7[%c6_124, %c0_125, %c0_126] : memref<8x16x384xbf16, #tpu.memory_space<vmem>>, vector<1x16x384xbf16>
    %145 = vector.shape_cast %144 : vector<1x16x384xbf16> to vector<16x384xbf16>
    %cst_127 = arith.constant dense<0.000000e+00> : vector<1x384xf32>
    %146 = tpu.matmul %107, %145, %cst_127 {dimension_numbers = #tpu.dot_dimension_numbers<[1], [0], [0], [1], [0, 0, 1, 1], [], []>} : vector<1x16xbf16>, vector<16x384xbf16>, vector<1x384xf32> -> vector<1x384xf32>
    %c6_128 = arith.constant 6 : index
    %c0_129 = arith.constant 0 : index
    %147 = vector.load %arg8[%c6_128, %c0_129] : memref<8x384xf32, #tpu.memory_space<vmem>>, vector<1x384xf32>
    %148 = arith.addf %146, %147 : vector<1x384xf32>
    %c6_130 = arith.constant 6 : index
    %c0_131 = arith.constant 0 : index
    %149 = vector.load %arg14[%c6_130, %c0_131] : memref<8x384xf32, #tpu.memory_space<vmem>>, vector<1x384xf32>
    tpu.vector_store %arg14[%c6_130, %c0_131], %148 {strides = array<i32>} : memref<8x384xf32, #tpu.memory_space<vmem>>, vector<1x384xf32>,
    %c7_132 = arith.constant 7 : index
    %c0_133 = arith.constant 0 : index
    %c0_134 = arith.constant 0 : index
    %150 = vector.load %arg7[%c7_132, %c0_133, %c0_134] : memref<8x16x384xbf16, #tpu.memory_space<vmem>>, vector<1x16x384xbf16>
    %151 = vector.shape_cast %150 : vector<1x16x384xbf16> to vector<16x384xbf16>
    %cst_135 = arith.constant dense<0.000000e+00> : vector<1x384xf32>
    %152 = tpu.matmul %107, %151, %cst_135 {dimension_numbers = #tpu.dot_dimension_numbers<[1], [0], [0], [1], [0, 0, 1, 1], [], []>} : vector<1x16xbf16>, vector<16x384xbf16>, vector<1x384xf32> -> vector<1x384xf32>
    %c7_136 = arith.constant 7 : index
    %c0_137 = arith.constant 0 : index
    %153 = vector.load %arg8[%c7_136, %c0_137] : memref<8x384xf32, #tpu.memory_space<vmem>>, vector<1x384xf32>
    %154 = arith.addf %152, %153 : vector<1x384xf32>
    %c7_138 = arith.constant 7 : index
    %c0_139 = arith.constant 0 : index
    %155 = vector.load %arg14[%c7_138, %c0_139] : memref<8x384xf32, #tpu.memory_space<vmem>>, vector<1x384xf32>
    tpu.vector_store %arg14[%c7_138, %c0_139], %154 {strides = array<i32>} : memref<8x384xf32, #tpu.memory_space<vmem>>, vector<1x384xf32>,
    %c0_140 = arith.constant 0 : index
    %c0_141 = arith.constant 0 : index
    %156 = vector.load %arg14[%c0_140, %c0_141] : memref<8x384xf32, #tpu.memory_space<vmem>>, vector<8x384xf32>
    %157 = arith.truncf %156 : vector<8x384xf32> to vector<8x384xbf16>
    %cst_142 = arith.constant 0.000000e+00 : f32
    %158 = vector.broadcast %cst_142 : f32 to vector<4x324xf32>
    %c0_143 = arith.constant 0 : index
    %c0_144 = arith.constant 0 : index
    %c0_145 = arith.constant 0 : index
    %159 = vector.load %arg9[%c0_143, %c0_144, %c0_145] : memref<9x4x8xbf16, #tpu.memory_space<vmem>>, vector<1x4x8xbf16>
    %160 = vector.shape_cast %159 : vector<1x4x8xbf16> to vector<4x8xbf16>
    %161 = vector.extract_strided_slice %157 {offsets = [0, 0], sizes = [8, 324], strides = [1, 1]} : vector<8x384xbf16> to vector<8x324xbf16>
    %cst_146 = arith.constant dense<0.000000e+00> : vector<4x324xf32>
    %162 = tpu.matmul %160, %161, %cst_146 {dimension_numbers = #tpu.dot_dimension_numbers<[1], [0], [0], [1], [0, 0, 1, 1], [], []>} : vector<4x8xbf16>, vector<8x324xbf16>, vector<4x324xf32> -> vector<4x324xf32>
    %163 = arith.addf %158, %162 : vector<4x324xf32>
    %c1_147 = arith.constant 1 : index
    %c0_148 = arith.constant 0 : index
    %c0_149 = arith.constant 0 : index
    %164 = vector.load %arg9[%c1_147, %c0_148, %c0_149] : memref<9x4x8xbf16, #tpu.memory_space<vmem>>, vector<1x4x8xbf16>
    %165 = vector.shape_cast %164 : vector<1x4x8xbf16> to vector<4x8xbf16>
    %166 = vector.extract_strided_slice %157 {offsets = [0, 1], sizes = [8, 324], strides = [1, 1]} : vector<8x384xbf16> to vector<8x324xbf16>
    %cst_150 = arith.constant dense<0.000000e+00> : vector<4x324xf32>
    %167 = tpu.matmul %165, %166, %cst_150 {dimension_numbers = #tpu.dot_dimension_numbers<[1], [0], [0], [1], [0, 0, 1, 1], [], []>} : vector<4x8xbf16>, vector<8x324xbf16>, vector<4x324xf32> -> vector<4x324xf32>
    %168 = arith.addf %163, %167 : vector<4x324xf32>
    %c2_151 = arith.constant 2 : index
    %c0_152 = arith.constant 0 : index
    %c0_153 = arith.constant 0 : index
    %169 = vector.load %arg9[%c2_151, %c0_152, %c0_153] : memref<9x4x8xbf16, #tpu.memory_space<vmem>>, vector<1x4x8xbf16>
    %170 = vector.shape_cast %169 : vector<1x4x8xbf16> to vector<4x8xbf16>
    %171 = vector.extract_strided_slice %157 {offsets = [0, 2], sizes = [8, 324], strides = [1, 1]} : vector<8x384xbf16> to vector<8x324xbf16>
    %cst_154 = arith.constant dense<0.000000e+00> : vector<4x324xf32>
    %172 = tpu.matmul %170, %171, %cst_154 {dimension_numbers = #tpu.dot_dimension_numbers<[1], [0], [0], [1], [0, 0, 1, 1], [], []>} : vector<4x8xbf16>, vector<8x324xbf16>, vector<4x324xf32> -> vector<4x324xf32>
    %173 = arith.addf %168, %172 : vector<4x324xf32>
    %c3_155 = arith.constant 3 : index
    %c0_156 = arith.constant 0 : index
    %c0_157 = arith.constant 0 : index
    %174 = vector.load %arg9[%c3_155, %c0_156, %c0_157] : memref<9x4x8xbf16, #tpu.memory_space<vmem>>, vector<1x4x8xbf16>
    %175 = vector.shape_cast %174 : vector<1x4x8xbf16> to vector<4x8xbf16>
    %176 = vector.extract_strided_slice %157 {offsets = [0, 18], sizes = [8, 324], strides = [1, 1]} : vector<8x384xbf16> to vector<8x324xbf16>
    %cst_158 = arith.constant dense<0.000000e+00> : vector<4x324xf32>
    %177 = tpu.matmul %175, %176, %cst_158 {dimension_numbers = #tpu.dot_dimension_numbers<[1], [0], [0], [1], [0, 0, 1, 1], [], []>} : vector<4x8xbf16>, vector<8x324xbf16>, vector<4x324xf32> -> vector<4x324xf32>
    %178 = arith.addf %173, %177 : vector<4x324xf32>
    %c4_159 = arith.constant 4 : index
    %c0_160 = arith.constant 0 : index
    %c0_161 = arith.constant 0 : index
    %179 = vector.load %arg9[%c4_159, %c0_160, %c0_161] : memref<9x4x8xbf16, #tpu.memory_space<vmem>>, vector<1x4x8xbf16>
    %180 = vector.shape_cast %179 : vector<1x4x8xbf16> to vector<4x8xbf16>
    %181 = vector.extract_strided_slice %157 {offsets = [0, 19], sizes = [8, 324], strides = [1, 1]} : vector<8x384xbf16> to vector<8x324xbf16>
    %cst_162 = arith.constant dense<0.000000e+00> : vector<4x324xf32>
    %182 = tpu.matmul %180, %181, %cst_162 {dimension_numbers = #tpu.dot_dimension_numbers<[1], [0], [0], [1], [0, 0, 1, 1], [], []>} : vector<4x8xbf16>, vector<8x324xbf16>, vector<4x324xf32> -> vector<4x324xf32>
    %183 = arith.addf %178, %182 : vector<4x324xf32>
    %c5_163 = arith.constant 5 : index
    %c0_164 = arith.constant 0 : index
    %c0_165 = arith.constant 0 : index
    %184 = vector.load %arg9[%c5_163, %c0_164, %c0_165] : memref<9x4x8xbf16, #tpu.memory_space<vmem>>, vector<1x4x8xbf16>
    %185 = vector.shape_cast %184 : vector<1x4x8xbf16> to vector<4x8xbf16>
    %186 = vector.extract_strided_slice %157 {offsets = [0, 20], sizes = [8, 324], strides = [1, 1]} : vector<8x384xbf16> to vector<8x324xbf16>
    %cst_166 = arith.constant dense<0.000000e+00> : vector<4x324xf32>
    %187 = tpu.matmul %185, %186, %cst_166 {dimension_numbers = #tpu.dot_dimension_numbers<[1], [0], [0], [1], [0, 0, 1, 1], [], []>} : vector<4x8xbf16>, vector<8x324xbf16>, vector<4x324xf32> -> vector<4x324xf32>
    %188 = arith.addf %183, %187 : vector<4x324xf32>
    %c6_167 = arith.constant 6 : index
    %c0_168 = arith.constant 0 : index
    %c0_169 = arith.constant 0 : index
    %189 = vector.load %arg9[%c6_167, %c0_168, %c0_169] : memref<9x4x8xbf16, #tpu.memory_space<vmem>>, vector<1x4x8xbf16>
    %190 = vector.shape_cast %189 : vector<1x4x8xbf16> to vector<4x8xbf16>
    %191 = vector.extract_strided_slice %157 {offsets = [0, 36], sizes = [8, 324], strides = [1, 1]} : vector<8x384xbf16> to vector<8x324xbf16>
    %cst_170 = arith.constant dense<0.000000e+00> : vector<4x324xf32>
    %192 = tpu.matmul %190, %191, %cst_170 {dimension_numbers = #tpu.dot_dimension_numbers<[1], [0], [0], [1], [0, 0, 1, 1], [], []>} : vector<4x8xbf16>, vector<8x324xbf16>, vector<4x324xf32> -> vector<4x324xf32>
    %193 = arith.addf %188, %192 : vector<4x324xf32>
    %c7_171 = arith.constant 7 : index
    %c0_172 = arith.constant 0 : index
    %c0_173 = arith.constant 0 : index
    %194 = vector.load %arg9[%c7_171, %c0_172, %c0_173] : memref<9x4x8xbf16, #tpu.memory_space<vmem>>, vector<1x4x8xbf16>
    %195 = vector.shape_cast %194 : vector<1x4x8xbf16> to vector<4x8xbf16>
    %196 = vector.extract_strided_slice %157 {offsets = [0, 37], sizes = [8, 324], strides = [1, 1]} : vector<8x384xbf16> to vector<8x324xbf16>
    %cst_174 = arith.constant dense<0.000000e+00> : vector<4x324xf32>
    %197 = tpu.matmul %195, %196, %cst_174 {dimension_numbers = #tpu.dot_dimension_numbers<[1], [0], [0], [1], [0, 0, 1, 1], [], []>} : vector<4x8xbf16>, vector<8x324xbf16>, vector<4x324xf32> -> vector<4x324xf32>
    %198 = arith.addf %193, %197 : vector<4x324xf32>
    %c8_175 = arith.constant 8 : index
    %c0_176 = arith.constant 0 : index
    %c0_177 = arith.constant 0 : index
    %199 = vector.load %arg9[%c8_175, %c0_176, %c0_177] : memref<9x4x8xbf16, #tpu.memory_space<vmem>>, vector<1x4x8xbf16>
    %200 = vector.shape_cast %199 : vector<1x4x8xbf16> to vector<4x8xbf16>
    %201 = vector.extract_strided_slice %157 {offsets = [0, 38], sizes = [8, 324], strides = [1, 1]} : vector<8x384xbf16> to vector<8x324xbf16>
    %cst_178 = arith.constant dense<0.000000e+00> : vector<4x324xf32>
    %202 = tpu.matmul %200, %201, %cst_178 {dimension_numbers = #tpu.dot_dimension_numbers<[1], [0], [0], [1], [0, 0, 1, 1], [], []>} : vector<4x8xbf16>, vector<8x324xbf16>, vector<4x324xf32> -> vector<4x324xf32>
    %203 = arith.addf %198, %202 : vector<4x324xf32>
    %c0_179 = arith.constant 0 : index
    %c0_180 = arith.constant 0 : index
    %204 = vector.load %arg10[%c0_179, %c0_180] : memref<4x1xf32, #tpu.memory_space<vmem>>, vector<4x1xf32>
    %205 = vector.broadcast %204 : vector<4x1xf32> to vector<4x324xf32>
    %206 = arith.addf %203, %205 : vector<4x324xf32>
    %207 = math.tanh %206 : vector<4x324xf32>
    %c0_181 = arith.constant 0 : index
    %c0_182 = arith.constant 0 : index
    %c0_183 = arith.constant 0 : index
    %208 = vector.load %arg11[%c0_181, %c0_182, %c0_183] : memref<1x4x324xf32, #tpu.memory_space<vmem>>, vector<1x4x324xf32>
    %209 = vector.shape_cast %208 : vector<1x4x324xf32> to vector<4x324xf32>
    %210 = vector.shape_cast %207 : vector<4x324xf32> to vector<1x4x324xf32>
    tpu.vector_store %arg11[%c0_181, %c0_182, %c0_183], %210 {strides = array<i32>} : memref<1x4x324xf32, #tpu.memory_space<vmem>>, vector<1x4x324xf32>,
    return
  }
  func.func @transform_0(%arg0: i32) -> (i32, i32, i32) {
    %c0_i32 = arith.constant 0 : i32
    %c0_i32_0 = arith.constant 0 : i32
    %c0_i32_1 = arith.constant 0 : i32
    return %arg0, %c0_i32, %c0_i32_0 : i32, i32, i32
  }
  func.func @transform_1(%arg0: i32) -> (i32, i32, i32) {
    %c0_i32 = arith.constant 0 : i32
    %c0_i32_0 = arith.constant 0 : i32
    %c0_i32_1 = arith.constant 0 : i32
    return %arg0, %c0_i32, %c0_i32_0 : i32, i32, i32
  }
  func.func @transform_2(%arg0: i32) -> (i32, i32, i32) {
    %c0_i32 = arith.constant 0 : i32
    %c0_i32_0 = arith.constant 0 : i32
    %c0_i32_1 = arith.constant 0 : i32
    %c0_i32_2 = arith.constant 0 : i32
    return %c0_i32, %c0_i32_0, %c0_i32_1 : i32, i32, i32
  }
  func.func @transform_3(%arg0: i32) -> (i32, i32) {
    %c0_i32 = arith.constant 0 : i32
    %c0_i32_0 = arith.constant 0 : i32
    %c0_i32_1 = arith.constant 0 : i32
    return %c0_i32, %c0_i32_0 : i32, i32
  }
  func.func @transform_4(%arg0: i32) -> (i32, i32, i32) {
    %c0_i32 = arith.constant 0 : i32
    %c0_i32_0 = arith.constant 0 : i32
    %c0_i32_1 = arith.constant 0 : i32
    %c0_i32_2 = arith.constant 0 : i32
    return %c0_i32, %c0_i32_0, %c0_i32_1 : i32, i32, i32
  }
  func.func @transform_5(%arg0: i32) -> (i32, i32) {
    %c0_i32 = arith.constant 0 : i32
    %c0_i32_0 = arith.constant 0 : i32
    %c0_i32_1 = arith.constant 0 : i32
    return %c0_i32, %c0_i32_0 : i32, i32
  }
  func.func @transform_6(%arg0: i32) -> (i32, i32, i32) {
    %c0_i32 = arith.constant 0 : i32
    %c0_i32_0 = arith.constant 0 : i32
    %c0_i32_1 = arith.constant 0 : i32
    %c0_i32_2 = arith.constant 0 : i32
    return %c0_i32, %c0_i32_0, %c0_i32_1 : i32, i32, i32
  }
  func.func @transform_7(%arg0: i32) -> (i32, i32) {
    %c0_i32 = arith.constant 0 : i32
    %c0_i32_0 = arith.constant 0 : i32
    %c0_i32_1 = arith.constant 0 : i32
    return %c0_i32, %c0_i32_0 : i32, i32
  }
  func.func @transform_8(%arg0: i32) -> (i32, i32, i32) {
    %c0_i32 = arith.constant 0 : i32
    %c0_i32_0 = arith.constant 0 : i32
    %c0_i32_1 = arith.constant 0 : i32
    %c0_i32_2 = arith.constant 0 : i32
    return %c0_i32, %c0_i32_0, %c0_i32_1 : i32, i32, i32
  }
  func.func @transform_9(%arg0: i32) -> (i32, i32) {
    %c0_i32 = arith.constant 0 : i32
    %c0_i32_0 = arith.constant 0 : i32
    %c0_i32_1 = arith.constant 0 : i32
    return %c0_i32, %c0_i32_0 : i32, i32
  }
  func.func @transform_10(%arg0: i32) -> (i32, i32, i32) {
    %c0_i32 = arith.constant 0 : i32
    %c0_i32_0 = arith.constant 0 : i32
    %c0_i32_1 = arith.constant 0 : i32
    return %arg0, %c0_i32, %c0_i32_0 : i32, i32, i32
  }
  func.func @transform_11(%arg0: i32) -> (i32, i32, i32) {
    %c0_i32 = arith.constant 0 : i32
    %c0_i32_0 = arith.constant 0 : i32
    %c0_i32_1 = arith.constant 0 : i32
    return %arg0, %c0_i32, %c0_i32_0 : i32, i32, i32
  }
  func.func @transform_12(%arg0: i32) -> (i32, i32, i32) {
    %c0_i32 = arith.constant 0 : i32
    %c0_i32_0 = arith.constant 0 : i32
    %c0_i32_1 = arith.constant 0 : i32
    return %arg0, %c0_i32, %c0_i32_0 : i32, i32, i32
  }
}

</mosaic_0001>

<bundles_post_ra>
// kernel: vae_forward.1
= control target key start
LH: loop header
LB: loop body
LE: loop exit
PB: predicated region body
PF: predicated region fallthrough
CT: control target
= control target key end

     0   :  { %s9284_s0 = inlined_call_operand.vmem [shape: bf16[2,4,512], index: 0, kind: input, shape index: {}]   ;;  %s9285_s1 = inlined_call_operand.vmem [shape: f32[2,1,16], index: 1, kind: input, shape index: {}]   ;;  %s9286_s2 = inlined_call_operand.vmem [shape: bf16[9,8,4], index: 2, kind: input, shape index: {}]   ;;  %s9287_s3 = inlined_call_operand.vmem [shape: f32[8,1], index: 3, kind: input, shape index: {}]   ;;  %s9288_s4 = inlined_call_operand.vmem [shape: bf16[8,384,32], index: 4, kind: input, shape index: {}]   ;;  %s9289_s5 = inlined_call_operand.vmem [shape: f32[1,32], index: 5, kind: input, shape index: {}]   ;;  %s9290_s6 = inlined_call_operand.vmem [shape: bf16[8,16,384], index: 6, kind: input, shape index: {}]   ;;  %s9291_s7 = inlined_call_operand.vmem [shape: f32[8,384], index: 7, kind: input, shape index: {}]   ;;  %s9292_s8 = inlined_call_operand.vmem [shape: bf16[9,4,8], index: 8, kind: input, shape index: {}]   ;;  %s9293_s9 = inlined_call_operand.vmem [shape: f32[4,1], index: 9, kind: input, shape index: {}]   ;;  %s9294_s10 = inlined_call_operand.vmem [shape: f32[2,4,324], index: 10, kind: output, shape index: {0}]   ;;  %s9295_s11 = inlined_call_operand.hbm [shape: f32[2,1,16], index: 11, kind: output, shape index: {1}]   ;;  %s9296_s12 = inlined_call_operand.hbm [shape: f32[2,1,16], index: 12, kind: output, shape index: {2}]  }
   0x1   :  { %9315 = sst [smem:[#allocation9_spill]] %s9284_s0 }
   0x2   :  { %9316 = sst [smem:[#allocation10_spill]] %s9285_s1 }
   0x3   :  { %9317 = sst [smem:[#allocation11_spill]] %s9286_s2 }
   0x4   :  { %9318 = sst [smem:[#allocation12_spill]] %s9287_s3 }
   0x5   :  { %9319 = sst [smem:[#allocation13_spill]] %s9288_s4 }
   0x6   :  { %9320 = sst [smem:[#allocation14_spill]] %s9289_s5 }
   0x7   :  { %9321 = sst [smem:[#allocation15_spill]] %s9290_s6 }
   0x8   :  { %18 = vsyncpa [#allocation4], 0 }
   0x9   :  { %20 = vsyncpa [#allocation4 + $0x1], 0 }
   0xa   :  { %21 = vsyncpa [#allocation6], 0 }
   0xb   :  { %23 = vsyncpa [#allocation6 + $0x1], 0  ;;  %s7861_s21 = smov 0   ;;  %s7863_s22 = smov 0  }
   0xc   :  { %s7865_s23 = smov 0   ;;  %s7867_s24 = smov 0  }
   0xd LB: > { %s7882_s25 = sadd.s32 4294967295, %s7777_s24   ;;  %s6052_s26 = sadd.s32 4294967294, %s7777_s24   ;;  %s7777_s24 = sphi %s7867_s24, %s9346_s24   ;;  %s7773_s23 = sphi %s7865_s23, %s9345_s23   ;;  %s7769_s22 = sphi %s7863_s22, %s9344_s22   ;;  %s7765_s21 = sphi %s7861_s21, %s9343_s21  }
   0xe   : > { %s7886_s27 = sadd.s32 1, %s7777_s24   ;;  %s282_s28 = sadd.s32 1, %s7773_s23 }
   0xf   : > { %s279_s29 = ssub.s32 %s7777_s24, %s7886_s27  ;;  %p292_p0 = scmp.ne.s32.totalorder %s7773_s23, %s7769_s22 }
  0x10   : > { %p280_p1 = scmp.eq.s32.totalorder %s279_s29, 0  ;;  %p293_p2 = scmp.eq.s32.totalorder %s7882_s25, 1 }
  0x11   : > { %p298_p3 = scmp.ne.s32.totalorder %s7769_s22, %s7765_s21  ;;  %p299_p4 = scmp.eq.s32.totalorder %s6052_s26, 1 }
  0x12   : > { %s7897_s30 = scalar_select %p280_p1, %s7773_s23, %s282_s28  }
  0x13   : > { %p7899_p5 = por %p293_p2, %p292_p0  ;;  %p7903_p6 = por %p299_p4, %p298_p3 }
  0x14   : > { %p6055_p7 = scmp.ge.s32.totalorder %s7777_s24, 1  ;;  %p381_p8 = scmp.lt.s32.totalorder %s7777_s24, 3 }
  0x16   : > { %p382_p9 = pnand %p6055_p7, %p381_p8 }
  0x17   : > { %p434_p10 = scmp.lt.s32.totalorder (!%p382_p9), %s7882_s25, 1  ;;  %v457_v0 = vlaneseq (!%p382_p9)  ;;  %v7779_v1 = vmov (!%p382_p9), 1983009808   ;;  %v7780_v5 = vmov (!%p382_p9), 0.0   ;;  %v7781_v6 = vmov (!%p382_p9), 0   ;;  %s9324_s0 = sld [smem:[#allocation9_spill]] (!%p382_p9) }
  0x18   : > { %385 = sbr.rel (%p382_p9) target bundleno = 1833 (0x729), region = 60  ;;  %v455_v2 = vunpack.c.l.s4 (!%p382_p9), %v7779_v1  ;;  %7037 = vmatprep.subr.bf16.mxu1 (!%p382_p9), %v7780_v5  ;;  %528 = vmatprep.mubr.bf16.mxu0 (!%p382_p9), %v7781_v6  ;;  %vm7782_vm0 = vmmov (!%p382_p9), 0   ;;  %s9311_s20 = smov (!%p382_p9), 127   ;;  %vm486_vm1 = vcmask (!%p382_p9), 1041408   ;;  %vm478_vm2 = vcmask (!%p382_p9), 1039360  }
  0x19   : > { %v7914_v3 = vshrl.u32 (!%p382_p9), %v457_v0, 7  ;;  %7450 = vset.pattern.permute.xlu0 (!%p382_p9), %v7781_v6  ;;  %7451 = vset.pattern.permute.xlu1 (!%p382_p9), %v7781_v6  ;;  %s9309_s26 = smov (!%p382_p9), 126   ;;  %s9307_s28 = smov (!%p382_p9), 110   ;;  %vm482_vm3 = vcmask (!%p382_p9), 31744   ;;  %vm680_vm4 = vcmask (!%p382_p9), 1031168   ;;  %vm790_vm5 = vcmask (!%p382_p9), 900096  }
  0x1a   : > { %v456_v4 = vunpack.c.0.s8 (!%p382_p9), %v455_v2  ;;  %7039 = vmatprep.mubr.msk.bf16.mxu1 (!%p382_p9), %vm7782_vm0, %v7780_v5  ;;  %s9303_s29 = smov (!%p382_p9), 109   ;;  %s9297_s17 = smov (!%p382_p9), 92   ;;  %vm900_vm6 = vcmask (!%p382_p9), 891904   ;;  %vm1010_vm7 = vcmask (!%p382_p9), 883712   ;;  %vm1120_vm8 = vcmask (!%p382_p9), 752640  }
  0x1b   : > { %s9301_s18 = smov (!%p382_p9), 91   ;;  %s9325_s3 = sld [smem:[#allocation12_spill]] (!%p382_p9)  ;;  %vm1230_vm9 = vcmask (!%p382_p9), 744448   ;;  %vm1340_vm10 = vcmask (!%p382_p9), 736256   ;;  %vm3698_vm11 = vcmask (!%p382_p9), 122880   ;;  %vm3760_vm12 = vcmask (!%p382_p9), 130048  }
  0x1c   : > { %v459_v7 = vsub.s32 (!%p382_p9), %v456_v4, %v7914_v3  ;;  %s9326_s2 = sld [smem:[#allocation11_spill]] (!%p382_p9)  ;;  %s9327_s4 = sld [smem:[#allocation13_spill]] (!%p382_p9)  ;;  %vm8976_vm13 = vcmp.lt.s32.totalorder (!%p382_p9), %v457_v0, 384  ;;  %vm4952_vm14 = vcmask (!%p382_p9), 1043456   ;;  %vm4948_vm15 = vcmask (!%p382_p9), 64512  }
  0x1d   : > { %s9328_s1 = sld [smem:[#allocation10_spill]] (!%p382_p9)  ;;  %s9329_s5 = sld [smem:[#allocation14_spill]] (!%p382_p9) }
  0x1e   : > { %s9330_s6 = sld [smem:[#allocation15_spill]] (!%p382_p9) }
  0x1f   : > { %s7911_s15 = scalar_select %p434_p10, %s7882_s25, 1 }
  0x21   : > { %s6736_s16 = sshll.u32 %s7911_s15, 3  ;;  %v1440_v16 = vld [vmem:[%s9325_s3] sm:$0xff] }
  0x22   : > { %s438_s19 = scalar_lea.vmem %s9324_s0, %s6736_s16  ;;  %s9299_s16 = smov 108   ;;  %v6059_v22 = vld [vmem:[%s9326_s2 + $0x4] sm:$0xf]  ;;  %v449_v33 = vld [vmem:[%s9326_s2] sm:$0xf] }
  0x23   : > { %v448_v8 = vld [vmem:[%s438_s19] sm:$0xff]  ;;  %s9305_s19 = smov 90   ;;  %v6066_v43 = vld [vmem:[%s9326_s2 + $0x8] sm:$0xf]  ;;  %v6070_v53 = vld [vmem:[%s9326_s2 + $0xc] sm:$0xf] }
  0x24   : > { %v460_v9 = vrot.slane %v448_v8, %v459_v7  ;;  %v453_v10 = vcombine.high %v448_v8, %v448_v8  ;;  %v6074_v63 = vld [vmem:[%s9326_s2 + $0x10] sm:$0xf]  ;;  %s8808_s0 = sand.u32 1, %s7769_s22  }
  0x26   : > { %470 = vrot.lane.b32.xlu0 %v460_v9, %s9311_s20  ;;  %v467_v11 = vrot.slane %v453_v10, %v459_v7  ;;  %v468_v12 = vcombine.high %v460_v9, %v460_v9  ;;  %v581_v14 = vsel %vm486_vm1, %v460_v9, 0 }
  0x28   : > { %474 = vrot.lane.b32.xlu1 %v467_v11, %s9311_s20  ;;  %v469_v13 = vcombine.high %v467_v11, %v467_v11  ;;  %v587_v15 = vsel %vm486_vm1, %v467_v11, 0 }
  0x2a   : > { %472 = vrot.lane.b32.xlu0 %v468_v12, %s9311_s20 }
  0x2c   : > { %476 = vrot.lane.b32.xlu1 %v469_v13, %s9311_s20  ;;  %s7792_s20 = smov 112  }
  0x2e   : > { %672 = vrot.lane.b32.xlu0 %v460_v9, %s9309_s26 }
  0x30   : > { %674 = vrot.lane.b32.xlu1 %v468_v12, %s9309_s26 }
  0x32   : > { %676 = vrot.lane.b32.xlu0 %v467_v11, %s9309_s26 }
  0x34   : > { %678 = vrot.lane.b32.xlu1 %v469_v13, %s9309_s26  ;;  %s9334_s26 = smov 126  }
  0x36   : > { %782 = vrot.lane.b32.xlu0 %v460_v9, %s9307_s28 }
  0x38   : > { %784 = vrot.lane.b32.xlu1 %v468_v12, %s9307_s28 }
  0x3a   : > { %786 = vrot.lane.b32.xlu0 %v467_v11, %s9307_s28 }
  0x3c   : > { %788 = vrot.lane.b32.xlu1 %v469_v13, %s9307_s28  ;;  %s9339_s28 = smov 91  }
  0x3e   : > { %892 = vrot.lane.b32.xlu0 %v460_v9, %s9303_s29 }
  0x40   : > { %894 = vrot.lane.b32.xlu1 %v468_v12, %s9303_s29 }
  0x42   : > { %896 = vrot.lane.b32.xlu0 %v467_v11, %s9303_s29 }
  0x44   : > { %898 = vrot.lane.b32.xlu1 %v469_v13, %s9303_s29  ;;  %s427_s29 = scalar_lea.vmem [#allocation3], %s8808_s0 }
  0x46   : > { %1002 = vrot.lane.b32.xlu0 %v460_v9, %s9299_s16 }
  0x48   : > { %1004 = vrot.lane.b32.xlu1 %v468_v12, %s9299_s16 }
  0x4a   : > { %1006 = vrot.lane.b32.xlu0 %v467_v11, %s9299_s16 }
  0x4c   : > { %1008 = vrot.lane.b32.xlu1 %v469_v13, %s9299_s16  ;;  %s441_s16 = scalar_lea.vmem %s9328_s1, %s7911_s15 }
  0x4e   : > { %1112 = vrot.lane.b32.xlu0 %v460_v9, %s9297_s17 }
  0x50   : > { %1114 = vrot.lane.b32.xlu1 %v468_v12, %s9297_s17 }
  0x52   : > { %1116 = vrot.lane.b32.xlu0 %v467_v11, %s9297_s17 }
  0x54   : > { %1118 = vrot.lane.b32.xlu1 %v469_v13, %s9297_s17  ;;  %s9336_s17 = smov 109  }
  0x56   : > { %1222 = vrot.lane.b32.xlu0 %v460_v9, %s9301_s18 }
  0x58   : > { %1224 = vrot.lane.b32.xlu1 %v468_v12, %s9301_s18 }
  0x5a   : > { %1226 = vrot.lane.b32.xlu0 %v467_v11, %s9301_s18 }
  0x5c   : > { %1228 = vrot.lane.b32.xlu1 %v469_v13, %s9301_s18  ;;  %s9337_s18 = smov 108  }
  0x5e   : > { %1332 = vrot.lane.b32.xlu0 %v460_v9, %s9305_s19 }
  0x60   : > { %1334 = vrot.lane.b32.xlu1 %v468_v12, %s9305_s19 }
  0x62   : > { %1336 = vrot.lane.b32.xlu0 %v467_v11, %s9305_s19 }
  0x64   : > { %1338 = vrot.lane.b32.xlu1 %v469_v13, %s9305_s19  ;;  %v6078_v13 = vld [vmem:[%s9326_s2 + $0x14] sm:$0xf]  ;;  %s9335_s19 = smov 110  }
  0x66   : > { %1443 = vperm.xlu0 %7450, %v1440_v16  }
  0x98   : > { %v471_v17 = vpop.permute.xlu0 %470 }
  0x9a   : > { %v475_v18 = vpop.permute.xlu1 %474 }
  0x9c   : > { %v473_v19 = vpop.permute.xlu0 %472 }
  0x9d   : > { %v480_v20 = vsel %vm478_vm2, %v473_v19, %v475_v18  ;;  %v479_v21 = vsel %vm478_vm2, %v471_v17, %v473_v19 }
  0x9e   : > { %6060 = vmatprep.subr.msk.bf16.mxu0 %vm486_vm1, %v480_v20  ;;  %v477_v23 = vpop.permute.xlu1 %476  ;;  %v488_v24 = vsel %vm486_vm1, %v479_v21, 0 }
  0x9f   : > { %497 = vmatpush1.bf16.msra.mxu0 %v488_v24  ;;  %v481_v25 = vsel %vm478_vm2, %v475_v18, %v477_v23  ;;  %v6082_v23 = vld [vmem:[%s9326_s2 + $0x18] sm:$0xf] }
  0xa0   : > { %v494_v26 = vsel %vm486_vm1, %v481_v25, 0  ;;  %v673_v27 = vpop.permute.xlu0 %672  ;;  %6063 = vmatprep.subr.msk.bf16.mxu0 %vm486_vm1, %v468_v12 }
  0xa1   : > { %7038 = vmatpush3.bf16.msra.mxu1 %v494_v26 }
  0xa2   : > { %6061 = vmatmul.mubr.msk.bf16.vlgmr.msra.gmra.mrb[0].mxu0 %vm482_vm3, %v6059_v22  ;;  %7043 = vmatprep.subr.bf16.mxu1 %v7780_v5  ;;  %v675_v28 = vpop.permute.xlu1 %674 }
  0xa3   : > { %590 = vmatpush1.bf16.msra.mxu0 %v581_v14  ;;  %v681_v29 = vsel %vm680_vm4, %v673_v27, %v675_v28  ;;  %621 = vmatprep.mubr.bf16.mxu0 %v7781_v6 }
  0xa4   : > { %7040 = vmatmul.mubr.msk.bf16.vlgmr.msra.gmra.mrb[0].mxu1 %vm482_vm3, %v6059_v22  ;;  %v677_v30 = vpop.permute.xlu0 %676  ;;  %v688_v31 = vsel %vm486_vm1, %v681_v29, 0 }
  0xa5   : > { %v682_v32 = vsel %vm680_vm4, %v675_v28, %v677_v30  ;;  %7044 = vmatpush3.bf16.msra.mxu1 %v587_v15  ;;  %7045 = vmatprep.mubr.msk.bf16.mxu1 %vm7782_vm0, %v7780_v5 }
  0xa6   : > { %6067 = vmatprep.subr.msk.bf16.mxu0 %vm486_vm1, %v682_v32  ;;  %v679_v34 = vpop.permute.xlu1 %678  ;;  %7049 = vmatprep.subr.bf16.mxu1 %v7780_v5 }
  0xa7   : > { %v683_v35 = vsel %vm680_vm4, %v677_v30, %v679_v34 }
  0xa8   : > { %v783_v36 = vpop.permute.xlu0 %782  ;;  %v694_v37 = vsel %vm486_vm1, %v683_v35, 0 }
  0xaa   : > { %6064 = vmatmul.mubr.msk.bf16.vlgmr.msra.gmra.mrb[4].mxu0 %vm482_vm3, %v449_v33  ;;  %v785_v38 = vpop.permute.xlu1 %784 }
  0xab   : > { %697 = vmatpush1.bf16.msra.mxu0 %v688_v31  ;;  %728 = vmatprep.mubr.bf16.mxu0 %v7781_v6  ;;  %v791_v40 = vsel %vm790_vm5, %v783_v36, %v785_v38 }
  0xac   : > { %7046 = vmatmul.mubr.msk.bf16.vlgmr.msra.gmra.mrb[4].mxu1 %vm482_vm3, %v449_v33  ;;  %v787_v39 = vpop.permute.xlu0 %786  ;;  %v798_v45 = vsel %vm486_vm1, %v791_v40, 0  ;;  %v6086_v33 = vld [vmem:[%s9326_s2 + $0x1c] sm:$0xf]  ;;  %v7455_v40 = vld [vmem:[%s9327_s4 + $0x80] sm:$0xff]  }
  0xad   : > { %7050 = vmatpush3.bf16.msra.mxu1 %v694_v37  ;;  %v792_v41 = vsel %vm790_vm5, %v785_v38, %v787_v39  ;;  %7051 = vmatprep.mubr.msk.bf16.mxu1 %vm7782_vm0, %v7780_v5  ;;  %v6090_v37 = vld [vmem:[%s9326_s2 + $0x20] sm:$0xf]  ;;  %s7791_s2 = smov 16  }
  0xae   : > { %6071 = vmatprep.subr.msk.bf16.mxu0 %vm486_vm1, %v792_v41  ;;  %v789_v42 = vpop.permute.xlu1 %788  ;;  %7055 = vmatprep.subr.bf16.mxu1 %v7780_v5  ;;  %v7453_v38 = vld [vmem:[%s9327_s4 + $0x40] sm:$0xff]   ;;  %v7456_v41 = vld [vmem:[%s9327_s4 + $0x48] sm:$0xff]  }
  0xaf   : > { %v793_v44 = vsel %vm790_vm5, %v787_v39, %v789_v42  ;;  %v7454_v39 = vld [vmem:[%s9327_s4] sm:$0xff]   ;;  %v7457_v42 = vld [vmem:[%s9327_s4 + $0x8] sm:$0xff]  }
  0xb0   : > { %v893_v46 = vpop.permute.xlu0 %892  ;;  %v804_v47 = vsel %vm486_vm1, %v793_v44, 0  ;;  %v7459_v44 = vld [vmem:[%s9327_s4 + $0x50] sm:$0xff]  }
  0xb2   : > { %6068 = vmatmul.mubr.msk.bf16.vlgmr.msra.gmra.mrb[8].mxu0 %vm482_vm3, %v6066_v43  ;;  %v895_v48 = vpop.permute.xlu1 %894 }
  0xb3   : > { %807 = vmatpush1.bf16.msra.mxu0 %v798_v45  ;;  %838 = vmatprep.mubr.bf16.mxu0 %v7781_v6  ;;  %v901_v50 = vsel %vm900_vm6, %v893_v46, %v895_v48  ;;  %v7460_v45 = vld [vmem:[%s9327_s4 + $0x10] sm:$0xff]  }
  0xb4   : > { %7052 = vmatmul.mubr.msk.bf16.vlgmr.msra.gmra.mrb[8].mxu1 %vm482_vm3, %v6066_v43  ;;  %v897_v49 = vpop.permute.xlu0 %896  ;;  %v908_v55 = vsel %vm486_vm1, %v901_v50, 0  ;;  %v7458_v43 = vld [vmem:[%s9327_s4 + $0x88] sm:$0xff]   ;;  %v7461_v46 = vld [vmem:[%s9327_s4 + $0x90] sm:$0xff]   ;;  %v7465_v50 = vld [vmem:[%s9327_s4 + $0x60] sm:$0xff]  }
  0xb5   : > { %7056 = vmatpush3.bf16.msra.mxu1 %v804_v47  ;;  %v902_v51 = vsel %vm900_vm6, %v895_v48, %v897_v49  ;;  %7057 = vmatprep.mubr.msk.bf16.mxu1 %vm7782_vm0, %v7780_v5  ;;  %v7462_v47 = vld [vmem:[%s9327_s4 + $0x58] sm:$0xff]  }
  0xb6   : > { %6075 = vmatprep.subr.msk.bf16.mxu0 %vm486_vm1, %v902_v51  ;;  %v899_v52 = vpop.permute.xlu1 %898  ;;  %7061 = vmatprep.subr.bf16.mxu1 %v7780_v5  ;;  %v7463_v48 = vld [vmem:[%s9327_s4 + $0x18] sm:$0xff]   ;;  %v7466_v51 = vld [vmem:[%s9327_s4 + $0x20] sm:$0xff]  }
  0xb7   : > { %v903_v54 = vsel %vm900_vm6, %v897_v49, %v899_v52  ;;  %v7464_v49 = vld [vmem:[%s9327_s4 + $0x98] sm:$0xff]   ;;  %v7467_v52 = vld [vmem:[%s9327_s4 + $0xa0] sm:$0xff]  }
  0xb8   : > { %v1003_v56 = vpop.permute.xlu0 %1002  ;;  %v914_v57 = vsel %vm486_vm1, %v903_v54, 0  ;;  %v7469_v54 = vld [vmem:[%s9327_s4 + $0x28] sm:$0xff]  }
  0xba   : > { %6072 = vmatmul.mubr.msk.bf16.vlgmr.msra.gmra.mrb[12].mxu0 %vm482_vm3, %v6070_v53  ;;  %v1005_v58 = vpop.permute.xlu1 %1004 }
  0xbb   : > { %917 = vmatpush1.bf16.msra.mxu0 %v908_v55  ;;  %948 = vmatprep.mubr.bf16.mxu0 %v7781_v6  ;;  %v1011_v60 = vsel %vm1010_vm7, %v1003_v56, %v1005_v58  ;;  %v7470_v55 = vld [vmem:[%s9327_s4 + $0xa8] sm:$0xff]   ;;  %v7471_v56 = vld [vmem:[%s9327_s4 + $0x70] sm:$0xff]  }
  0xbc   : > { %7058 = vmatmul.mubr.msk.bf16.vlgmr.msra.gmra.mrb[12].mxu1 %vm482_vm3, %v6070_v53  ;;  %v1007_v59 = vpop.permute.xlu0 %1006  ;;  %v1018_v2 = vsel %vm486_vm1, %v1011_v60, 0  ;;  %v7468_v53 = vld [vmem:[%s9327_s4 + $0x68] sm:$0xff]   ;;  %v7475_v60 = vld [vmem:[%s9327_s4 + $0x38] sm:$0xff]  }
  0xbd   : > { %7062 = vmatpush3.bf16.msra.mxu1 %v914_v57  ;;  %v1012_v61 = vsel %vm1010_vm7, %v1005_v58, %v1007_v59  ;;  %7063 = vmatprep.mubr.msk.bf16.mxu1 %vm7782_vm0, %v7780_v5  ;;  %v7472_v57 = vld [vmem:[%s9327_s4 + $0x30] sm:$0xff]  }
  0xbe   : > { %6079 = vmatprep.subr.msk.bf16.mxu0 %vm486_vm1, %v1012_v61  ;;  %v1009_v62 = vpop.permute.xlu1 %1008  ;;  %7067 = vmatprep.subr.bf16.mxu1 %v7780_v5  ;;  %v7473_v58 = vld [vmem:[%s9327_s4 + $0xb0] sm:$0xff]   ;;  %v7476_v61 = vld [vmem:[%s9327_s4 + $0xb8] sm:$0xff]  }
  0xbf   : > { %v1013_v1 = vsel %vm1010_vm7, %v1007_v59, %v1009_v62  ;;  %v7474_v59 = vld [vmem:[%s9327_s4 + $0x78] sm:$0xff]   ;;  %v7477_v62 = vld [vmem:[%s9327_s4 + $0x100] sm:$0xff]  }
  0xc0   : > { %v1113_v4 = vpop.permute.xlu0 %1112  ;;  %v1024_v7 = vsel %vm486_vm1, %v1013_v1, 0 }
  0xc2   : > { %6076 = vmatmul.mubr.msk.bf16.vlgmr.msra.gmra.mrb[16].mxu0 %vm482_vm3, %v6074_v63  ;;  %v1115_v8 = vpop.permute.xlu1 %1114 }
  0xc3   : > { %1027 = vmatpush1.bf16.msra.mxu0 %v1018_v2  ;;  %1058 = vmatprep.mubr.bf16.mxu0 %v7781_v6  ;;  %v1121_v10 = vsel %vm1120_vm8, %v1113_v4, %v1115_v8 }
  0xc4   : > { %7064 = vmatmul.mubr.msk.bf16.vlgmr.msra.gmra.mrb[16].mxu1 %vm482_vm3, %v6074_v63  ;;  %v1117_v9 = vpop.permute.xlu0 %1116  ;;  %v1128_v15 = vsel %vm486_vm1, %v1121_v10, 0 }
  0xc5   : > { %7068 = vmatpush3.bf16.msra.mxu1 %v1024_v7  ;;  %v1122_v11 = vsel %vm1120_vm8, %v1115_v8, %v1117_v9  ;;  %7069 = vmatprep.mubr.msk.bf16.mxu1 %vm7782_vm0, %v7780_v5 }
  0xc6   : > { %6083 = vmatprep.subr.msk.bf16.mxu0 %vm486_vm1, %v1122_v11  ;;  %v1119_v12 = vpop.permute.xlu1 %1118  ;;  %7073 = vmatprep.subr.bf16.mxu1 %v7780_v5 }
  0xc7   : > { %v1123_v14 = vsel %vm1120_vm8, %v1117_v9, %v1119_v12 }
  0xc8   : > { %v1223_v16 = vpop.permute.xlu0 %1222  ;;  %v1134_v17 = vsel %vm486_vm1, %v1123_v14, 0 }
  0xca   : > { %6080 = vmatmul.mubr.msk.bf16.vlgmr.msra.gmra.mrb[20].mxu0 %vm482_vm3, %v6078_v13  ;;  %v1225_v18 = vpop.permute.xlu1 %1224 }
  0xcb   : > { %1137 = vmatpush1.bf16.msra.mxu0 %v1128_v15  ;;  %1168 = vmatprep.mubr.bf16.mxu0 %v7781_v6  ;;  %v1231_v20 = vsel %vm1230_vm9, %v1223_v16, %v1225_v18 }
  0xcc   : > { %7070 = vmatmul.mubr.msk.bf16.vlgmr.msra.gmra.mrb[20].mxu1 %vm482_vm3, %v6078_v13  ;;  %v1227_v19 = vpop.permute.xlu0 %1226  ;;  %v1238_v25 = vsel %vm486_vm1, %v1231_v20, 0 }
  0xcd   : > { %7074 = vmatpush3.bf16.msra.mxu1 %v1134_v17  ;;  %v1232_v21 = vsel %vm1230_vm9, %v1225_v18, %v1227_v19  ;;  %7075 = vmatprep.mubr.msk.bf16.mxu1 %vm7782_vm0, %v7780_v5 }
  0xce   : > { %6087 = vmatprep.subr.msk.bf16.mxu0 %vm486_vm1, %v1232_v21  ;;  %v1229_v22 = vpop.permute.xlu1 %1228  ;;  %7079 = vmatprep.subr.bf16.mxu1 %v7780_v5 }
  0xcf   : > { %v1233_v24 = vsel %vm1230_vm9, %v1227_v19, %v1229_v22 }
  0xd0   : > { %v1333_v26 = vpop.permute.xlu0 %1332  ;;  %v1244_v27 = vsel %vm486_vm1, %v1233_v24, 0 }
  0xd2   : > { %6084 = vmatmul.mubr.msk.bf16.vlgmr.msra.gmra.mrb[24].mxu0 %vm482_vm3, %v6082_v23  ;;  %v1335_v28 = vpop.permute.xlu1 %1334 }
  0xd3   : > { %1247 = vmatpush1.bf16.msra.mxu0 %v1238_v25  ;;  %1278 = vmatprep.mubr.bf16.mxu0 %v7781_v6  ;;  %v1341_v30 = vsel %vm1340_vm10, %v1333_v26, %v1335_v28 }
  0xd4   : > { %7076 = vmatmul.mubr.msk.bf16.vlgmr.msra.gmra.mrb[24].mxu1 %vm482_vm3, %v6082_v23  ;;  %v1337_v29 = vpop.permute.xlu0 %1336  ;;  %v1348_v35 = vsel %vm486_vm1, %v1341_v30, 0 }
  0xd5   : > { %7080 = vmatpush3.bf16.msra.mxu1 %v1244_v27  ;;  %v1342_v31 = vsel %vm1340_vm10, %v1335_v28, %v1337_v29  ;;  %7081 = vmatprep.mubr.msk.bf16.mxu1 %vm7782_vm0, %v7780_v5 }
  0xd6   : > { %6091 = vmatprep.subr.msk.bf16.mxu0 %vm486_vm1, %v1342_v31  ;;  %v1339_v32 = vpop.permute.xlu1 %1338  ;;  %7085 = vmatprep.subr.bf16.mxu1 %v7780_v5 }
  0xd7   : > { %v1343_v34 = vsel %vm1340_vm10, %v1337_v29, %v1339_v32 }
  0xd8   : > { %v1354_v36 = vsel %vm486_vm1, %v1343_v34, 0 }
  0xda   : > { %6088 = vmatmul.mubr.msk.bf16.vlgmr.msra.gmra.mrb[28].mxu0 %vm482_vm3, %v6086_v33 }
  0xdb   : > { %1357 = vmatpush1.bf16.msra.mxu0 %v1348_v35  ;;  %1388 = vmatprep.mubr.bf16.mxu0 %v7781_v6 }
  0xdc   : > { %7082 = vmatmul.mubr.msk.bf16.vlgmr.msra.gmra.mrb[28].mxu1 %vm482_vm3, %v6086_v33  ;;  %6755 = vmatprep.subr.bf16.mxu0 %v7453_v38 }
  0xdd   : > { %7086 = vmatpush3.bf16.msra.mxu1 %v1354_v36  ;;  %7087 = vmatprep.mubr.msk.bf16.mxu1 %vm7782_vm0, %v7780_v5 }
  0xde   : > { %7091 = vmatprep.subr.bf16.mxu1 %v7780_v5 }
  0xe2   : > { %6092 = vmatmul.mubr.msk.bf16.vlgmr.msra.gmra.mrb[32].mxu0 %vm482_vm3, %v6090_v37 }
  0xe3   : > { %6756 = vmatpush3.bf16.msra.mxu0 %v7454_v39 }
  0xe4   : > { %7088 = vmatmul.mubr.msk.bf16.vlgmr.msra.gmra.mrb[32].mxu1 %vm482_vm3, %v6090_v37  ;;  %6757 = vmatprep.subr.bf16.mxu0 %v7456_v41 }
  0xe5   : > { %7107 = vmatprep.mubr.msk.bf16.mxu1 %vm7782_vm0, %v7780_v5  ;;  %7092 = vmatpush3.bf16.msra.mxu1 %v7455_v40 }
  0xe6   : > { %7093 = vmatprep.subr.bf16.mxu1 %v7780_v5 }
  0xe7   : > { %6758 = vmatpush3.bf16.msra.mxu0 %v7457_v42 }
  0xe8   : > { %6759 = vmatprep.subr.bf16.mxu0 %v7459_v44 }
  0xe9   : > { %7094 = vmatpush3.bf16.msra.mxu1 %v7458_v43 }
  0xea   : > { %7095 = vmatprep.subr.bf16.mxu1 %v7780_v5 }
  0xeb   : > { %6760 = vmatpush3.bf16.msra.mxu0 %v7460_v45 }
  0xec   : > { %6761 = vmatprep.subr.bf16.mxu0 %v7462_v47 }
  0xed   : > { %7096 = vmatpush3.bf16.msra.mxu1 %v7461_v46 }
  0xee   : > { %7097 = vmatprep.subr.bf16.mxu1 %v7780_v5 }
  0xef   : > { %6762 = vmatpush3.bf16.msra.mxu0 %v7463_v48 }
  0xf0   : > { %6763 = vmatprep.subr.bf16.mxu0 %v7465_v50 }
  0xf1   : > { %7098 = vmatpush3.bf16.msra.mxu1 %v7464_v49 }
  0xf2   : > { %7099 = vmatprep.subr.bf16.mxu1 %v7780_v5 }
  0xf3   : > { %6764 = vmatpush3.bf16.msra.mxu0 %v7466_v51 }
  0xf4   : > { %6765 = vmatprep.subr.bf16.mxu0 %v7468_v53 }
  0xf5   : > { %7100 = vmatpush3.bf16.msra.mxu1 %v7467_v52 }
  0xf6   : > { %7101 = vmatprep.subr.bf16.mxu1 %v7780_v5 }
  0xf7   : > { %6766 = vmatpush3.bf16.msra.mxu0 %v7469_v54 }
  0xf8   : > { %6767 = vmatprep.subr.bf16.mxu0 %v7471_v56 }
  0xf9   : > { %7102 = vmatpush3.bf16.msra.mxu1 %v7470_v55 }
  0xfa   : > { %7103 = vmatprep.subr.bf16.mxu1 %v7780_v5 }
  0xfb   : > { %6768 = vmatpush3.bf16.msra.mxu0 %v7472_v57 }
  0xfc   : > { %6769 = vmatprep.subr.bf16.mxu0 %v7474_v59 }
  0xfd   : > { %7104 = vmatpush3.bf16.msra.mxu1 %v7473_v58 }
  0xfe   : > { %7105 = vmatprep.subr.bf16.mxu1 %v7780_v5 }
  0xff   : > { %6770 = vmatpush3.bf16.msra.mxu0 %v7475_v60 }
 0x100   : > { %6786 = vmatprep.subr.bf16.mxu0 %v7477_v62 }
 0x101   : > { %7106 = vmatpush3.bf16.msra.mxu1 %v7476_v61 }
 0x102   : > { %7111 = vmatprep.subr.bf16.mxu1 %v7780_v5 }
 0x175   : > { %v530_v63 = vpop.f32.mrb[0].mxu0 }
 0x176   : > { %v532_v1 = vpop.f32.mrb[1].mxu0 }
 0x177   : > { %v534_v2 = vpop.f32.mrb[2].mxu0  ;;  %v571_v4 = vpop.f32.mrb[0].mxu1 }
 0x178   : > { %v535_v7 = vpop.f32.mrb[3].mxu0  ;;  %v7041_v8 = vpop.f32.mrb[1].mxu1 }
 0x179   : > { %v574_v9 = vpop.f32.mrb[2].mxu1 }
 0x17a   : > { %v7042_v10 = vpop.f32.mrb[3].mxu1 }
 0x17d   : > { %v623_v11 = vpop.f32.mrb[4].mxu0 }
 0x17e   : > { %v624_v12 = vadd.f32 %v623_v11, %v530_v63  ;;  %v625_v13 = vpop.f32.mrb[5].mxu0 }
 0x17f   : > { %v626_v14 = vadd.f32 %v625_v13, %v532_v1  ;;  %v627_v15 = vpop.f32.mrb[6].mxu0  ;;  %v664_v16 = vpop.f32.mrb[4].mxu1 }
 0x180   : > { %v665_v17 = vadd.f32 %v664_v16, %v571_v4  ;;  %v628_v18 = vpop.f32.mrb[7].mxu0  ;;  %v7047_v19 = vpop.f32.mrb[5].mxu1 }
 0x181   : > { %v667_v20 = vpop.f32.mrb[6].mxu1 }
 0x182   : > { %v7048_v21 = vpop.f32.mrb[7].mxu1 }
 0x185   : > { %v730_v22 = vpop.f32.mrb[8].mxu0 }
 0x186   : > { %v777_v23 = vadd.f32 %v730_v22, %v624_v12  ;;  %v732_v24 = vpop.f32.mrb[9].mxu0 }
 0x187   : > { %v778_v25 = vadd.f32 %v732_v24, %v626_v14  ;;  %v734_v26 = vpop.f32.mrb[10].mxu0  ;;  %v771_v27 = vpop.f32.mrb[8].mxu1 }
 0x188   : > { %v779_v28 = vadd.f32 %v771_v27, %v665_v17  ;;  %v735_v29 = vpop.f32.mrb[11].mxu0  ;;  %v7053_v30 = vpop.f32.mrb[9].mxu1 }
 0x189   : > { %v774_v31 = vpop.f32.mrb[10].mxu1  ;;  %v1444_v29 = vpop.permute.xlu0 %1443 }
 0x18a   : > { %v7054_v32 = vpop.f32.mrb[11].mxu1 }
 0x18d   : > { %v840_v33 = vpop.f32.mrb[12].mxu0 }
 0x18e   : > { %v887_v34 = vadd.f32 %v840_v33, %v777_v23  ;;  %v842_v35 = vpop.f32.mrb[13].mxu0 }
 0x18f   : > { %v888_v36 = vadd.f32 %v842_v35, %v778_v25  ;;  %v844_v37 = vpop.f32.mrb[14].mxu0  ;;  %v881_v38 = vpop.f32.mrb[12].mxu1 }
 0x190   : > { %v889_v39 = vadd.f32 %v881_v38, %v779_v28  ;;  %v845_v40 = vpop.f32.mrb[15].mxu0  ;;  %v7059_v41 = vpop.f32.mrb[13].mxu1 }
 0x191   : > { %v884_v42 = vpop.f32.mrb[14].mxu1 }
 0x192   : > { %v7060_v43 = vpop.f32.mrb[15].mxu1 }
 0x195   : > { %v950_v44 = vpop.f32.mrb[16].mxu0 }
 0x196   : > { %v997_v45 = vadd.f32 %v950_v44, %v887_v34  ;;  %v952_v46 = vpop.f32.mrb[17].mxu0 }
 0x197   : > { %v998_v47 = vadd.f32 %v952_v46, %v888_v36  ;;  %v954_v48 = vpop.f32.mrb[18].mxu0  ;;  %v991_v49 = vpop.f32.mrb[16].mxu1 }
 0x198   : > { %v999_v50 = vadd.f32 %v991_v49, %v889_v39  ;;  %v955_v51 = vpop.f32.mrb[19].mxu0  ;;  %v7065_v52 = vpop.f32.mrb[17].mxu1  ;;  %v7479_v48 = vld [vmem:[%s9327_s4 + $0x140] sm:$0xff]  }
 0x199   : > { %v994_v53 = vpop.f32.mrb[18].mxu1  ;;  %v7480_v51 = vld [vmem:[%s9327_s4 + $0x108] sm:$0xff]  }
 0x19a   : > { %v7066_v54 = vpop.f32.mrb[19].mxu1  ;;  %v7481_v53 = vld [vmem:[%s9327_s4 + $0xc8] sm:$0xff]  }
 0x19b   : > { %v7482_v54 = vld [vmem:[%s9327_s4 + $0x148] sm:$0xff]  }
 0x19d   : > { %v1060_v55 = vpop.f32.mrb[20].mxu0 }
 0x19e   : > { %v1107_v56 = vadd.f32 %v1060_v55, %v997_v45  ;;  %v1062_v57 = vpop.f32.mrb[21].mxu0  ;;  %v7483_v55 = vld [vmem:[%s9327_s4 + $0x110] sm:$0xff]  }
 0x19f   : > { %v1108_v58 = vadd.f32 %v1062_v57, %v998_v47  ;;  %v1064_v59 = vpop.f32.mrb[22].mxu0  ;;  %v1101_v60 = vpop.f32.mrb[20].mxu1  ;;  %v7478_v47 = vld [vmem:[%s9327_s4 + $0xc0] sm:$0xff]   ;;  %v7485_v57 = vld [vmem:[%s9327_s4 + $0x150] sm:$0xff]  }
 0x1a0   : > { %v1109_v61 = vadd.f32 %v1101_v60, %v999_v50  ;;  %v1065_v62 = vpop.f32.mrb[23].mxu0  ;;  %v7071_v63 = vpop.f32.mrb[21].mxu1  ;;  %v7487_v59 = vld [vmem:[%s9327_s4 + $0xd8] sm:$0xff]  }
 0x1a1   : > { %v1104_v1 = vpop.f32.mrb[22].mxu1  ;;  %v7488_v60 = vld [vmem:[%s9327_s4 + $0x158] sm:$0xff]   ;;  %v7490_v62 = vld [vmem:[%s9327_s4 + $0xe0] sm:$0xff]  }
 0x1a2   : > { %v7072_v2 = vpop.f32.mrb[23].mxu1  ;;  %v7491_v63 = vld [vmem:[%s9327_s4 + $0x160] sm:$0xff]   ;;  %v7492_v1 = vld [vmem:[%s9327_s4 + $0x128] sm:$0xff]  }
 0x1a3   : > { %v7493_v2 = vld [vmem:[%s9327_s4 + $0xe8] sm:$0xff]  }
 0x1a5   : > { %v1170_v4 = vpop.f32.mrb[24].mxu0 }
 0x1a6   : > { %v1217_v7 = vadd.f32 %v1170_v4, %v1107_v56  ;;  %v1172_v8 = vpop.f32.mrb[25].mxu0  ;;  %v7484_v56 = vld [vmem:[%s9327_s4 + $0xd0] sm:$0xff]   ;;  %v7494_v4 = vld [vmem:[%s9327_s4 + $0x168] sm:$0xff]  }
 0x1a7   : > { %v1218_v9 = vadd.f32 %v1172_v8, %v1108_v58  ;;  %v1174_v10 = vpop.f32.mrb[26].mxu0  ;;  %v1211_v11 = vpop.f32.mrb[24].mxu1  ;;  %v7486_v58 = vld [vmem:[%s9327_s4 + $0x118] sm:$0xff]   ;;  %v7496_v8 = vld [vmem:[%s9327_s4 + $0xf0] sm:$0xff]  }
 0x1a8   : > { %v1219_v12 = vadd.f32 %v1211_v11, %v1109_v61  ;;  %v1175_v13 = vpop.f32.mrb[27].mxu0  ;;  %v7077_v14 = vpop.f32.mrb[25].mxu1  ;;  %v7489_v61 = vld [vmem:[%s9327_s4 + $0x120] sm:$0xff]   ;;  %v7498_v10 = vld [vmem:[%s9327_s4 + $0x138] sm:$0xff]  }
 0x1a9   : > { %v1214_v15 = vpop.f32.mrb[26].mxu1  ;;  %v7499_v11 = vld [vmem:[%s9327_s4 + $0xf8] sm:$0xff]   ;;  %v7501_v13 = vld [vmem:[%s9327_s4 + $0x1c0] sm:$0xff]  }
 0x1aa   : > { %v7078_v16 = vpop.f32.mrb[27].mxu1  ;;  %v7502_v14 = vld [vmem:[%s9327_s4 + $0x180] sm:$0xff]  }
 0x1ad   : > { %v1280_v17 = vpop.f32.mrb[28].mxu0 }
 0x1ae   : > { %v1327_v18 = vadd.f32 %v1280_v17, %v1217_v7  ;;  %v1282_v19 = vpop.f32.mrb[29].mxu0  ;;  %v7495_v7 = vld [vmem:[%s9327_s4 + $0x130] sm:$0xff]   ;;  %v7503_v17 = vld [vmem:[%s9327_s4 + $0x200] sm:$0xff]  }
 0x1af   : > { %v1328_v20 = vadd.f32 %v1282_v19, %v1218_v9  ;;  %v1284_v21 = vpop.f32.mrb[30].mxu0  ;;  %v1321_v22 = vpop.f32.mrb[28].mxu1  ;;  %v7497_v9 = vld [vmem:[%s9327_s4 + $0x170] sm:$0xff]  }
 0x1b0   : > { %v1329_v23 = vadd.f32 %v1321_v22, %v1219_v12  ;;  %v1285_v24 = vpop.f32.mrb[31].mxu0  ;;  %v7083_v25 = vpop.f32.mrb[29].mxu1  ;;  %v7500_v12 = vld [vmem:[%s9327_s4 + $0x178] sm:$0xff]   ;;  %v7506_v21 = vld [vmem:[%s9327_s4 + $0x208] sm:$0xff]   ;;  %v7507_v22 = vld [vmem:[%s9327_s4 + $0x1d0] sm:$0xff]  }
 0x1b1   : > { %v1324_v26 = vpop.f32.mrb[30].mxu1  ;;  %v7509_v24 = vld [vmem:[%s9327_s4 + $0x210] sm:$0xff]   ;;  %v7510_v25 = vld [vmem:[%s9327_s4 + $0x1d8] sm:$0xff]  }
 0x1b2   : > { %v7084_v27 = vpop.f32.mrb[31].mxu1  ;;  %v7511_v26 = vld [vmem:[%s9327_s4 + $0x198] sm:$0xff]  }
 0x1b3   : > { %v7512_v27 = vld [vmem:[%s9327_s4 + $0x218] sm:$0xff]  }
 0x1b5   : > { %v1390_v28 = vpop.f32.mrb[32].mxu0 }
 0x1b6   : > { %v1437_v30 = vadd.f32 %v1390_v28, %v1327_v18  ;;  %v1392_v31 = vpop.f32.mrb[33].mxu0  ;;  %v7504_v18 = vld [vmem:[%s9327_s4 + $0x1c8] sm:$0xff]   ;;  %v7513_v28 = vld [vmem:[%s9327_s4 + $0x1e0] sm:$0xff]  }
 0x1b7   : > { %v1438_v32 = vadd.f32 %v1392_v31, %v1328_v20  ;;  %v1394_v33 = vpop.f32.mrb[34].mxu0  ;;  %v1431_v34 = vpop.f32.mrb[32].mxu1  ;;  %v7505_v20 = vld [vmem:[%s9327_s4 + $0x188] sm:$0xff]  }
 0x1b8   : > { %v1446_v35 = vadd.f32 %v1444_v29, %v1437_v30  ;;  %v1439_v36 = vadd.f32 %v1431_v34, %v1329_v23  ;;  %v1395_v37 = vpop.f32.mrb[35].mxu0  ;;  %v7089_v38 = vpop.f32.mrb[33].mxu1  ;;  %v7508_v23 = vld [vmem:[%s9327_s4 + $0x190] sm:$0xff]   ;;  %v7515_v30 = vld [vmem:[%s9327_s4 + $0x220] sm:$0xff]   ;;  %v7516_v31 = vld [vmem:[%s9327_s4 + $0x1e8] sm:$0xff]  }
 0x1b9   : > { %v1447_v39 = vadd.f32 %v1444_v29, %v1438_v32  ;;  %v1434_v40 = vpop.f32.mrb[34].mxu1  ;;  %v7517_v32 = vld [vmem:[%s9327_s4 + $0x1a8] sm:$0xff]   ;;  %v7519_v34 = vld [vmem:[%s9327_s4 + $0x1f0] sm:$0xff]   ;;  %v7522_v37 = vld [vmem:[%s9327_s4 + $0x1f8] sm:$0xff]  }
 0x1ba   : > { %v1449_v41 = vmax.f32 %v1446_v35, 0.0  ;;  %v1448_v42 = vadd.f32 %v1444_v29, %v1439_v36  ;;  %v7090_v43 = vpop.f32.mrb[35].mxu1  ;;  %v7514_v29 = vld [vmem:[%s9327_s4 + $0x1a0] sm:$0xff]   ;;  %v7518_v33 = vld [vmem:[%s9327_s4 + $0x228] sm:$0xff]   ;;  %v7520_v35 = vld [vmem:[%s9327_s4 + $0x1b0] sm:$0xff]  }
 0x1bb   : > { %v1450_v44 = vmax.f32 %v1447_v39, 0.0  ;;  %v7521_v36 = vld [vmem:[%s9327_s4 + $0x230] sm:$0xff]   ;;  %v7523_v38 = vld [vmem:[%s9327_s4 + $0x1b8] sm:$0xff]   ;;  %v7525_v40 = vld [vmem:[%s9327_s4 + $0x280] sm:$0xff]  }
 0x1bc   : > { %v1451_v45 = vmax.f32 %v1448_v42, 0.0  ;;  %v8184_v49 = vpack.c.bf16 %v1449_v41, %v1449_v41  ;;  %v7524_v39 = vld [vmem:[%s9327_s4 + $0x238] sm:$0xff]   ;;  %v7526_v41 = vld [vmem:[%s9327_s4 + $0x240] sm:$0xff]  }
 0x1bd   : > { %v8176_v46 = vpack.c.bf16 %v1450_v44, %v1450_v44  ;;  %v7527_v43 = vld [vmem:[%s9327_s4 + $0x2c0] sm:$0xff]  }
 0x1be   : > { %v8186_v50 = vpack.c.bf16 %v1451_v45, %v1451_v45  ;;  %v8274_v15 = vshrl.u32 %v8184_v49, 16  ;;  %v2067_v42 = vrot.slane %v8184_v49, 1  ;;  %v7528_v45 = vld [vmem:[%s9327_s4 + $0x288] sm:$0xff]  }
 0x1bf   : > { %1680 = vmatprep.mubr.bf16.mxu0 %v8176_v46  ;;  %v8193_v52 = vshrl.u32 %v8176_v46, 16  ;;  %v2068_v19 = vrot.slane %v8176_v46, 1 }
 0x1c0   : > { %1681 = vmatmul.mubr.bf16.vlgmr.msra.gmra.mrb[36].mxu0 %v8184_v49  ;;  %7108 = vmatmul.mubr.bf16.vlgmr.msra.gmra.mrb[36].mxu1 %v8186_v50  ;;  %v8277_v16 = vshrl.u32 %v8186_v50, 16  ;;  %v2069_v44 = vrot.slane %v8186_v50, 1 }
 0x1c1   : > { %6787 = vmatpush3.bf16.msra.mxu0 %v7478_v47  ;;  %7112 = vmatpush3.bf16.msra.mxu1 %v7479_v48  ;;  %v2348_v47 = vrot.slane %v8193_v52, 1  ;;  %v7529_v48 = vld [vmem:[%s9327_s4 + $0x248] sm:$0xff]  }
 0x1c2   : > { %1966 = vmatprep.mubr.bf16.mxu0 %v8193_v52  ;;  %6788 = vmatprep.subr.bf16.mxu0 %v7480_v51  ;;  %v7530_v51 = vld [vmem:[%s9327_s4 + $0x2c8] sm:$0xff]  }
 0x1c3   : > { %7113 = vmatprep.subr.bf16.mxu1 %v7780_v5  ;;  %7127 = vmatprep.mubr.msk.bf16.mxu1 %vm7782_vm0, %v7780_v5 }
 0x1c5   : > { %6789 = vmatpush3.bf16.msra.mxu0 %v7481_v53  ;;  %7114 = vmatpush3.bf16.msra.mxu1 %v7482_v54  ;;  %v7531_v53 = vld [vmem:[%s9327_s4 + $0x290] sm:$0xff]  }
 0x1c6   : > { %6790 = vmatprep.subr.bf16.mxu0 %v7483_v55  ;;  %7115 = vmatprep.subr.bf16.mxu1 %v7780_v5  ;;  %v7532_v54 = vld [vmem:[%s9327_s4 + $0x250] sm:$0xff]  }
 0x1c7   : > { %v7533_v55 = vld [vmem:[%s9327_s4 + $0x2d0] sm:$0xff]  }
 0x1c9   : > { %6791 = vmatpush3.bf16.msra.mxu0 %v7484_v56  ;;  %7116 = vmatpush3.bf16.msra.mxu1 %v7485_v57  ;;  %v7534_v56 = vld [vmem:[%s9327_s4 + $0x298] sm:$0xff]  }
 0x1ca   : > { %6792 = vmatprep.subr.bf16.mxu0 %v7486_v58  ;;  %7117 = vmatprep.subr.bf16.mxu1 %v7780_v5  ;;  %v7535_v57 = vld [vmem:[%s9327_s4 + $0x258] sm:$0xff]  }
 0x1cb   : > { %v7536_v58 = vld [vmem:[%s9327_s4 + $0x2d8] sm:$0xff]  }
 0x1cd   : > { %6793 = vmatpush3.bf16.msra.mxu0 %v7487_v59  ;;  %7118 = vmatpush3.bf16.msra.mxu1 %v7488_v60  ;;  %v7537_v59 = vld [vmem:[%s9327_s4 + $0x2a0] sm:$0xff]  }
 0x1ce   : > { %6794 = vmatprep.subr.bf16.mxu0 %v7489_v61  ;;  %7119 = vmatprep.subr.bf16.mxu1 %v7780_v5  ;;  %v7538_v60 = vld [vmem:[%s9327_s4 + $0x260] sm:$0xff]  }
 0x1cf   : > { %v7539_v61 = vld [vmem:[%s9327_s4 + $0x2e0] sm:$0xff]  }
 0x1d1   : > { %6795 = vmatpush3.bf16.msra.mxu0 %v7490_v62  ;;  %7120 = vmatpush3.bf16.msra.mxu1 %v7491_v63  ;;  %v7540_v62 = vld [vmem:[%s9327_s4 + $0x2a8] sm:$0xff]  }
 0x1d2   : > { %6796 = vmatprep.subr.bf16.mxu0 %v7492_v1  ;;  %7121 = vmatprep.subr.bf16.mxu1 %v7780_v5  ;;  %v7541_v63 = vld [vmem:[%s9327_s4 + $0x268] sm:$0xff]  }
 0x1d3   : > { %v7542_v1 = vld [vmem:[%s9327_s4 + $0x2e8] sm:$0xff]  }
 0x1d5   : > { %6797 = vmatpush3.bf16.msra.mxu0 %v7493_v2  ;;  %7122 = vmatpush3.bf16.msra.mxu1 %v7494_v4  ;;  %v7543_v2 = vld [vmem:[%s9327_s4 + $0x2b0] sm:$0xff]  }
 0x1d6   : > { %6798 = vmatprep.subr.bf16.mxu0 %v7495_v7  ;;  %7123 = vmatprep.subr.bf16.mxu1 %v7780_v5  ;;  %v7544_v4 = vld [vmem:[%s9327_s4 + $0x270] sm:$0xff]  }
 0x1d7   : > { %v7545_v7 = vld [vmem:[%s9327_s4 + $0x2f0] sm:$0xff]  }
 0x1d9   : > { %6799 = vmatpush3.bf16.msra.mxu0 %v7496_v8  ;;  %7124 = vmatpush3.bf16.msra.mxu1 %v7497_v9  ;;  %v7546_v8 = vld [vmem:[%s9327_s4 + $0x2b8] sm:$0xff]  }
 0x1da   : > { %6800 = vmatprep.subr.bf16.mxu0 %v7498_v10  ;;  %7125 = vmatprep.subr.bf16.mxu1 %v7780_v5  ;;  %v7547_v9 = vld [vmem:[%s9327_s4 + $0x278] sm:$0xff]  }
 0x1db   : > { %v7548_v10 = vld [vmem:[%s9327_s4 + $0x2f8] sm:$0xff]  }
 0x1dd   : > { %6801 = vmatpush3.bf16.msra.mxu0 %v7499_v11  ;;  %7126 = vmatpush3.bf16.msra.mxu1 %v7500_v12  ;;  %v7549_v11 = vld [vmem:[%s9327_s4 + $0x340] sm:$0xff]  }
 0x1de   : > { %6817 = vmatprep.subr.bf16.mxu0 %v7501_v13  ;;  %7131 = vmatprep.subr.bf16.mxu1 %v7780_v5  ;;  %v7550_v12 = vld [vmem:[%s9327_s4 + $0x300] sm:$0xff]   ;;  %v2347_v13 = vrot.slane %v8274_v15, 1 }
 0x1e0   : > { %1967 = vmatmul.mubr.bf16.vlgmr.msra.gmra.mrb[40].mxu0 %v8274_v15  ;;  %7128 = vmatmul.mubr.bf16.vlgmr.msra.gmra.mrb[36].mxu1 %v8277_v16 }
 0x1e1   : > { %6818 = vmatpush3.bf16.msra.mxu0 %v7502_v14  ;;  %2249 = vmatprep.mubr.bf16.mxu0 %v2068_v19  ;;  %v7551_v14 = vld [vmem:[%s9327_s4 + $0x380] sm:$0xff]   ;;  %v2628_v19 = vrot.slane %v8176_v46, 2 }
 0x1e2   : > { %7132 = vmatpush3.bf16.msra.mxu1 %v7503_v17  ;;  %6819 = vmatprep.subr.bf16.mxu0 %v7504_v18  ;;  %v2349_v17 = vrot.slane %v8277_v16, 1  ;;  %v7552_v18 = vld [vmem:[%s9327_s4 + $0x348] sm:$0xff]  }
 0x1e3   : > { %7133 = vmatprep.subr.bf16.mxu1 %v7780_v5  ;;  %7147 = vmatprep.mubr.msk.bf16.mxu1 %vm7782_vm0, %v7780_v5 }
 0x1e5   : > { %6820 = vmatpush3.bf16.msra.mxu0 %v7505_v20  ;;  %v7553_v20 = vld [vmem:[%s9327_s4 + $0x308] sm:$0xff]  }
 0x1e6   : > { %7134 = vmatpush3.bf16.msra.mxu1 %v7506_v21  ;;  %6821 = vmatprep.subr.bf16.mxu0 %v7507_v22  ;;  %v7554_v21 = vld [vmem:[%s9327_s4 + $0x388] sm:$0xff]   ;;  %v7555_v22 = vld [vmem:[%s9327_s4 + $0x350] sm:$0xff]  }
 0x1e7   : > { %7135 = vmatprep.subr.bf16.mxu1 %v7780_v5 }
 0x1e9   : > { %6822 = vmatpush3.bf16.msra.mxu0 %v7508_v23  ;;  %v7556_v23 = vld [vmem:[%s9327_s4 + $0x310] sm:$0xff]  }
 0x1ea   : > { %7136 = vmatpush3.bf16.msra.mxu1 %v7509_v24  ;;  %6823 = vmatprep.subr.bf16.mxu0 %v7510_v25  ;;  %v7557_v24 = vld [vmem:[%s9327_s4 + $0x390] sm:$0xff]   ;;  %v7558_v25 = vld [vmem:[%s9327_s4 + $0x358] sm:$0xff]  }
 0x1eb   : > { %7137 = vmatprep.subr.bf16.mxu1 %v7780_v5 }
 0x1ed   : > { %6824 = vmatpush3.bf16.msra.mxu0 %v7511_v26  ;;  %v7559_v26 = vld [vmem:[%s9327_s4 + $0x318] sm:$0xff]  }
 0x1ee   : > { %7138 = vmatpush3.bf16.msra.mxu1 %v7512_v27  ;;  %6825 = vmatprep.subr.bf16.mxu0 %v7513_v28  ;;  %v7560_v27 = vld [vmem:[%s9327_s4 + $0x398] sm:$0xff]   ;;  %v7561_v28 = vld [vmem:[%s9327_s4 + $0x360] sm:$0xff]  }
 0x1ef   : > { %7139 = vmatprep.subr.bf16.mxu1 %v7780_v5 }
 0x1f1   : > { %6826 = vmatpush3.bf16.msra.mxu0 %v7514_v29  ;;  %v7562_v29 = vld [vmem:[%s9327_s4 + $0x320] sm:$0xff]  }
 0x1f2   : > { %7140 = vmatpush3.bf16.msra.mxu1 %v7515_v30  ;;  %6827 = vmatprep.subr.bf16.mxu0 %v7516_v31  ;;  %v7563_v30 = vld [vmem:[%s9327_s4 + $0x3a0] sm:$0xff]   ;;  %v7564_v31 = vld [vmem:[%s9327_s4 + $0x368] sm:$0xff]  }
 0x1f3   : > { %7141 = vmatprep.subr.bf16.mxu1 %v7780_v5 }
 0x1f5   : > { %6828 = vmatpush3.bf16.msra.mxu0 %v7517_v32  ;;  %v7565_v32 = vld [vmem:[%s9327_s4 + $0x328] sm:$0xff]  }
 0x1f6   : > { %7142 = vmatpush3.bf16.msra.mxu1 %v7518_v33  ;;  %6829 = vmatprep.subr.bf16.mxu0 %v7519_v34  ;;  %v7566_v33 = vld [vmem:[%s9327_s4 + $0x3a8] sm:$0xff]   ;;  %v7567_v34 = vld [vmem:[%s9327_s4 + $0x370] sm:$0xff]  }
 0x1f7   : > { %7143 = vmatprep.subr.bf16.mxu1 %v7780_v5 }
 0x1f9   : > { %6830 = vmatpush3.bf16.msra.mxu0 %v7520_v35  ;;  %v7568_v35 = vld [vmem:[%s9327_s4 + $0x330] sm:$0xff]  }
 0x1fa   : > { %7144 = vmatpush3.bf16.msra.mxu1 %v7521_v36  ;;  %6831 = vmatprep.subr.bf16.mxu0 %v7522_v37  ;;  %v7569_v36 = vld [vmem:[%s9327_s4 + $0x3b0] sm:$0xff]   ;;  %v7570_v37 = vld [vmem:[%s9327_s4 + $0x378] sm:$0xff]  }
 0x1fb   : > { %7145 = vmatprep.subr.bf16.mxu1 %v7780_v5 }
 0x1fd   : > { %6832 = vmatpush3.bf16.msra.mxu0 %v7523_v38  ;;  %v7571_v38 = vld [vmem:[%s9327_s4 + $0x338] sm:$0xff]  }
 0x1fe   : > { %7146 = vmatpush3.bf16.msra.mxu1 %v7524_v39  ;;  %6848 = vmatprep.subr.bf16.mxu0 %v7525_v40  ;;  %v7572_v39 = vld [vmem:[%s9327_s4 + $0x3b8] sm:$0xff]   ;;  %v7573_v40 = vld [vmem:[%s9327_s4 + $0x400] sm:$0xff]  }
 0x1ff   : > { %7151 = vmatprep.subr.bf16.mxu1 %v7780_v5 }
 0x200   : > { %2250 = vmatmul.mubr.bf16.vlgmr.msra.gmra.mrb[44].mxu0 %v2067_v42  ;;  %v2627_v42 = vrot.slane %v8184_v49, 2 }
 0x201   : > { %7148 = vmatmul.mubr.bf16.vlgmr.msra.gmra.mrb[36].mxu1 %v2069_v44  ;;  %6849 = vmatpush3.bf16.msra.mxu0 %v7526_v41  ;;  %v7574_v41 = vld [vmem:[%s9327_s4 + $0x3c0] sm:$0xff]   ;;  %v2629_v44 = vrot.slane %v8186_v50, 2 }
 0x202   : > { %2529 = vmatprep.mubr.bf16.mxu0 %v2348_v47  ;;  %7152 = vmatpush3.bf16.msra.mxu1 %v7527_v43  ;;  %v7575_v43 = vld [vmem:[%s9327_s4 + $0x440] sm:$0xff]   ;;  %v2908_v47 = vrot.slane %v8193_v52, 2 }
 0x203   : > { %6850 = vmatprep.subr.bf16.mxu0 %v7528_v45  ;;  %7153 = vmatprep.subr.bf16.mxu1 %v7780_v5  ;;  %v7576_v45 = vld [vmem:[%s9327_s4 + $0x408] sm:$0xff]  }
 0x204   : > { %7167 = vmatprep.mubr.msk.bf16.mxu1 %vm7782_vm0, %v7780_v5 }
 0x205   : > { %6851 = vmatpush3.bf16.msra.mxu0 %v7529_v48  ;;  %v7577_v48 = vld [vmem:[%s9327_s4 + $0x3c8] sm:$0xff]  }
 0x206   : > { %7154 = vmatpush3.bf16.msra.mxu1 %v7530_v51  ;;  %6852 = vmatprep.subr.bf16.mxu0 %v7531_v53  ;;  %v7578_v51 = vld [vmem:[%s9327_s4 + $0x448] sm:$0xff]   ;;  %v7579_v53 = vld [vmem:[%s9327_s4 + $0x410] sm:$0xff]  }
 0x207   : > { %7155 = vmatprep.subr.bf16.mxu1 %v7780_v5 }
 0x209   : > { %6853 = vmatpush3.bf16.msra.mxu0 %v7532_v54  ;;  %v7580_v54 = vld [vmem:[%s9327_s4 + $0x3d0] sm:$0xff]  }
 0x20a   : > { %7156 = vmatpush3.bf16.msra.mxu1 %v7533_v55  ;;  %6854 = vmatprep.subr.bf16.mxu0 %v7534_v56  ;;  %v7581_v55 = vld [vmem:[%s9327_s4 + $0x450] sm:$0xff]   ;;  %v7582_v56 = vld [vmem:[%s9327_s4 + $0x418] sm:$0xff]  }
 0x20b   : > { %7157 = vmatprep.subr.bf16.mxu1 %v7780_v5 }
 0x20d   : > { %6855 = vmatpush3.bf16.msra.mxu0 %v7535_v57  ;;  %v7583_v57 = vld [vmem:[%s9327_s4 + $0x3d8] sm:$0xff]  }
 0x20e   : > { %7158 = vmatpush3.bf16.msra.mxu1 %v7536_v58  ;;  %6856 = vmatprep.subr.bf16.mxu0 %v7537_v59  ;;  %v7584_v58 = vld [vmem:[%s9327_s4 + $0x458] sm:$0xff]   ;;  %v7585_v59 = vld [vmem:[%s9327_s4 + $0x420] sm:$0xff]  }
 0x20f   : > { %7159 = vmatprep.subr.bf16.mxu1 %v7780_v5 }
 0x211   : > { %6857 = vmatpush3.bf16.msra.mxu0 %v7538_v60  ;;  %v7586_v60 = vld [vmem:[%s9327_s4 + $0x3e0] sm:$0xff]  }
 0x212   : > { %7160 = vmatpush3.bf16.msra.mxu1 %v7539_v61  ;;  %6858 = vmatprep.subr.bf16.mxu0 %v7540_v62  ;;  %v7587_v61 = vld [vmem:[%s9327_s4 + $0x460] sm:$0xff]   ;;  %v7588_v62 = vld [vmem:[%s9327_s4 + $0x428] sm:$0xff]  }
 0x213   : > { %7161 = vmatprep.subr.bf16.mxu1 %v7780_v5 }
 0x215   : > { %6859 = vmatpush3.bf16.msra.mxu0 %v7541_v63  ;;  %v7589_v63 = vld [vmem:[%s9327_s4 + $0x3e8] sm:$0xff]  }
 0x216   : > { %7162 = vmatpush3.bf16.msra.mxu1 %v7542_v1  ;;  %6860 = vmatprep.subr.bf16.mxu0 %v7543_v2  ;;  %v7590_v1 = vld [vmem:[%s9327_s4 + $0x468] sm:$0xff]   ;;  %v7591_v2 = vld [vmem:[%s9327_s4 + $0x430] sm:$0xff]  }
 0x217   : > { %7163 = vmatprep.subr.bf16.mxu1 %v7780_v5 }
 0x219   : > { %6861 = vmatpush3.bf16.msra.mxu0 %v7544_v4  ;;  %v7592_v4 = vld [vmem:[%s9327_s4 + $0x3f0] sm:$0xff]  }
 0x21a   : > { %7164 = vmatpush3.bf16.msra.mxu1 %v7545_v7  ;;  %6862 = vmatprep.subr.bf16.mxu0 %v7546_v8  ;;  %v7593_v7 = vld [vmem:[%s9327_s4 + $0x470] sm:$0xff]   ;;  %v7594_v8 = vld [vmem:[%s9327_s4 + $0x438] sm:$0xff]  }
 0x21b   : > { %7165 = vmatprep.subr.bf16.mxu1 %v7780_v5 }
 0x21d   : > { %6863 = vmatpush3.bf16.msra.mxu0 %v7547_v9  ;;  %v7595_v9 = vld [vmem:[%s9327_s4 + $0x3f8] sm:$0xff]  }
 0x21e   : > { %7166 = vmatpush3.bf16.msra.mxu1 %v7548_v10  ;;  %6879 = vmatprep.subr.bf16.mxu0 %v7549_v11  ;;  %v7596_v10 = vld [vmem:[%s9327_s4 + $0x478] sm:$0xff]   ;;  %v7597_v11 = vld [vmem:[%s9327_s4 + $0x4c0] sm:$0xff]  }
 0x21f   : > { %7171 = vmatprep.subr.bf16.mxu1 %v7780_v5 }
 0x220   : > { %2530 = vmatmul.mubr.bf16.vlgmr.msra.gmra.mrb[48].mxu0 %v2347_v13  ;;  %v2907_v13 = vrot.slane %v8274_v15, 2 }
 0x221   : > { %7168 = vmatmul.mubr.bf16.vlgmr.msra.gmra.mrb[36].mxu1 %v2349_v17  ;;  %6880 = vmatpush3.bf16.msra.mxu0 %v7550_v12  ;;  %v7598_v12 = vld [vmem:[%s9327_s4 + $0x480] sm:$0xff]   ;;  %v2909_v17 = vrot.slane %v8277_v16, 2 }
 0x222   : > { %2809 = vmatprep.mubr.bf16.mxu0 %v2628_v19  ;;  %7172 = vmatpush3.bf16.msra.mxu1 %v7551_v14  ;;  %v7599_v14 = vld [vmem:[%s9327_s4 + $0x500] sm:$0xff]   ;;  %v3188_v19 = vrot.slane %v8176_v46, 3  ;;  %v7604_v46 = vld [vmem:[%s9327_s4 + $0x490] sm:$0xff]  }
 0x223   : > { %6881 = vmatprep.subr.bf16.mxu0 %v7552_v18  ;;  %7173 = vmatprep.subr.bf16.mxu1 %v7780_v5  ;;  %v7600_v18 = vld [vmem:[%s9327_s4 + $0x4c8] sm:$0xff]  }
 0x224   : > { %7187 = vmatprep.mubr.msk.bf16.mxu1 %vm7782_vm0, %v7780_v5 }
 0x225   : > { %6882 = vmatpush3.bf16.msra.mxu0 %v7553_v20  ;;  %v7601_v20 = vld [vmem:[%s9327_s4 + $0x488] sm:$0xff]  }
 0x226   : > { %7174 = vmatpush3.bf16.msra.mxu1 %v7554_v21  ;;  %6883 = vmatprep.subr.bf16.mxu0 %v7555_v22  ;;  %v7602_v21 = vld [vmem:[%s9327_s4 + $0x508] sm:$0xff]   ;;  %v7603_v22 = vld [vmem:[%s9327_s4 + $0x4d0] sm:$0xff]  }
 0x227   : > { %7175 = vmatprep.subr.bf16.mxu1 %v7780_v5 }
 0x229   : > { %6884 = vmatpush3.bf16.msra.mxu0 %v7556_v23  ;;  %v7605_v23 = vld [vmem:[%s9327_s4 + $0x510] sm:$0xff]  }
 0x22a   : > { %7176 = vmatpush3.bf16.msra.mxu1 %v7557_v24  ;;  %6885 = vmatprep.subr.bf16.mxu0 %v7558_v25  ;;  %v7606_v24 = vld [vmem:[%s9327_s4 + $0x4d8] sm:$0xff]  }
 0x22b   : > { %7177 = vmatprep.subr.bf16.mxu1 %v7780_v5  ;;  %v7607_v25 = vld [vmem:[%s9327_s4 + $0x498] sm:$0xff]  }
 0x22d   : > { %6886 = vmatpush3.bf16.msra.mxu0 %v7559_v26  ;;  %v7608_v26 = vld [vmem:[%s9327_s4 + $0x518] sm:$0xff]  }
 0x22e   : > { %7178 = vmatpush3.bf16.msra.mxu1 %v7560_v27  ;;  %6887 = vmatprep.subr.bf16.mxu0 %v7561_v28  ;;  %v7609_v27 = vld [vmem:[%s9327_s4 + $0x4e0] sm:$0xff]  }
 0x22f   : > { %7179 = vmatprep.subr.bf16.mxu1 %v7780_v5  ;;  %v7610_v28 = vld [vmem:[%s9327_s4 + $0x4a0] sm:$0xff]  }
 0x231   : > { %6888 = vmatpush3.bf16.msra.mxu0 %v7562_v29  ;;  %v7611_v29 = vld [vmem:[%s9327_s4 + $0x520] sm:$0xff]  }
 0x232   : > { %7180 = vmatpush3.bf16.msra.mxu1 %v7563_v30  ;;  %6889 = vmatprep.subr.bf16.mxu0 %v7564_v31  ;;  %v7612_v30 = vld [vmem:[%s9327_s4 + $0x4e8] sm:$0xff]  }
 0x233   : > { %7181 = vmatprep.subr.bf16.mxu1 %v7780_v5  ;;  %v7613_v31 = vld [vmem:[%s9327_s4 + $0x4a8] sm:$0xff]  }
 0x235   : > { %6890 = vmatpush3.bf16.msra.mxu0 %v7565_v32  ;;  %v7614_v32 = vld [vmem:[%s9327_s4 + $0x528] sm:$0xff]  }
 0x236   : > { %7182 = vmatpush3.bf16.msra.mxu1 %v7566_v33  ;;  %6891 = vmatprep.subr.bf16.mxu0 %v7567_v34  ;;  %v7615_v33 = vld [vmem:[%s9327_s4 + $0x4f0] sm:$0xff]  }
 0x237   : > { %7183 = vmatprep.subr.bf16.mxu1 %v7780_v5  ;;  %v7616_v34 = vld [vmem:[%s9327_s4 + $0x4b0] sm:$0xff]  }
 0x239   : > { %6892 = vmatpush3.bf16.msra.mxu0 %v7568_v35  ;;  %v7617_v35 = vld [vmem:[%s9327_s4 + $0x530] sm:$0xff]  }
 0x23a   : > { %7184 = vmatpush3.bf16.msra.mxu1 %v7569_v36  ;;  %6893 = vmatprep.subr.bf16.mxu0 %v7570_v37  ;;  %v7618_v36 = vld [vmem:[%s9327_s4 + $0x4f8] sm:$0xff]   ;;  %v3709_v37 = vld [vmem:[%s441_s16] sm:$0x1]  ;;  %s9338_s16 = smov 92  }
 0x23b   : > { %7185 = vmatprep.subr.bf16.mxu1 %v7780_v5  ;;  %3711 = vrot.lane.b32.xlu1 %v3709_v37, %s7791_s2 }
 0x23d   : > { %6894 = vmatpush3.bf16.msra.mxu0 %v7571_v38  ;;  %v7619_v38 = vld [vmem:[%s9327_s4 + $0x4b8] sm:$0xff]  }
 0x23e   : > { %7186 = vmatpush3.bf16.msra.mxu1 %v7572_v39  ;;  %6910 = vmatprep.subr.bf16.mxu0 %v7573_v40  ;;  %v7620_v39 = vld [vmem:[%s9327_s4 + $0x538] sm:$0xff]   ;;  %v7621_v40 = vld [vmem:[%s9327_s4 + $0x580] sm:$0xff]  }
 0x23f   : > { %7191 = vmatprep.subr.bf16.mxu1 %v7780_v5 }
 0x240   : > { %2810 = vmatmul.mubr.bf16.vlgmr.msra.gmra.mrb[52].mxu0 %v2627_v42  ;;  %v3187_v42 = vrot.slane %v8184_v49, 3  ;;  %v7625_v49 = vld [vmem:[%s9327_s4 + $0x548] sm:$0xff]  }
 0x241   : > { %7188 = vmatmul.mubr.bf16.vlgmr.msra.gmra.mrb[36].mxu1 %v2629_v44  ;;  %6911 = vmatpush3.bf16.msra.mxu0 %v7574_v41  ;;  %v7622_v41 = vld [vmem:[%s9327_s4 + $0x540] sm:$0xff]   ;;  %v3189_v44 = vrot.slane %v8186_v50, 3  ;;  %v7626_v50 = vld [vmem:[%s9327_s4 + $0x5c8] sm:$0xff]  }
 0x242   : > { %3089 = vmatprep.mubr.bf16.mxu0 %v2908_v47  ;;  %7192 = vmatpush3.bf16.msra.mxu1 %v7575_v43  ;;  %v7623_v43 = vld [vmem:[%s9327_s4 + $0x5c0] sm:$0xff]   ;;  %v3468_v47 = vrot.slane %v8193_v52, 3  ;;  %v7628_v52 = vld [vmem:[%s9327_s4 + $0x550] sm:$0xff]  }
 0x243   : > { %6912 = vmatprep.subr.bf16.mxu0 %v7576_v45  ;;  %7193 = vmatprep.subr.bf16.mxu1 %v7780_v5  ;;  %v7624_v45 = vld [vmem:[%s9327_s4 + $0x588] sm:$0xff]  }
 0x244   : > { %7207 = vmatprep.mubr.msk.bf16.mxu1 %vm7782_vm0, %v7780_v5 }
 0x245   : > { %6913 = vmatpush3.bf16.msra.mxu0 %v7577_v48  ;;  %v7627_v48 = vld [vmem:[%s9327_s4 + $0x590] sm:$0xff]  }
 0x246   : > { %7194 = vmatpush3.bf16.msra.mxu1 %v7578_v51  ;;  %6914 = vmatprep.subr.bf16.mxu0 %v7579_v53  ;;  %v7629_v51 = vld [vmem:[%s9327_s4 + $0x5d0] sm:$0xff]   ;;  %v7630_v53 = vld [vmem:[%s9327_s4 + $0x598] sm:$0xff]  }
 0x247   : > { %7195 = vmatprep.subr.bf16.mxu1 %v7780_v5 }
 0x249   : > { %6915 = vmatpush3.bf16.msra.mxu0 %v7580_v54  ;;  %v7631_v54 = vld [vmem:[%s9327_s4 + $0x558] sm:$0xff]  }
 0x24a   : > { %7196 = vmatpush3.bf16.msra.mxu1 %v7581_v55  ;;  %6916 = vmatprep.subr.bf16.mxu0 %v7582_v56  ;;  %v7632_v55 = vld [vmem:[%s9327_s4 + $0x5d8] sm:$0xff]   ;;  %v7633_v56 = vld [vmem:[%s9327_s4 + $0x5a0] sm:$0xff]  }
 0x24b   : > { %7197 = vmatprep.subr.bf16.mxu1 %v7780_v5 }
 0x24d   : > { %6917 = vmatpush3.bf16.msra.mxu0 %v7583_v57  ;;  %v7634_v57 = vld [vmem:[%s9327_s4 + $0x560] sm:$0xff]  }
 0x24e   : > { %7198 = vmatpush3.bf16.msra.mxu1 %v7584_v58  ;;  %6918 = vmatprep.subr.bf16.mxu0 %v7585_v59  ;;  %v7635_v58 = vld [vmem:[%s9327_s4 + $0x5e0] sm:$0xff]   ;;  %v7636_v59 = vld [vmem:[%s9327_s4 + $0x5a8] sm:$0xff]  }
 0x24f   : > { %7199 = vmatprep.subr.bf16.mxu1 %v7780_v5 }
 0x251   : > { %6919 = vmatpush3.bf16.msra.mxu0 %v7586_v60  ;;  %v7637_v60 = vld [vmem:[%s9327_s4 + $0x568] sm:$0xff]  }
 0x252   : > { %7200 = vmatpush3.bf16.msra.mxu1 %v7587_v61  ;;  %6920 = vmatprep.subr.bf16.mxu0 %v7588_v62  ;;  %v7638_v61 = vld [vmem:[%s9327_s4 + $0x5e8] sm:$0xff]   ;;  %v7639_v62 = vld [vmem:[%s9327_s4 + $0x5b0] sm:$0xff]  }
 0x253   : > { %7201 = vmatprep.subr.bf16.mxu1 %v7780_v5 }
 0x255   : > { %6921 = vmatpush3.bf16.msra.mxu0 %v7589_v63 }
 0x256   : > { %7202 = vmatpush3.bf16.msra.mxu1 %v7590_v1  ;;  %6922 = vmatprep.subr.bf16.mxu0 %v7591_v2 }
 0x257   : > { %7203 = vmatprep.subr.bf16.mxu1 %v7780_v5 }
 0x259   : > { %6923 = vmatpush3.bf16.msra.mxu0 %v7592_v4 }
 0x25a   : > { %7204 = vmatpush3.bf16.msra.mxu1 %v7593_v7  ;;  %6924 = vmatprep.subr.bf16.mxu0 %v7594_v8  ;;  %v7640_v7 = vld [vmem:[%s9327_s4 + $0x570] sm:$0xff]  }
 0x25b   : > { %7205 = vmatprep.subr.bf16.mxu1 %v7780_v5 }
 0x25d   : > { %6925 = vmatpush3.bf16.msra.mxu0 %v7595_v9  ;;  %v7641_v9 = vld [vmem:[%s9327_s4 + $0x5f0] sm:$0xff]  }
 0x25e   : > { %7206 = vmatpush3.bf16.msra.mxu1 %v7596_v10  ;;  %6941 = vmatprep.subr.bf16.mxu0 %v7597_v11  ;;  %v7642_v10 = vld [vmem:[%s9327_s4 + $0x5b8] sm:$0xff]  }
 0x25f   : > { %7211 = vmatprep.subr.bf16.mxu1 %v7780_v5  ;;  %v7643_v11 = vld [vmem:[%s9327_s4 + $0x578] sm:$0xff]  }
 0x260   : > { %3090 = vmatmul.mubr.bf16.vlgmr.msra.gmra.mrb[56].mxu0 %v2907_v13  ;;  %v3467_v13 = vrot.slane %v8274_v15, 3 }
 0x261   : > { %7208 = vmatmul.mubr.bf16.vlgmr.msra.gmra.mrb[36].mxu1 %v2909_v17  ;;  %6942 = vmatpush3.bf16.msra.mxu0 %v7598_v12  ;;  %v7644_v12 = vld [vmem:[%s9327_s4 + $0x5f8] sm:$0xff]   ;;  %v1455_v17 = vld [vmem:[%s9329_s5] sm:$0x1] }
 0x262   : > { %3369 = vmatprep.mubr.bf16.mxu0 %v3188_v19  ;;  %7212 = vmatpush3.bf16.msra.mxu1 %v7599_v14  ;;  %v3469_v14 = vrot.slane %v8277_v16, 3 }
 0x263   : > { %6943 = vmatprep.subr.bf16.mxu0 %v7600_v18  ;;  %7213 = vmatprep.subr.bf16.mxu1 %v7780_v5 }
 0x264   : > { %7227 = vmatprep.mubr.msk.bf16.mxu1 %vm7782_vm0, %v7780_v5 }
 0x265   : > { %6944 = vmatpush3.bf16.msra.mxu0 %v7601_v20 }
 0x266   : > { %7214 = vmatpush3.bf16.msra.mxu1 %v7602_v21  ;;  %6945 = vmatprep.subr.bf16.mxu0 %v7603_v22 }
 0x267   : > { %7215 = vmatprep.subr.bf16.mxu1 %v7780_v5 }
 0x269   : > { %6946 = vmatpush3.bf16.msra.mxu0 %v7604_v46 }
 0x26a   : > { %7216 = vmatpush3.bf16.msra.mxu1 %v7605_v23  ;;  %6947 = vmatprep.subr.bf16.mxu0 %v7606_v24 }
 0x26b   : > { %7217 = vmatprep.subr.bf16.mxu1 %v7780_v5 }
 0x26d   : > { %6948 = vmatpush3.bf16.msra.mxu0 %v7607_v25 }
 0x26e   : > { %7218 = vmatpush3.bf16.msra.mxu1 %v7608_v26  ;;  %6949 = vmatprep.subr.bf16.mxu0 %v7609_v27 }
 0x26f   : > { %7219 = vmatprep.subr.bf16.mxu1 %v7780_v5 }
 0x271   : > { %6950 = vmatpush3.bf16.msra.mxu0 %v7610_v28 }
 0x272   : > { %7220 = vmatpush3.bf16.msra.mxu1 %v7611_v29  ;;  %6951 = vmatprep.subr.bf16.mxu0 %v7612_v30 }
 0x273   : > { %7221 = vmatprep.subr.bf16.mxu1 %v7780_v5 }
 0x275   : > { %6952 = vmatpush3.bf16.msra.mxu0 %v7613_v31 }
 0x276   : > { %7222 = vmatpush3.bf16.msra.mxu1 %v7614_v32  ;;  %6953 = vmatprep.subr.bf16.mxu0 %v7615_v33 }
 0x277   : > { %7223 = vmatprep.subr.bf16.mxu1 %v7780_v5 }
 0x279   : > { %6954 = vmatpush3.bf16.msra.mxu0 %v7616_v34 }
 0x27a   : > { %7224 = vmatpush3.bf16.msra.mxu1 %v7617_v35  ;;  %6955 = vmatprep.subr.bf16.mxu0 %v7618_v36 }
 0x27b   : > { %7225 = vmatprep.subr.bf16.mxu1 %v7780_v5 }
 0x27d   : > { %6956 = vmatpush3.bf16.msra.mxu0 %v7619_v38 }
 0x27e   : > { %7226 = vmatpush3.bf16.msra.mxu1 %v7620_v39  ;;  %6972 = vmatprep.subr.bf16.mxu0 %v7621_v40 }
 0x27f   : > { %7231 = vmatprep.subr.bf16.mxu1 %v7780_v5 }
 0x280   : > { %3370 = vmatmul.mubr.bf16.vlgmr.msra.gmra.mrb[60].mxu0 %v3187_v42 }
 0x281   : > { %7228 = vmatmul.mubr.bf16.vlgmr.msra.gmra.mrb[36].mxu1 %v3189_v44  ;;  %6973 = vmatpush3.bf16.msra.mxu0 %v7622_v41 }
 0x282   : > { %3649 = vmatprep.mubr.bf16.mxu0 %v3468_v47  ;;  %7232 = vmatpush3.bf16.msra.mxu1 %v7623_v43 }
 0x283   : > { %6974 = vmatprep.subr.bf16.mxu0 %v7624_v45  ;;  %7233 = vmatprep.subr.bf16.mxu1 %v7780_v5 }
 0x284   : > { %7247 = vmatprep.mubr.msk.bf16.mxu1 %vm7782_vm0, %v7780_v5 }
 0x285   : > { %6975 = vmatpush3.bf16.msra.mxu0 %v7625_v49 }
 0x286   : > { %7234 = vmatpush3.bf16.msra.mxu1 %v7626_v50  ;;  %6976 = vmatprep.subr.bf16.mxu0 %v7627_v48 }
 0x287   : > { %7235 = vmatprep.subr.bf16.mxu1 %v7780_v5 }
 0x289   : > { %6977 = vmatpush3.bf16.msra.mxu0 %v7628_v52 }
 0x28a   : > { %7236 = vmatpush3.bf16.msra.mxu1 %v7629_v51  ;;  %6978 = vmatprep.subr.bf16.mxu0 %v7630_v53  ;;  %v7645_v53 = vld [vmem:[%s9330_s6] ss:$12 sps:$4 sm:$0xff]  }
 0x28b   : > { %7237 = vmatprep.subr.bf16.mxu1 %v7780_v5 }
 0x28d   : > { %6979 = vmatpush3.bf16.msra.mxu0 %v7631_v54  ;;  %v7647_v54 = vld [vmem:[%s9330_s6 + $0x4] ss:$12 sps:$4 sm:$0xff]  }
 0x28e   : > { %7238 = vmatpush3.bf16.msra.mxu1 %v7632_v55  ;;  %6980 = vmatprep.subr.bf16.mxu0 %v7633_v56  ;;  %v7648_v55 = vld [vmem:[%s9330_s6 + $0x8] ss:$12 sps:$4 sm:$0xff]  }
 0x28f   : > { %7239 = vmatprep.subr.bf16.mxu1 %v7780_v5 }
 0x291   : > { %6981 = vmatpush3.bf16.msra.mxu0 %v7634_v57 }
 0x292   : > { %7240 = vmatpush3.bf16.msra.mxu1 %v7635_v58  ;;  %6982 = vmatprep.subr.bf16.mxu0 %v7636_v59 }
 0x293   : > { %v6771_v63 = vpop.f32.mrb[36].mxu0  ;;  %7241 = vmatprep.subr.bf16.mxu1 %v7780_v5 }
 0x294   : > { %v6772_v1 = vpop.f32.mrb[37].mxu0 }
 0x295   : > { %v6773_v2 = vadd.f32 %v6772_v1, %v6771_v63  ;;  %6983 = vmatpush3.bf16.msra.mxu0 %v7637_v60  ;;  %v6774_v4 = vpop.f32.mrb[38].mxu0 }
 0x296   : > { %7242 = vmatpush3.bf16.msra.mxu1 %v7638_v61  ;;  %v6775_v8 = vpop.f32.mrb[39].mxu0  ;;  %6984 = vmatprep.subr.bf16.mxu0 %v7639_v62 }
 0x297   : > { %7243 = vmatprep.subr.bf16.mxu1 %v7780_v5  ;;  %v7353_v20 = vadd.f32 %v6773_v2, %v1455_v17 }
 0x299   : > { %6985 = vmatpush3.bf16.msra.mxu0 %v7640_v7  ;;  %v7651_v7 = vld [vmem:[%s9330_s6 + $0x1c] ss:$12 sps:$4 sm:$0xff]  }
 0x29a   : > { %7244 = vmatpush3.bf16.msra.mxu1 %v7641_v9  ;;  %6986 = vmatprep.subr.bf16.mxu0 %v7642_v10 }
 0x29b   : > { %7245 = vmatprep.subr.bf16.mxu1 %v7780_v5 }
 0x29d   : > { %6987 = vmatpush3.bf16.msra.mxu0 %v7643_v11 }
 0x29e   : > { %7246 = vmatpush3.bf16.msra.mxu1 %v7644_v12  ;;  %3764 = vmatprep.subr.bf16.mxu0 %v7647_v54  ;;  %v6631_v54 = vld [vmem:[%s9291_s7 + $0x1] ss:$8 sm:$0x7] }
 0x29f   : > { %7251 = vmatprep.subr.bf16.mxu1 %v7780_v5 }
 0x2a0   : > { %3650 = vmatmul.mubr.bf16.vlgmr.msra.gmra.mrb[64].mxu0 %v3467_v13  ;;  %v7649_v13 = vld [vmem:[%s9330_s6 + $0x18] ss:$12 sps:$4 sm:$0xff]  }
 0x2a1   : > { %7248 = vmatmul.mubr.bf16.vlgmr.msra.gmra.mrb[36].mxu1 %v3469_v14  ;;  %3796 = vmatprep.mubr.bf16.mxu0 %v7781_v6  ;;  %v7652_v14 = vld [vmem:[%s9330_s6 + $0x20] ss:$12 sps:$4 sm:$0xff]  }
 0x2a2   : > { %7253 = vmatprep.mubr.msk.bf16.mxu1 %vm7782_vm0, %v7780_v5  ;;  %7252 = vmatpush3.bf16.msra.mxu1 %v7648_v55 }
 0x2a3   : > { %3765 = vmatpush1.bf16.msra.mxu0 %v7645_v53  ;;  %7257 = vmatprep.subr.bf16.mxu1 %v7780_v5 }
 0x2a4   : > { %3917 = vmatprep.subr.bf16.mxu0 %v7651_v7 }
 0x2ad   : > { %v3712_v8 = vpop.permute.xlu1 %3711 }
 0x2b3   : > { %v6802_v18 = vpop.f32.mrb[40].mxu0 }
 0x2b4   : > { %v6803_v19 = vpop.f32.mrb[41].mxu0 }
 0x2b5   : > { %v6804_v21 = vadd.f32 %v6803_v19, %v6802_v18  ;;  %v6805_v15 = vpop.f32.mrb[42].mxu0  ;;  %v7655_v18 = vld [vmem:[%s9330_s6 + $0x34] ss:$12 sps:$4 sm:$0xff]   ;;  %v7653_v19 = vld [vmem:[%s9330_s6 + $0x30] ss:$12 sps:$4 sm:$0xff]  }
 0x2b6   : > { %v6806_v22 = vpop.f32.mrb[43].mxu0  ;;  %v7657_v15 = vld [vmem:[%s9330_s6 + $0x48] ss:$12 sps:$4 sm:$0xff]  }
 0x2b7   : > { %v7354_v16 = vadd.f32 %v7353_v20, %v6804_v21  ;;  %v7656_v20 = vld [vmem:[%s9330_s6 + $0x38] ss:$12 sps:$4 sm:$0xff]   ;;  %v7660_v22 = vld [vmem:[%s9330_s6 + $0x50] ss:$12 sps:$4 sm:$0xff]  }
 0x2b8   : > { %v7659_v21 = vld [vmem:[%s9330_s6 + $0x4c] ss:$12 sps:$4 sm:$0xff]  }
 0x2d3   : > { %v6833_v46 = vpop.f32.mrb[44].mxu0 }
 0x2d4   : > { %v6834_v23 = vpop.f32.mrb[45].mxu0 }
 0x2d5   : > { %v6835_v24 = vadd.f32 %v6834_v23, %v6833_v46  ;;  %v6836_v25 = vpop.f32.mrb[46].mxu0  ;;  %v7661_v46 = vld [vmem:[%s9330_s6 + $0x60] ss:$12 sps:$4 sm:$0xff]   ;;  %v7664_v23 = vld [vmem:[%s9330_s6 + $0x68] ss:$12 sps:$4 sm:$0xff]  }
 0x2d6   : > { %v6837_v26 = vpop.f32.mrb[47].mxu0  ;;  %v7665_v25 = vld [vmem:[%s9330_s6 + $0x78] ss:$12 sps:$4 sm:$0xff]  }
 0x2d7   : > { %v7355_v27 = vadd.f32 %v7354_v16, %v6835_v24  ;;  %v7663_v16 = vld [vmem:[%s9330_s6 + $0x64] ss:$12 sps:$4 sm:$0xff]   ;;  %v7667_v24 = vld [vmem:[%s9330_s6 + $0x7c] ss:$12 sps:$4 sm:$0xff]   ;;  %v7668_v26 = vld [vmem:[%s9330_s6 + $0x80] ss:$12 sps:$4 sm:$0xff]  }
 0x2f3   : > { %v6864_v28 = vpop.f32.mrb[48].mxu0 }
 0x2f4   : > { %v6865_v29 = vpop.f32.mrb[49].mxu0 }
 0x2f5   : > { %v6866_v30 = vadd.f32 %v6865_v29, %v6864_v28  ;;  %v6867_v31 = vpop.f32.mrb[50].mxu0  ;;  %v7669_v28 = vld [vmem:[%s9330_s6 + $0x90] ss:$12 sps:$4 sm:$0xff]   ;;  %v7672_v29 = vld [vmem:[%s9330_s6 + $0x98] ss:$12 sps:$4 sm:$0xff]  }
 0x2f6   : > { %v6868_v32 = vpop.f32.mrb[51].mxu0  ;;  %v7673_v31 = vld [vmem:[%s9330_s6 + $0xa8] ss:$12 sps:$4 sm:$0xff]  }
 0x2f7   : > { %v7356_v33 = vadd.f32 %v7355_v27, %v6866_v30  ;;  %v7671_v27 = vld [vmem:[%s9330_s6 + $0x94] ss:$12 sps:$4 sm:$0xff]   ;;  %v7675_v30 = vld [vmem:[%s9330_s6 + $0xac] ss:$12 sps:$4 sm:$0xff]   ;;  %v7676_v32 = vld [vmem:[%s9330_s6 + $0xb0] ss:$12 sps:$4 sm:$0xff]  }
 0x313   : > { %v6895_v34 = vpop.f32.mrb[52].mxu0 }
 0x314   : > { %v6896_v35 = vpop.f32.mrb[53].mxu0 }
 0x315   : > { %v6897_v36 = vadd.f32 %v6896_v35, %v6895_v34  ;;  %v6898_v37 = vpop.f32.mrb[54].mxu0  ;;  %v8953_v34 = vsub.s32 2, %v7914_v3  ;;  %v7793_v35 = vmov 1966171168  }
 0x316   : > { %v6899_v38 = vpop.f32.mrb[55].mxu0  ;;  %v8956_v37 = vsub.s32 1, %v7914_v3 }
 0x317   : > { %v7357_v39 = vadd.f32 %v7356_v33, %v6897_v36  ;;  %v3724_v33 = vld [vmem:[%s9291_s7] ss:$8 sm:$0x7]  ;;  %v3850_v36 = vunpack.c.l.s4 %v7793_v35  ;;  %v8959_v38 = vsub.s32 0, %v7914_v3 }
 0x333   : > { %v6926_v40 = vpop.f32.mrb[56].mxu0 }
 0x334   : > { %v6927_v41 = vpop.f32.mrb[57].mxu0 }
 0x335   : > { %v6928_v42 = vadd.f32 %v6927_v41, %v6926_v40  ;;  %v6929_v43 = vpop.f32.mrb[58].mxu0  ;;  %v3756_v40 = vrot.slane %v3724_v33, %v8953_v34  ;;  %v3851_v41 = vunpack.c.0.s8 %v3850_v36 }
 0x336   : > { %v6930_v44 = vpop.f32.mrb[59].mxu0 }
 0x337   : > { %v7358_v45 = vadd.f32 %v7357_v39, %v6928_v42  ;;  %v3748_v39 = vrot.slane %v3724_v33, %v8959_v38  ;;  %v3752_v42 = vrot.slane %v3724_v33, %v8956_v37  ;;  %v6651_v33 = vld [vmem:[%s9291_s7 + $0x3] ss:$8 sm:$0x7] }
 0x353   : > { %v6957_v47 = vpop.f32.mrb[60].mxu0 }
 0x354   : > { %v6958_v49 = vpop.f32.mrb[61].mxu0 }
 0x355   : > { %v6959_v50 = vadd.f32 %v6958_v49, %v6957_v47  ;;  %v6960_v48 = vpop.f32.mrb[62].mxu0 }
 0x356   : > { %v6961_v52 = vpop.f32.mrb[63].mxu0  ;;  %v8965_v48 = vsub.s32 %v3851_v41, %v7914_v3  ;;  %v3909_v3 = vrot.slane %v6631_v54, %v8956_v37 }
 0x357   : > { %v7359_v51 = vadd.f32 %v7358_v45, %v6959_v50 }
 0x373   : > { %v6988_v56 = vpop.f32.mrb[64].mxu0 }
 0x374   : > { %v3691_v57 = vpop.f32.mrb[36].mxu1  ;;  %v6989_v58 = vpop.f32.mrb[65].mxu0 }
 0x375   : > { %v6990_v59 = vadd.f32 %v6989_v58, %v6988_v56  ;;  %v7249_v60 = vpop.f32.mrb[37].mxu1  ;;  %v6991_v61 = vpop.f32.mrb[66].mxu0  ;;  %v3905_v58 = vrot.slane %v6631_v54, %v8959_v38 }
 0x376   : > { %v3694_v62 = vpop.f32.mrb[38].mxu1  ;;  %v6992_v63 = vpop.f32.mrb[67].mxu0  ;;  %v3913_v61 = vrot.slane %v6631_v54, %v8953_v34 }
 0x377   : > { %v7360_v1 = vadd.f32 %v7359_v51, %v6990_v59  ;;  %v7250_v2 = vpop.f32.mrb[39].mxu1 }
 0x378   : > { %v5878_v2 = vld [vmem:[%s9293_s9] sm:$0xf] }
 0x379   : > { %v8810_v4 = vadd.f32 %v7360_v1, %v3691_v57 }
 0x37b   : > { %3715 = vrot.lane.b32.xlu1 %v8810_v4, %s7791_s2  ;;  %3699 = vst.msk [vmem:[%s427_s29] sm:$0x1] %vm3698_vm11, %v8810_v4  ;;  %v3714_v9 = vmul.f32 %v8810_v4, %v3712_v8  ;;  %s9333_s2 = smov 127  }
 0x3ed   : > { %v3716_v10 = vpop.permute.xlu1 %3715 }
 0x3ee   : > { %v3718_v11 = vadd.f32 %v3716_v10, %v3714_v9 }
 0x3f0   : > { %v3719_v12 = vpack.c.bf16 %v3718_v11, %v3718_v11 }
 0x3f2   : > { %3726 = vrot.lane.b32.xlu0 %v3719_v12, %s7792_s20 }
 0x464   : > { %v8830_v17 = vpop.permute.xlu0 %3726 }
 0x465   : > { %6625 = vmatmul.mubr.msk.bf16.vlgmr.msra.gmra.mrb[68].mxu0 %vm3760_vm12, %v8830_v17  ;;  %7254 = vmatmul.mubr.msk.bf16.vlgmr.msra.gmra.mrb[40].mxu1 %vm3760_vm12, %v8830_v17 }
 0x466   : > { %3918 = vmatpush1.bf16.msra.mxu0 %v7649_v13  ;;  %7258 = vmatpush3.bf16.msra.mxu1 %v7652_v14 }
 0x467   : > { %3949 = vmatprep.mubr.bf16.mxu0 %v7781_v6  ;;  %7259 = vmatprep.mubr.msk.bf16.mxu1 %vm7782_vm0, %v7780_v5 }
 0x468   : > { %4067 = vmatprep.subr.bf16.mxu0 %v7655_v18  ;;  %7263 = vmatprep.subr.bf16.mxu1 %v7780_v5 }
 0x46d   : > { %6635 = vmatmul.mubr.msk.bf16.vlgmr.msra.gmra.mrb[72].mxu0 %vm3760_vm12, %v8830_v17  ;;  %7260 = vmatmul.mubr.msk.bf16.vlgmr.msra.gmra.mrb[44].mxu1 %vm3760_vm12, %v8830_v17 }
 0x46e   : > { %4068 = vmatpush1.bf16.msra.mxu0 %v7653_v19  ;;  %7264 = vmatpush3.bf16.msra.mxu1 %v7656_v20 }
 0x46f   : > { %4099 = vmatprep.mubr.bf16.mxu0 %v7781_v6  ;;  %7265 = vmatprep.mubr.msk.bf16.mxu1 %vm7782_vm0, %v7780_v5 }
 0x470   : > { %4217 = vmatprep.subr.bf16.mxu0 %v7659_v21  ;;  %7269 = vmatprep.subr.bf16.mxu1 %v7780_v5 }
 0x475   : > { %6645 = vmatmul.mubr.msk.bf16.vlgmr.msra.gmra.mrb[76].mxu0 %vm3760_vm12, %v8830_v17  ;;  %7266 = vmatmul.mubr.msk.bf16.vlgmr.msra.gmra.mrb[48].mxu1 %vm3760_vm12, %v8830_v17 }
 0x476   : > { %4218 = vmatpush1.bf16.msra.mxu0 %v7657_v15  ;;  %7270 = vmatpush3.bf16.msra.mxu1 %v7660_v22 }
 0x477   : > { %4249 = vmatprep.mubr.bf16.mxu0 %v7781_v6  ;;  %7271 = vmatprep.mubr.msk.bf16.mxu1 %vm7782_vm0, %v7780_v5 }
 0x478   : > { %4367 = vmatprep.subr.bf16.mxu0 %v7663_v16  ;;  %7275 = vmatprep.subr.bf16.mxu1 %v7780_v5 }
 0x47d   : > { %6655 = vmatmul.mubr.msk.bf16.vlgmr.msra.gmra.mrb[80].mxu0 %vm3760_vm12, %v8830_v17  ;;  %7272 = vmatmul.mubr.msk.bf16.vlgmr.msra.gmra.mrb[52].mxu1 %vm3760_vm12, %v8830_v17 }
 0x47e   : > { %4368 = vmatpush1.bf16.msra.mxu0 %v7661_v46  ;;  %7276 = vmatpush3.bf16.msra.mxu1 %v7664_v23 }
 0x47f   : > { %4399 = vmatprep.mubr.bf16.mxu0 %v7781_v6  ;;  %7277 = vmatprep.mubr.msk.bf16.mxu1 %vm7782_vm0, %v7780_v5 }
 0x480   : > { %4517 = vmatprep.subr.bf16.mxu0 %v7667_v24  ;;  %7281 = vmatprep.subr.bf16.mxu1 %v7780_v5 }
 0x485   : > { %6665 = vmatmul.mubr.msk.bf16.vlgmr.msra.gmra.mrb[84].mxu0 %vm3760_vm12, %v8830_v17  ;;  %7278 = vmatmul.mubr.msk.bf16.vlgmr.msra.gmra.mrb[56].mxu1 %vm3760_vm12, %v8830_v17 }
 0x486   : > { %4518 = vmatpush1.bf16.msra.mxu0 %v7665_v25  ;;  %7282 = vmatpush3.bf16.msra.mxu1 %v7668_v26 }
 0x487   : > { %4549 = vmatprep.mubr.bf16.mxu0 %v7781_v6  ;;  %7283 = vmatprep.mubr.msk.bf16.mxu1 %vm7782_vm0, %v7780_v5 }
 0x488   : > { %4667 = vmatprep.subr.bf16.mxu0 %v7671_v27  ;;  %7287 = vmatprep.subr.bf16.mxu1 %v7780_v5 }
 0x48d   : > { %6675 = vmatmul.mubr.msk.bf16.vlgmr.msra.gmra.mrb[88].mxu0 %vm3760_vm12, %v8830_v17  ;;  %7284 = vmatmul.mubr.msk.bf16.vlgmr.msra.gmra.mrb[60].mxu1 %vm3760_vm12, %v8830_v17 }
 0x48e   : > { %4668 = vmatpush1.bf16.msra.mxu0 %v7669_v28  ;;  %7288 = vmatpush3.bf16.msra.mxu1 %v7672_v29 }
 0x48f   : > { %4699 = vmatprep.mubr.bf16.mxu0 %v7781_v6  ;;  %7289 = vmatprep.mubr.msk.bf16.mxu1 %vm7782_vm0, %v7780_v5 }
 0x490   : > { %4817 = vmatprep.subr.bf16.mxu0 %v7675_v30  ;;  %7293 = vmatprep.subr.bf16.mxu1 %v7780_v5 }
 0x495   : > { %6685 = vmatmul.mubr.msk.bf16.vlgmr.msra.gmra.mrb[92].mxu0 %vm3760_vm12, %v8830_v17  ;;  %7290 = vmatmul.mubr.msk.bf16.vlgmr.msra.gmra.mrb[64].mxu1 %vm3760_vm12, %v8830_v17 }
 0x496   : > { %4818 = vmatpush1.bf16.msra.mxu0 %v7673_v31  ;;  %7294 = vmatpush3.bf16.msra.mxu1 %v7676_v32 }
 0x497   : > { %4849 = vmatprep.mubr.bf16.mxu0 %v7781_v6  ;;  %7295 = vmatprep.mubr.msk.bf16.mxu1 %vm7782_vm0, %v7780_v5 }
 0x498   : > { %7299 = vmatprep.subr.bf16.mxu1 %v7780_v5 }
 0x49d   : > { %6695 = vmatmul.mubr.msk.bf16.vlgmr.msra.gmra.mrb[96].mxu0 %vm3760_vm12, %v8830_v17  ;;  %7296 = vmatmul.mubr.msk.bf16.vlgmr.msra.gmra.mrb[68].mxu1 %vm3760_vm12, %v8830_v17  ;;  %v6641_v17 = vld [vmem:[%s9291_s7 + $0x2] ss:$8 sm:$0x7] }
 0x49e   : > { %7301 = vmatprep.mubr.msk.bf16.mxu1 %vm7782_vm0, %v7780_v5  ;;  %4994 = vmatprep.mubr.bf16.mxu0 %v7781_v6  ;;  %v4055_v20 = vrot.slane %v6641_v17, %v8959_v38  ;;  %v4063_v22 = vrot.slane %v6641_v17, %v8953_v34  ;;  %v4059_v16 = vrot.slane %v6641_v17, %v8956_v37 }
 0x538   : > { %v3798_v43 = vpop.f32.mrb[68].mxu0  ;;  %v3839_v44 = vpop.f32.mrb[40].mxu1 }
 0x539   : > { %v3799_v45 = vadd.f32 %v3798_v43, %v3748_v39  ;;  %v3800_v47 = vpop.f32.mrb[69].mxu0  ;;  %v7255_v49 = vpop.f32.mrb[41].mxu1  ;;  %v3840_v50 = vadd.f32 %v3839_v44, %v3756_v40  ;;  %v4205_v40 = vrot.slane %v6651_v33, %v8959_v38  ;;  %v4213_v43 = vrot.slane %v6651_v33, %v8953_v34 }
 0x53a   : > { %v3801_v52 = vadd.f32 %v3800_v47, %v3752_v42  ;;  %v3802_v51 = vpop.f32.mrb[70].mxu0  ;;  %v3842_v53 = vpop.f32.mrb[42].mxu1  ;;  %v4209_v44 = vrot.slane %v6651_v33, %v8956_v37 }
 0x53b   : > { %v3803_v55 = vpop.f32.mrb[71].mxu0  ;;  %v7256_v56 = vpop.f32.mrb[43].mxu1  ;;  %v3862_v59 = vrot.slane %v3840_v50, %v8965_v48 }
 0x53c   : > { %v3848_v57 = vcombine.low %v3799_v45, %v3801_v52 }
 0x53e   : > { %v3855_v60 = vrot.slane %v3848_v57, %v8965_v48 }
 0x540   : > { %v3863_v62 = vcombine.low %v3855_v60, %v3862_v59  ;;  %v3951_v63 = vpop.f32.mrb[72].mxu0  ;;  %v3992_v1 = vpop.f32.mrb[44].mxu1 }
 0x541   : > { %v3952_v7 = vadd.f32 %v3951_v63, %v3905_v58  ;;  %v3953_v8 = vpop.f32.mrb[73].mxu0  ;;  %v7261_v9 = vpop.f32.mrb[45].mxu1  ;;  %v3993_v11 = vadd.f32 %v3992_v1, %v3913_v61  ;;  %v6661_v58 = vld [vmem:[%s9291_s7 + $0x4] ss:$8 sm:$0x7] }
 0x542   : > { %v3870_v10 = vrot.slane %v3863_v62, %v8965_v48  ;;  %v3954_v12 = vadd.f32 %v3953_v8, %v3909_v3  ;;  %v3955_v13 = vpop.f32.mrb[74].mxu0  ;;  %v3995_v14 = vpop.f32.mrb[46].mxu1  ;;  %v4355_v3 = vrot.slane %v6661_v58, %v8959_v38  ;;  %v4363_v1 = vrot.slane %v6661_v58, %v8953_v34 }
 0x543   : > { %v3956_v18 = vpop.f32.mrb[75].mxu0  ;;  %v7262_v19 = vpop.f32.mrb[47].mxu1  ;;  %v4015_v21 = vrot.slane %v3993_v11, %v8965_v48 }
 0x544   : > { %3876 = vst.msk [vmem:[#allocation2] ss:$8 sm:$0x7] %vm8976_vm13, %v3870_v10  ;;  %v4001_v0 = vcombine.low %v3952_v7, %v3954_v12  ;;  %v4359_v7 = vrot.slane %v6661_v58, %v8956_v37 }
 0x546   : > { %v4008_v15 = vrot.slane %v4001_v0, %v8965_v48 }
 0x548   : > { %v4016_v46 = vcombine.low %v4008_v15, %v4015_v21  ;;  %v4101_v23 = vpop.f32.mrb[76].mxu0  ;;  %v4142_v24 = vpop.f32.mrb[48].mxu1 }
 0x549   : > { %v4102_v25 = vadd.f32 %v4101_v23, %v4055_v20  ;;  %v4103_v26 = vpop.f32.mrb[77].mxu0  ;;  %v7267_v27 = vpop.f32.mrb[49].mxu1  ;;  %v4143_v29 = vadd.f32 %v4142_v24, %v4063_v22  ;;  %v6671_v20 = vld [vmem:[%s9291_s7 + $0x5] ss:$8 sm:$0x7] }
 0x54a   : > { %v4023_v28 = vrot.slane %v4016_v46, %v8965_v48  ;;  %v4104_v30 = vadd.f32 %v4103_v26, %v4059_v16  ;;  %v4105_v31 = vpop.f32.mrb[78].mxu0  ;;  %v4145_v32 = vpop.f32.mrb[50].mxu1  ;;  %v4505_v16 = vrot.slane %v6671_v20, %v8959_v38  ;;  %v4513_v24 = vrot.slane %v6671_v20, %v8953_v34 }
 0x54b   : > { %v4106_v35 = vpop.f32.mrb[79].mxu0  ;;  %v7268_v36 = vpop.f32.mrb[51].mxu1  ;;  %v4165_v41 = vrot.slane %v4143_v29, %v8965_v48 }
 0x54c   : > { %4026 = vst.msk [vmem:[#allocation2 + $0x1] ss:$8 sm:$0x7] %vm8976_vm13, %v4023_v28  ;;  %v4151_v39 = vcombine.low %v4102_v25, %v4104_v30  ;;  %v4509_v25 = vrot.slane %v6671_v20, %v8956_v37 }
 0x54e   : > { %v4158_v42 = vrot.slane %v4151_v39, %v8965_v48 }
 0x550   : > { %v4166_v45 = vcombine.low %v4158_v42, %v4165_v41  ;;  %v4251_v47 = vpop.f32.mrb[80].mxu0  ;;  %v4292_v49 = vpop.f32.mrb[52].mxu1 }
 0x551   : > { %v4252_v50 = vadd.f32 %v4251_v47, %v4205_v40  ;;  %v4253_v52 = vpop.f32.mrb[81].mxu0  ;;  %v7273_v51 = vpop.f32.mrb[53].mxu1  ;;  %v4293_v54 = vadd.f32 %v4292_v49, %v4213_v43  ;;  %v6681_v40 = vld [vmem:[%s9291_s7 + $0x6] ss:$8 sm:$0x7] }
 0x552   : > { %v4173_v53 = vrot.slane %v4166_v45, %v8965_v48  ;;  %v4254_v55 = vadd.f32 %v4253_v52, %v4209_v44  ;;  %v4255_v56 = vpop.f32.mrb[82].mxu0  ;;  %v4295_v57 = vpop.f32.mrb[54].mxu1  ;;  %v4655_v44 = vrot.slane %v6681_v40, %v8959_v38  ;;  %v4663_v49 = vrot.slane %v6681_v40, %v8953_v34 }
 0x553   : > { %v4256_v59 = vpop.f32.mrb[83].mxu0  ;;  %v7274_v60 = vpop.f32.mrb[55].mxu1  ;;  %v4315_v62 = vrot.slane %v4293_v54, %v8965_v48 }
 0x554   : > { %4176 = vst.msk [vmem:[#allocation2 + $0x2] ss:$8 sm:$0x7] %vm8976_vm13, %v4173_v53  ;;  %v4301_v61 = vcombine.low %v4252_v50, %v4254_v55  ;;  %v4659_v50 = vrot.slane %v6681_v40, %v8956_v37 }
 0x556   : > { %v4308_v63 = vrot.slane %v4301_v61, %v8965_v48 }
 0x558   : > { %v4316_v8 = vcombine.low %v4308_v63, %v4315_v62  ;;  %v4401_v9 = vpop.f32.mrb[84].mxu0  ;;  %v4442_v10 = vpop.f32.mrb[56].mxu1 }
 0x559   : > { %v4402_v11 = vadd.f32 %v4401_v9, %v4355_v3  ;;  %v4403_v12 = vpop.f32.mrb[85].mxu0  ;;  %v7279_v13 = vpop.f32.mrb[57].mxu1  ;;  %v4443_v17 = vadd.f32 %v4442_v10, %v4363_v1  ;;  %v6691_v3 = vld [vmem:[%s9291_s7 + $0x7] ss:$8 sm:$0x7] }
 0x55a   : > { %v4323_v14 = vrot.slane %v4316_v8, %v8965_v48  ;;  %v4404_v18 = vadd.f32 %v4403_v12, %v4359_v7  ;;  %v4405_v19 = vpop.f32.mrb[86].mxu0  ;;  %v4445_v0 = vpop.f32.mrb[58].mxu1  ;;  %v4805_v7 = vrot.slane %v6691_v3, %v8959_v38  ;;  %v4813_v10 = vrot.slane %v6691_v3, %v8953_v34 }
 0x55b   : > { %v4406_v21 = vpop.f32.mrb[87].mxu0  ;;  %v7280_v15 = vpop.f32.mrb[59].mxu1  ;;  %v4465_v46 = vrot.slane %v4443_v17, %v8965_v48 }
 0x55c   : > { %4326 = vst.msk [vmem:[#allocation2 + $0x3] ss:$8 sm:$0x7] %vm8976_vm13, %v4323_v14  ;;  %v4451_v22 = vcombine.low %v4402_v11, %v4404_v18  ;;  %v4809_v11 = vrot.slane %v6691_v3, %v8956_v37 }
 0x55e   : > { %v4458_v23 = vrot.slane %v4451_v22, %v8965_v48 }
 0x560   : > { %v4466_v26 = vcombine.low %v4458_v23, %v4465_v46  ;;  %v4551_v27 = vpop.f32.mrb[88].mxu0  ;;  %v4592_v28 = vpop.f32.mrb[60].mxu1 }
 0x561   : > { %v4552_v29 = vadd.f32 %v4551_v27, %v4505_v16  ;;  %v4553_v30 = vpop.f32.mrb[89].mxu0  ;;  %v7285_v31 = vpop.f32.mrb[61].mxu1  ;;  %v4593_v33 = vadd.f32 %v4592_v28, %v4513_v24 }
 0x562   : > { %v4473_v32 = vrot.slane %v4466_v26, %v8965_v48  ;;  %v4554_v35 = vadd.f32 %v4553_v30, %v4509_v25  ;;  %v4555_v36 = vpop.f32.mrb[90].mxu0  ;;  %v4595_v39 = vpop.f32.mrb[62].mxu1 }
 0x563   : > { %v4556_v41 = vpop.f32.mrb[91].mxu0  ;;  %v7286_v42 = vpop.f32.mrb[63].mxu1  ;;  %v4615_v45 = vrot.slane %v4593_v33, %v8965_v48 }
 0x564   : > { %4476 = vst.msk [vmem:[#allocation2 + $0x4] ss:$8 sm:$0x7] %vm8976_vm13, %v4473_v32  ;;  %v4601_v43 = vcombine.low %v4552_v29, %v4554_v35 }
 0x566   : > { %v4608_v47 = vrot.slane %v4601_v43, %v8965_v48 }
 0x568   : > { %v4616_v52 = vcombine.low %v4608_v47, %v4615_v45  ;;  %v4701_v51 = vpop.f32.mrb[92].mxu0  ;;  %v4742_v53 = vpop.f32.mrb[64].mxu1 }
 0x569   : > { %v4702_v54 = vadd.f32 %v4701_v51, %v4655_v44  ;;  %v4703_v55 = vpop.f32.mrb[93].mxu0  ;;  %v7291_v56 = vpop.f32.mrb[65].mxu1  ;;  %v4743_v58 = vadd.f32 %v4742_v53, %v4663_v49 }
 0x56a   : > { %v4623_v57 = vrot.slane %v4616_v52, %v8965_v48  ;;  %v4704_v59 = vadd.f32 %v4703_v55, %v4659_v50  ;;  %v4705_v60 = vpop.f32.mrb[94].mxu0  ;;  %v4745_v61 = vpop.f32.mrb[66].mxu1  ;;  %v4934_v52 = vld [vmem:[%s9292_s8] sm:$0x3] }
 0x56b   : > { %v4706_v62 = vpop.f32.mrb[95].mxu0  ;;  %v7292_v63 = vpop.f32.mrb[67].mxu1  ;;  %v4765_v8 = vrot.slane %v4743_v58, %v8965_v48  ;;  %v6704_v60 = vld [vmem:[%s9292_s8 + $0x4] sm:$0x3] }
 0x56c   : > { %4626 = vst.msk [vmem:[#allocation2 + $0x5] ss:$8 sm:$0x7] %vm8976_vm13, %v4623_v57  ;;  %v4751_v1 = vcombine.low %v4702_v54, %v4704_v59 }
 0x56e   : > { %v4758_v9 = vrot.slane %v4751_v1, %v8965_v48 }
 0x570   : > { %v4766_v12 = vcombine.low %v4758_v9, %v4765_v8  ;;  %v4851_v13 = vpop.f32.mrb[96].mxu0  ;;  %v4892_v14 = vpop.f32.mrb[68].mxu1 }
 0x571   : > { %v4852_v17 = vadd.f32 %v4851_v13, %v4805_v7  ;;  %v4853_v18 = vpop.f32.mrb[97].mxu0  ;;  %v7297_v19 = vpop.f32.mrb[69].mxu1  ;;  %v4893_v20 = vadd.f32 %v4892_v14, %v4813_v10  ;;  %v6708_v10 = vld [vmem:[%s9292_s8 + $0x6] sm:$0x3] }
 0x572   : > { %v4773_v0 = vrot.slane %v4766_v12, %v8965_v48  ;;  %v4854_v21 = vadd.f32 %v4853_v18, %v4809_v11  ;;  %v4855_v15 = vpop.f32.mrb[98].mxu0  ;;  %v4895_v22 = vpop.f32.mrb[70].mxu1 }
 0x573   : > { %v4856_v16 = vpop.f32.mrb[99].mxu0  ;;  %v7298_v46 = vpop.f32.mrb[71].mxu1  ;;  %v4915_v37 = vrot.slane %v4893_v20, %v8965_v48 }
 0x574   : > { %4776 = vst.msk [vmem:[#allocation2 + $0x6] ss:$8 sm:$0x7] %vm8976_vm13, %v4773_v0  ;;  %v4901_v34 = vcombine.low %v4852_v17, %v4854_v21  ;;  %v6712_v0 = vld [vmem:[%s9292_s8 + $0x8] sm:$0x3] }
 0x576   : > { %v4908_v23 = vrot.slane %v4901_v34, %v8965_v48 }
 0x578   : > { %v4916_v24 = vcombine.low %v4908_v23, %v4915_v37  ;;  %v6716_v37 = vld [vmem:[%s9292_s8 + $0xa] sm:$0x3] }
 0x57a   : > { %v4923_v25 = vrot.slane %v4916_v24, %v8965_v48  ;;  %v3704_v48 = vrot.slane %v8810_v4, %v8959_v38  ;;  %v6697_v38 = vld [vmem:[%s9292_s8 + $0x2] sm:$0x3] }
 0x57c   : > { %4926 = vst.msk [vmem:[#allocation2 + $0x7] ss:$8 sm:$0x7] %vm8976_vm13, %v4923_v25 }
 0x583   : > { %v4929_v26 = vld [vmem:[#allocation2 + $0x8] sm:$0xff]  ;;  %v4928_v27 = vld [vmem:[#allocation2] sm:$0xff]  ;;  %v4930_v30 = vld [vmem:[#allocation2 + $0x10] sm:$0xff] }
 0x584   : > { %v4932_v28 = vpack.c.bf16 %v4929_v26, %v4929_v26  ;;  %v4931_v29 = vpack.c.bf16 %v4928_v27, %v4928_v27  ;;  %v4933_v31 = vpack.c.bf16 %v4930_v30, %v4930_v30 }
 0x586   : > { %4942 = vrot.lane.b32.xlu0 %v4932_v28, %s9333_s2  ;;  %4940 = vrot.lane.b32.xlu1 %v4931_v29, %s9333_s2  ;;  %v5053_v44 = vsel %vm4952_vm14, %v4933_v31, 0  ;;  %v5047_v45 = vsel %vm4952_vm14, %v4931_v29, 0 }
 0x58a   : > { %5138 = vrot.lane.b32.xlu0 %v4931_v29, %s9334_s26  ;;  %4944 = vrot.lane.b32.xlu1 %v4933_v31, %s9333_s2  ;;  %s9340_s2 = smov 90  }
 0x58e   : > { %5142 = vrot.lane.b32.xlu0 %v4933_v31, %s9334_s26  ;;  %5140 = vrot.lane.b32.xlu1 %v4932_v28, %s9334_s26 }
 0x592   : > { %5246 = vrot.lane.b32.xlu0 %v4932_v28, %s9335_s19  ;;  %5244 = vrot.lane.b32.xlu1 %v4931_v29, %s9335_s19 }
 0x596   : > { %5350 = vrot.lane.b32.xlu0 %v4931_v29, %s9336_s17  ;;  %5248 = vrot.lane.b32.xlu1 %v4933_v31, %s9335_s19 }
 0x59a   : > { %5354 = vrot.lane.b32.xlu0 %v4933_v31, %s9336_s17  ;;  %5352 = vrot.lane.b32.xlu1 %v4932_v28, %s9336_s17  ;;  %s7794_s17 = smov [#allocation3]  }
 0x59e   : > { %5458 = vrot.lane.b32.xlu0 %v4932_v28, %s9337_s18  ;;  %5456 = vrot.lane.b32.xlu1 %v4931_v29, %s9337_s18 }
 0x5a2   : > { %5562 = vrot.lane.b32.xlu0 %v4931_v29, %s9338_s16  ;;  %5460 = vrot.lane.b32.xlu1 %v4933_v31, %s9337_s18  ;;  %s7687_s18 = sshll.u32 %s7794_s17, 4  ;;  %s7688_s18 = int_to_ptr.vmem [resolvable:$false] %s7687_s18 }
 0x5a3   : > { %s7689_s3 = scalar_lea.vmem %s7688_s18, 32 }
 0x5a6   : > { %5566 = vrot.lane.b32.xlu0 %v4933_v31, %s9338_s16  ;;  %5564 = vrot.lane.b32.xlu1 %v4932_v28, %s9338_s16  ;;  %s9314_s16 = sshll.u32 %s7882_s25, 4 }
 0x5a7   : > { %s9214_s19 = scalar_lea.hbm %s9295_s11, %s9314_s16 }
 0x5aa   : > { %5670 = vrot.lane.b32.xlu0 %v4932_v28, %s9339_s28  ;;  %5668 = vrot.lane.b32.xlu1 %v4931_v29, %s9339_s28 }
 0x5ae   : > { %5774 = vrot.lane.b32.xlu0 %v4931_v29, %s9340_s2  ;;  %5672 = vrot.lane.b32.xlu1 %v4933_v31, %s9339_s28  ;;  %s9313_s28 = scalar_lea.vmem [#allocation5], %s8808_s0  ;;  %v6720_v29 = vld [vmem:[%s9292_s8 + $0xc] sm:$0x3] }
 0x5b2   : > { %5778 = vrot.lane.b32.xlu0 %v4933_v31, %s9340_s2  ;;  %5776 = vrot.lane.b32.xlu1 %v4932_v28, %s9340_s2 }
 0x5b6   : > { %3705 = vrot.lane.b32.xlu0 %v3704_v48, %s7792_s20  ;;  %5881 = vperm.xlu1 %7451, %v5878_v2   ;;  %s5922_s20 = sshll.u32 %s427_s29, 4  ;;  %s5923_s20 = int_to_ptr.vmem [resolvable:$true] %s5922_s20 }
 0x5b7   : > { %s7683_s1 = scalar_lea.vmem %s5923_s20, 16  ;;  %p7690_p0 = scmp.lt.s32.totalorder %s5923_s20, %s7688_s18 }
 0x5b8   : > { %p7684_p11 = scmp.ne.s32.totalorder %s5923_s20, %s7683_s1  ;;  %p7691_p1 = scmp.lt.s32.totalorder %s7689_s3, %s7683_s1 }
 0x5ba   : > { %p7685_p12 = pnand %p7684_p11, %p7899_p5  ;;  %p7692_p2 = por %p7691_p1, %p7690_p0 }
 0x5bc   : > { %p7686_p13 = pneg %p7685_p12 }
 0x5be   : > { %p7693_p3 = pnand %p7692_p2, %p7686_p13 }
 0x5f8   : > { %v4943_v32 = vpop.permute.xlu0 %4942  ;;  %v4941_v33 = vpop.permute.xlu1 %4940 }
 0x5f9   : > { %v4946_v35 = vsel %vm478_vm2, %v4941_v33, %v4943_v32  ;;  %v6724_v33 = vld [vmem:[%s9292_s8 + $0xe] sm:$0x3] }
 0x5fa   : > { %v4954_v4 = vsel %vm4952_vm14, %v4946_v35, 0 }
 0x5fc   : > { %v5139_v36 = vpop.permute.xlu0 %5138  ;;  %v4945_v39 = vpop.permute.xlu1 %4944 }
 0x5fd   : > { %v4947_v40 = vsel %vm478_vm2, %v4943_v32, %v4945_v39  ;;  %v4960_v41 = vsel %vm4952_vm14, %v4945_v39, 0 }
 0x5fe   : > { %6698 = vmatprep.subr.msk.bf16.mxu0 %vm4952_vm14, %v4947_v40  ;;  %7300 = vmatpush3.bf16.msra.mxu1 %v4960_v41  ;;  %v6728_v40 = vld [vmem:[%s9292_s8 + $0x10] sm:$0x3] }
 0x5ff   : > { %4963 = vmatpush1.bf16.msra.mxu0 %v4954_v4  ;;  %7305 = vmatprep.subr.bf16.mxu1 %v7780_v5 }
 0x600   : > { %v5143_v42 = vpop.permute.xlu0 %5142  ;;  %6701 = vmatprep.subr.msk.bf16.mxu0 %vm4952_vm14, %v4932_v28  ;;  %v5141_v43 = vpop.permute.xlu1 %5140 }
 0x601   : > { %7302 = vmatmul.mubr.msk.bf16.vlgmr.msra.gmra.mrb[72].mxu1 %vm4948_vm15, %v6697_v38  ;;  %v5145_v47 = vsel %vm680_vm4, %v5141_v43, %v5143_v42  ;;  %v5144_v51 = vsel %vm680_vm4, %v5139_v36, %v5141_v43  ;;  %v5156_v55 = vsel %vm4952_vm14, %v5143_v42, 0 }
 0x602   : > { %6699 = vmatmul.mubr.msk.bf16.vlgmr.msra.gmra.mrb[100].mxu0 %vm4948_vm15, %v6697_v38  ;;  %7306 = vmatpush3.bf16.msra.mxu1 %v5053_v44  ;;  %v5150_v57 = vsel %vm4952_vm14, %v5144_v51, 0 }
 0x603   : > { %5056 = vmatpush1.bf16.msra.mxu0 %v5047_v45  ;;  %7307 = vmatprep.mubr.msk.bf16.mxu1 %vm7782_vm0, %v7780_v5 }
 0x604   : > { %v5247_v49 = vpop.permute.xlu0 %5246  ;;  %v5245_v50 = vpop.permute.xlu1 %5244  ;;  %6705 = vmatprep.subr.msk.bf16.mxu0 %vm4952_vm14, %v5145_v47  ;;  %7311 = vmatprep.subr.bf16.mxu1 %v7780_v5 }
 0x605   : > { %5087 = vmatprep.mubr.bf16.mxu0 %v7781_v6  ;;  %v5250_v61 = vsel %vm790_vm5, %v5245_v50, %v5247_v49 }
 0x606   : > { %v5256_v1 = vsel %vm4952_vm14, %v5250_v61, 0 }
 0x608   : > { %v5351_v53 = vpop.permute.xlu0 %5350  ;;  %v5249_v54 = vpop.permute.xlu1 %5248 }
 0x609   : > { %v5251_v56 = vsel %vm790_vm5, %v5247_v49, %v5249_v54  ;;  %7308 = vmatmul.mubr.msk.bf16.vlgmr.msra.gmra.mrb[76].mxu1 %vm4948_vm15, %v4934_v52  ;;  %v5262_v63 = vsel %vm4952_vm14, %v5249_v54, 0 }
 0x60a   : > { %7312 = vmatpush3.bf16.msra.mxu1 %v5156_v55  ;;  %6702 = vmatmul.mubr.msk.bf16.vlgmr.msra.gmra.mrb[104].mxu0 %vm4948_vm15, %v4934_v52 }
 0x60b   : > { %5159 = vmatpush1.bf16.msra.mxu0 %v5150_v57  ;;  %7313 = vmatprep.mubr.msk.bf16.mxu1 %vm7782_vm0, %v7780_v5 }
 0x60c   : > { %6709 = vmatprep.subr.msk.bf16.mxu0 %vm4952_vm14, %v5251_v56  ;;  %v5355_v58 = vpop.permute.xlu0 %5354  ;;  %v5353_v59 = vpop.permute.xlu1 %5352  ;;  %7317 = vmatprep.subr.bf16.mxu1 %v7780_v5 }
 0x60d   : > { %5190 = vmatprep.mubr.bf16.mxu0 %v7781_v6  ;;  %v5357_v7 = vsel %vm900_vm6, %v5353_v59, %v5355_v58  ;;  %v5356_v11 = vsel %vm900_vm6, %v5351_v53, %v5353_v59  ;;  %v5368_v13 = vsel %vm4952_vm14, %v5355_v58, 0 }
 0x60e   : > { %v5362_v14 = vsel %vm4952_vm14, %v5356_v11, 0 }
 0x610   : > { %v5459_v3 = vpop.permute.xlu0 %5458  ;;  %v5457_v62 = vpop.permute.xlu1 %5456 }
 0x611   : > { %7314 = vmatmul.mubr.msk.bf16.vlgmr.msra.gmra.mrb[80].mxu1 %vm4948_vm15, %v6704_v60  ;;  %v5462_v20 = vsel %vm1010_vm7, %v5457_v62, %v5459_v3 }
 0x612   : > { %7318 = vmatpush3.bf16.msra.mxu1 %v5262_v63  ;;  %6706 = vmatmul.mubr.msk.bf16.vlgmr.msra.gmra.mrb[108].mxu0 %vm4948_vm15, %v6704_v60  ;;  %v5468_v22 = vsel %vm4952_vm14, %v5462_v20, 0 }
 0x613   : > { %5265 = vmatpush1.bf16.msra.mxu0 %v5256_v1  ;;  %7319 = vmatprep.mubr.msk.bf16.mxu1 %vm7782_vm0, %v7780_v5 }
 0x614   : > { %6713 = vmatprep.subr.msk.bf16.mxu0 %vm4952_vm14, %v5357_v7  ;;  %v5563_v8 = vpop.permute.xlu0 %5562  ;;  %7323 = vmatprep.subr.bf16.mxu1 %v7780_v5  ;;  %v5461_v9 = vpop.permute.xlu1 %5460 }
 0x615   : > { %5296 = vmatprep.mubr.bf16.mxu0 %v7781_v6  ;;  %v5463_v17 = vsel %vm1010_vm7, %v5459_v3, %v5461_v9  ;;  %v5474_v15 = vsel %vm4952_vm14, %v5461_v9, 0 }
 0x618   : > { %v5567_v12 = vpop.permute.xlu0 %5566  ;;  %v5565_v18 = vpop.permute.xlu1 %5564 }
 0x619   : > { %7320 = vmatmul.mubr.msk.bf16.vlgmr.msra.gmra.mrb[84].mxu1 %vm4948_vm15, %v6708_v10  ;;  %v5569_v46 = vsel %vm1120_vm8, %v5565_v18, %v5567_v12  ;;  %v5568_v23 = vsel %vm1120_vm8, %v5563_v8, %v5565_v18  ;;  %v5580_v26 = vsel %vm4952_vm14, %v5567_v12, 0 }
 0x61a   : > { %7324 = vmatpush3.bf16.msra.mxu1 %v5368_v13  ;;  %6710 = vmatmul.mubr.msk.bf16.vlgmr.msra.gmra.mrb[112].mxu0 %vm4948_vm15, %v6708_v10  ;;  %v5574_v27 = vsel %vm4952_vm14, %v5568_v23, 0 }
 0x61b   : > { %5371 = vmatpush1.bf16.msra.mxu0 %v5362_v14  ;;  %7325 = vmatprep.mubr.msk.bf16.mxu1 %vm7782_vm0, %v7780_v5 }
 0x61c   : > { %6717 = vmatprep.subr.msk.bf16.mxu0 %vm4952_vm14, %v5463_v17  ;;  %v5671_v19 = vpop.permute.xlu0 %5670  ;;  %7329 = vmatprep.subr.bf16.mxu1 %v7780_v5  ;;  %v5669_v16 = vpop.permute.xlu1 %5668 }
 0x61d   : > { %5402 = vmatprep.mubr.bf16.mxu0 %v7781_v6  ;;  %v5674_v30 = vsel %vm1230_vm9, %v5669_v16, %v5671_v19 }
 0x61e   : > { %v5680_v2 = vsel %vm4952_vm14, %v5674_v30, 0 }
 0x620   : > { %v5775_v21 = vpop.permute.xlu0 %5774  ;;  %v5673_v24 = vpop.permute.xlu1 %5672 }
 0x621   : > { %7326 = vmatmul.mubr.msk.bf16.vlgmr.msra.gmra.mrb[88].mxu1 %vm4948_vm15, %v6712_v0  ;;  %v5675_v28 = vsel %vm1230_vm9, %v5671_v19, %v5673_v24  ;;  %v5686_v48 = vsel %vm4952_vm14, %v5673_v24, 0 }
 0x622   : > { %7330 = vmatpush3.bf16.msra.mxu1 %v5474_v15  ;;  %6714 = vmatmul.mubr.msk.bf16.vlgmr.msra.gmra.mrb[116].mxu0 %vm4948_vm15, %v6712_v0 }
 0x623   : > { %5477 = vmatpush1.bf16.msra.mxu0 %v5468_v22  ;;  %7331 = vmatprep.mubr.msk.bf16.mxu1 %vm7782_vm0, %v7780_v5 }
 0x624   : > { %6721 = vmatprep.subr.msk.bf16.mxu0 %vm4952_vm14, %v5569_v46  ;;  %v5779_v34 = vpop.permute.xlu0 %5778  ;;  %7335 = vmatprep.subr.bf16.mxu1 %v7780_v5  ;;  %v5777_v31 = vpop.permute.xlu1 %5776 }
 0x625   : > { %5508 = vmatprep.mubr.bf16.mxu0 %v7781_v6  ;;  %v5781_v32 = vsel %vm1340_vm10, %v5777_v31, %v5779_v34  ;;  %v5780_v35 = vsel %vm1340_vm10, %v5775_v21, %v5777_v31  ;;  %v5792_v36 = vsel %vm4952_vm14, %v5779_v34, 0 }
 0x626   : > { %v5786_v39 = vsel %vm4952_vm14, %v5780_v35, 0 }
 0x628   : > { %v3706_v25 = vpop.permute.xlu0 %3705 }
 0x629   : > { %3708 = vst.msk [vmem:[%s9313_s28] sm:$0x1] %vm3698_vm11, %v3706_v25  ;;  %7332 = vmatmul.mubr.msk.bf16.vlgmr.msra.gmra.mrb[92].mxu1 %vm4948_vm15, %v6716_v37  ;;  %s5903_s28 = scalar_lea.sflag [#allocation4], %s8808_s0 }
 0x62a   : > { %7336 = vmatpush3.bf16.msra.mxu1 %v5580_v26  ;;  %6718 = vmatmul.mubr.msk.bf16.vlgmr.msra.gmra.mrb[120].mxu0 %vm4948_vm15, %v6716_v37 }
 0x62b   : > { %5583 = vmatpush1.bf16.msra.mxu0 %v5574_v27  ;;  %7337 = vmatprep.mubr.msk.bf16.mxu1 %vm7782_vm0, %v7780_v5 }
 0x62c   : > { %6725 = vmatprep.subr.msk.bf16.mxu0 %vm4952_vm14, %v5675_v28  ;;  %7341 = vmatprep.subr.bf16.mxu1 %v7780_v5 }
 0x62d   : > { %5614 = vmatprep.mubr.bf16.mxu0 %v7781_v6 }
 0x631   : > { %7338 = vmatmul.mubr.msk.bf16.vlgmr.msra.gmra.mrb[96].mxu1 %vm4948_vm15, %v6720_v29 }
 0x632   : > { %7342 = vmatpush3.bf16.msra.mxu1 %v5686_v48  ;;  %6722 = vmatmul.mubr.msk.bf16.vlgmr.msra.gmra.mrb[124].mxu0 %vm4948_vm15, %v6720_v29 }
 0x633   : > { %5689 = vmatpush1.bf16.msra.mxu0 %v5680_v2  ;;  %7343 = vmatprep.mubr.msk.bf16.mxu1 %vm7782_vm0, %v7780_v5 }
 0x634   : > { %6729 = vmatprep.subr.msk.bf16.mxu0 %vm4952_vm14, %v5781_v32  ;;  %7347 = vmatprep.subr.bf16.mxu1 %v7780_v5 }
 0x635   : > { %5720 = vmatprep.mubr.bf16.mxu0 %v7781_v6 }
 0x639   : > { %7344 = vmatmul.mubr.msk.bf16.vlgmr.msra.gmra.mrb[100].mxu1 %vm4948_vm15, %v6724_v33 }
 0x63a   : > { %7348 = vmatpush3.bf16.msra.mxu1 %v5792_v36  ;;  %6726 = vmatmul.mubr.msk.bf16.vlgmr.msra.gmra.mrb[128].mxu0 %vm4948_vm15, %v6724_v33 }
 0x63b   : > { %5795 = vmatpush1.bf16.msra.mxu0 %v5786_v39  ;;  %7349 = vmatprep.mubr.msk.bf16.mxu1 %vm7782_vm0, %v7780_v5 }
 0x63c   : > { %5826 = vmatprep.mubr.bf16.mxu0 %v7781_v6 }
 0x641   : > { %7350 = vmatmul.mubr.msk.bf16.vlgmr.msra.gmra.mrb[104].mxu1 %vm4948_vm15, %v6728_v40 }
 0x642   : > { %6730 = vmatmul.mubr.msk.bf16.vlgmr.msra.gmra.mrb[132].mxu0 %vm4948_vm15, %v6728_v40 }
 0x643   : > { %7696 = shalt.err (!%p7693_p3)
}
 0x644   : > { %s7697_s29 = scalar_lea.hbm %s9214_s19, 16  ;;  %s7701_s17 = scalar_lea.hbm %s9295_s11, 32 }
 0x645   : > { %p7698_p4 = scmp.ne.s32.totalorder %s9214_s19, %s7697_s29  ;;  %p7702_p9 = scmp.lt.u32.totalorder %s9214_s19, %s9295_s11 }
 0x646   : > { %p7703_p10 = scmp.lt.u32.totalorder %s7701_s17, %s7697_s29  ;;  %p7705_p12 = scmp.lt.u32.totalorder %s7697_s29, %s9214_s19 }
 0x647   : > { %p7699_p7 = pnand %p7698_p4, %p7899_p5 }
 0x648   : > { %p7704_p11 = por %p7703_p10, %p7702_p9 }
 0x649   : > { %p7700_p8 = pneg %p7699_p7 }
 0x64a   : > { %p7706_p13 = por %p7705_p12, %p7704_p11 }
 0x64c   : > { %p7707_p0 = pnand %p7706_p13, %p7700_p8 }
 0x64e   : > { %7710 = shalt.err (!%p7707_p0)
}
 0x64f   : > { %7391 = dma.vmem_to_hbm [thread:$0]  (%p7899_p5), %s5923_s20, 16, %s9214_s19, %s5903_s28  }
 0x650   : > { %s9341_s1 = sshll.u32 %s7882_s25, 4  ;;  %s9342_s26 = scalar_lea.vmem [#allocation5], %s8808_s0 }
 0x651   : > { %s9241_s16 = scalar_lea.hbm %s9296_s12, %s9341_s1  ;;  %s5935_s17 = sshll.u32 %s9342_s26, 4  ;;  %s5936_s17 = int_to_ptr.vmem [resolvable:$true] %s5935_s17 }
 0x652   : > { %s5907_s29 = scalar_lea.sflag [#allocation6], %s8808_s0  ;;  %s7711_s18 = scalar_lea.vmem %s5936_s17, 16 }
 0x653   : > { %p7712_p1 = scmp.ne.s32.totalorder %s5936_s17, %s7711_s18  ;;  %s7795_s4 = smov [#allocation5]  }
 0x654   : > { %s7715_s5 = sshll.u32 %s7795_s4, 4  ;;  %s7716_s5 = int_to_ptr.vmem [resolvable:$false] %s7715_s5 }
 0x655   : > { %p7713_p2 = pnand %p7712_p1, %p7899_p5  ;;  %s7717_s6 = scalar_lea.vmem %s7716_s5, 32 }
 0x656   : > { %p7718_p4 = scmp.lt.s32.totalorder %s5936_s17, %s7716_s5  ;;  %p7719_p7 = scmp.lt.s32.totalorder %s7717_s6, %s7711_s18 }
 0x657   : > { %p7714_p3 = pneg %p7713_p2 }
 0x658   : > { %p7720_p8 = por %p7719_p7, %p7718_p4 }
 0x65a   : > { %p7721_p9 = pnand %p7720_p8, %p7714_p3 }
 0x65c   : > { %7724 = shalt.err (!%p7721_p9)
}
 0x65d   : > { %s7725_s25 = scalar_lea.hbm %s9241_s16, 16  ;;  %s7729_s4 = scalar_lea.hbm %s9296_s12, 32 }
 0x65e   : > { %p7726_p10 = scmp.ne.s32.totalorder %s9241_s16, %s7725_s25  ;;  %p7730_p13 = scmp.lt.u32.totalorder %s9241_s16, %s9296_s12 }
 0x65f   : > { %p7731_p0 = scmp.lt.u32.totalorder %s7729_s4, %s7725_s25  ;;  %p7733_p2 = scmp.lt.u32.totalorder %s7725_s25, %s9241_s16 }
 0x660   : > { %p7727_p11 = pnand %p7726_p10, %p7899_p5 }
 0x661   : > { %p7732_p1 = por %p7731_p0, %p7730_p13 }
 0x662   : > { %p7728_p12 = pneg %p7727_p11 }
 0x663   : > { %p7734_p3 = por %p7733_p2, %p7732_p1 }
 0x665   : > { %p7735_p4 = pnand %p7734_p3, %p7728_p12 }
 0x667   : > { %7738 = shalt.err (!%p7735_p4)
}
 0x668   : > { %7392 = dma.vmem_to_hbm [thread:$0]  (%p7899_p5), %s5936_s17, 16, %s9241_s16, %s5907_s29   ;;  %vm5895_vm0 = vcmask 551936  }
 0x669   : > { %s7390_s6 = smul.u32 12, %s7911_s15 }
 0x66b   : > { %s446_s1 = scalar_lea.vmem %s9294_s10, %s7390_s6 }
 0x6d4   : > { %v5037_v5 = vpop.f32.mrb[72].mxu1 }
 0x6d5   : > { %v4996_v6 = vpop.f32.mrb[100].mxu0  ;;  %v7303_v41 = vpop.f32.mrb[73].mxu1 }
 0x6d6   : > { %v4998_v4 = vpop.f32.mrb[101].mxu0  ;;  %v5040_v38 = vpop.f32.mrb[74].mxu1 }
 0x6d7   : > { %v5000_v42 = vpop.f32.mrb[102].mxu0  ;;  %v7304_v43 = vpop.f32.mrb[75].mxu1 }
 0x6d8   : > { %v5001_v44 = vpop.f32.mrb[103].mxu0 }
 0x6dc   : > { %v5130_v45 = vpop.f32.mrb[76].mxu1 }
 0x6dd   : > { %v5089_v47 = vpop.f32.mrb[104].mxu0  ;;  %v5131_v49 = vadd.f32 %v5130_v45, %v5037_v5  ;;  %v7309_v50 = vpop.f32.mrb[77].mxu1 }
 0x6de   : > { %v5090_v52 = vadd.f32 %v5089_v47, %v4996_v6  ;;  %v5091_v51 = vpop.f32.mrb[105].mxu0  ;;  %v5133_v53 = vpop.f32.mrb[78].mxu1 }
 0x6df   : > { %v5092_v54 = vadd.f32 %v5091_v51, %v4998_v4  ;;  %v5093_v55 = vpop.f32.mrb[106].mxu0  ;;  %v7310_v56 = vpop.f32.mrb[79].mxu1 }
 0x6e0   : > { %v5094_v57 = vpop.f32.mrb[107].mxu0 }
 0x6e4   : > { %v5233_v58 = vpop.f32.mrb[80].mxu1 }
 0x6e5   : > { %v5241_v59 = vadd.f32 %v5233_v58, %v5131_v49  ;;  %v5192_v60 = vpop.f32.mrb[108].mxu0  ;;  %v7315_v61 = vpop.f32.mrb[81].mxu1 }
 0x6e6   : > { %v5239_v3 = vadd.f32 %v5192_v60, %v5090_v52  ;;  %v5194_v62 = vpop.f32.mrb[109].mxu0  ;;  %v5236_v63 = vpop.f32.mrb[82].mxu1 }
 0x6e7   : > { %v5240_v1 = vadd.f32 %v5194_v62, %v5092_v54  ;;  %v5196_v7 = vpop.f32.mrb[110].mxu0  ;;  %v7316_v8 = vpop.f32.mrb[83].mxu1 }
 0x6e8   : > { %v5197_v9 = vpop.f32.mrb[111].mxu0  ;;  %v5882_v61 = vpop.permute.xlu1 %5881 }
 0x6ec   : > { %v5339_v10 = vpop.f32.mrb[84].mxu1 }
 0x6ed   : > { %v5347_v11 = vadd.f32 %v5339_v10, %v5241_v59  ;;  %v5298_v12 = vpop.f32.mrb[112].mxu0  ;;  %v7321_v13 = vpop.f32.mrb[85].mxu1 }
 0x6ee   : > { %v5345_v14 = vadd.f32 %v5298_v12, %v5239_v3  ;;  %v5300_v17 = vpop.f32.mrb[113].mxu0  ;;  %v5342_v18 = vpop.f32.mrb[86].mxu1 }
 0x6ef   : > { %v5346_v19 = vadd.f32 %v5300_v17, %v5240_v1  ;;  %v5302_v0 = vpop.f32.mrb[114].mxu0  ;;  %v7322_v20 = vpop.f32.mrb[87].mxu1 }
 0x6f0   : > { %v5303_v21 = vpop.f32.mrb[115].mxu0 }
 0x6f4   : > { %v5445_v15 = vpop.f32.mrb[88].mxu1 }
 0x6f5   : > { %v5453_v22 = vadd.f32 %v5445_v15, %v5347_v11  ;;  %v5404_v16 = vpop.f32.mrb[116].mxu0  ;;  %v7327_v46 = vpop.f32.mrb[89].mxu1 }
 0x6f6   : > { %v5451_v34 = vadd.f32 %v5404_v16, %v5345_v14  ;;  %v5406_v37 = vpop.f32.mrb[117].mxu0  ;;  %v5448_v23 = vpop.f32.mrb[90].mxu1 }
 0x6f7   : > { %v5452_v24 = vadd.f32 %v5406_v37, %v5346_v19  ;;  %v5408_v25 = vpop.f32.mrb[118].mxu0  ;;  %v7328_v26 = vpop.f32.mrb[91].mxu1 }
 0x6f8   : > { %v5409_v27 = vpop.f32.mrb[119].mxu0 }
 0x6fc   : > { %v5551_v28 = vpop.f32.mrb[92].mxu1 }
 0x6fd   : > { %v5559_v29 = vadd.f32 %v5551_v28, %v5453_v22  ;;  %v5510_v30 = vpop.f32.mrb[120].mxu0  ;;  %v7333_v31 = vpop.f32.mrb[93].mxu1 }
 0x6fe   : > { %v5557_v48 = vadd.f32 %v5510_v30, %v5451_v34  ;;  %v5512_v2 = vpop.f32.mrb[121].mxu0  ;;  %v5554_v32 = vpop.f32.mrb[94].mxu1 }
 0x6ff   : > { %v5558_v33 = vadd.f32 %v5512_v2, %v5452_v24  ;;  %v5514_v35 = vpop.f32.mrb[122].mxu0  ;;  %v7334_v36 = vpop.f32.mrb[95].mxu1 }
 0x700   : > { %v5515_v39 = vpop.f32.mrb[123].mxu0 }
 0x704   : > { %v5657_v40 = vpop.f32.mrb[96].mxu1 }
 0x705   : > { %v5665_v5 = vadd.f32 %v5657_v40, %v5559_v29  ;;  %v5616_v6 = vpop.f32.mrb[124].mxu0  ;;  %v7339_v41 = vpop.f32.mrb[97].mxu1 }
 0x706   : > { %v5663_v4 = vadd.f32 %v5616_v6, %v5557_v48  ;;  %v5618_v38 = vpop.f32.mrb[125].mxu0  ;;  %v5660_v42 = vpop.f32.mrb[98].mxu1 }
 0x707   : > { %v5664_v43 = vadd.f32 %v5618_v38, %v5558_v33  ;;  %v5620_v44 = vpop.f32.mrb[126].mxu0  ;;  %v7340_v45 = vpop.f32.mrb[99].mxu1 }
 0x708   : > { %v5621_v47 = vpop.f32.mrb[127].mxu0 }
 0x70c   : > { %v5763_v49 = vpop.f32.mrb[100].mxu1 }
 0x70d   : > { %v5771_v50 = vadd.f32 %v5763_v49, %v5665_v5  ;;  %v5722_v52 = vpop.f32.mrb[128].mxu0  ;;  %v7345_v51 = vpop.f32.mrb[101].mxu1 }
 0x70e   : > { %v5769_v53 = vadd.f32 %v5722_v52, %v5663_v4  ;;  %v5724_v54 = vpop.f32.mrb[129].mxu0  ;;  %v5766_v55 = vpop.f32.mrb[102].mxu1 }
 0x70f   : > { %v5770_v56 = vadd.f32 %v5724_v54, %v5664_v43  ;;  %v5726_v57 = vpop.f32.mrb[130].mxu0  ;;  %v7346_v58 = vpop.f32.mrb[103].mxu1 }
 0x710   : > { %v5727_v59 = vpop.f32.mrb[131].mxu0 }
 0x714   : > { %v5869_v60 = vpop.f32.mrb[104].mxu1 }
 0x715   : > { %v5877_v3 = vadd.f32 %v5869_v60, %v5771_v50  ;;  %v5828_v62 = vpop.f32.mrb[132].mxu0  ;;  %v7351_v63 = vpop.f32.mrb[105].mxu1 }
 0x716   : > { %v5875_v1 = vadd.f32 %v5828_v62, %v5769_v53  ;;  %v5830_v7 = vpop.f32.mrb[133].mxu0  ;;  %v5872_v8 = vpop.f32.mrb[106].mxu1 }
 0x717   : > { %v5886_v9 = vadd.f32 %v5882_v61, %v5877_v3  ;;  %v5876_v10 = vadd.f32 %v5830_v7, %v5770_v56  ;;  %v5832_v11 = vpop.f32.mrb[134].mxu0  ;;  %v7352_v12 = vpop.f32.mrb[107].mxu1 }
 0x718   : > { %v5884_v13 = vadd.f32 %v5882_v61, %v5875_v1  ;;  %v5833_v14 = vpop.f32.mrb[135].mxu0 }
 0x719   : > { %7677 = vtanh.f32 %v5886_v9  ;;  %v5885_v17 = vadd.f32 %v5882_v61, %v5876_v10 }
 0x71a   : > { %7679 = vtanh.f32 %v5884_v13 }
 0x71b   : > { %7681 = vtanh.f32 %v5885_v17 }
 0x723   : > { %v7678_v18 = vpop.eup %7677 }
 0x724   : > { %v7680_v19 = vpop.eup %7679  ;;  %5896 = vst.msk [vmem:[%s446_s1 + $0x8] sm:$0xf] %vm5895_vm0, %v7678_v18 }
 0x725   : > { %v7682_v0 = vpop.eup %7681 }
 0x726   : > { %v5892_v20 = vcombine.low %v7680_v19, %v7682_v0 }
 0x728   : > { %5894 = vst [vmem:[%s446_s1] sm:$0xff] %v5892_v20 }
 0x729 PF: > { %p7402_p5 = scmp.ge.s32.totalorder %s7777_s24, 2  ;;  %s5955_s3 = sand.u32 1, %s7765_s21  }
 0x72a   : > { %s5956_s15 = scalar_lea.sflag [#allocation4], %s5955_s3 }
 0x72b   : > { %p7396_p7 = pnand %p7402_p5, %p7903_p6 }
 0x72d   : > { %7756 = dma.done.wait (!%p7396_p7), %s5956_s15, 16  }
 0x72e   : > { %7758 = vsyncadd (!%p7396_p7), %s5956_s15, 4294967280  ;;  %s5964_s2 = scalar_lea.sflag [#allocation6], %s5955_s3 }
 0x72f   : > { %7760 = dma.done.wait (!%p7396_p7), %s5964_s2, 16  }
 0x730   : > { %7762 = vsyncadd (!%p7396_p7), %s5964_s2, 4294967280  ;;  %p26_p8 = scmp.ge.s32.totalorder %s7886_s27, 4   ;;  %s9343_s21 = smov %s7769_s22 }
 0x731   : > { %s9344_s22 = smov %s7773_s23  ;;  %s9345_s23 = smov %s7897_s30 }
 0x732   : > { %s9346_s24 = smov %s7886_s27  ;;  %28 = sbr.rel (!%p26_p8) target bundleno = 13 (0xd), region = 171 }
 0x739   :  { %5968 = vsyncpa [#allocation4], 1 }
 0x73a   :  { %5970 = vsyncpa [#allocation4 + $0x1], 1 }
 0x73b   :  { %5971 = vsyncpa [#allocation6], 1 }
 0x73c   :  { %5973 = vsyncpa [#allocation6 + $0x1], 1 }

</bundles_post_ra>
